<compile_context>
chip_gen: v5e
topology: v5e:2x2
jax: 0.10.0
libtpu: 0.0.40
codegen_flags: <defaults>
</compile_context>

<pallas_src>
import functools

import jax
import jax.numpy as jnp
from jax import lax
from jax.experimental import pallas as pl
from jax.experimental.pallas import tpu as pltpu


# ----------------------------- in-kernel math helpers ------------------------

def _erf(x):
    # Abramowitz & Stegun 7.1.26 rational approximation (max abs err ~1.5e-7).
    a1, a2, a3, a4, a5 = 0.254829592, -0.284496736, 1.421413741, -1.453152027, 1.061405429
    p = 0.3275911
    s = jnp.where(x >= 0.0, 1.0, -1.0)
    ax = jnp.abs(x)
    t = 1.0 / (1.0 + p * ax)
    poly = ((((a5 * t + a4) * t + a3) * t + a2) * t + a1) * t
    return s * (1.0 - poly * jnp.exp(-ax * ax))


def _gelu(x):
    # exact (erf-based) GELU, matching torch.nn.GELU() default
    return 0.5 * x * (1.0 + _erf(x * 0.7071067811865476))


def _sigmoid(x):
    return 1.0 / (1.0 + jnp.exp(-x))


# ----------------------------------- kernel ----------------------------------

def _feat_extract_kernel(*refs, H, W, keep_dim):
    if keep_dim:
        x_ref, wdw_ref, w1_ref, w2_ref, wpw_ref, o_ref = refs
        sel_ref = None
    else:
        x_ref, wdw_ref, w1_ref, w2_ref, wpw_ref, sel_ref, o_ref = refs

    HW = H * W
    x = x_ref[...].astype(jnp.float32)            # (R, HW), R = Bt*C (lane-dense)
    wdw = wdw_ref[...]                            # (R, 9)  per-row depthwise taps

    # flat index p = h*W + w along the lane axis; boundary masks for the taps
    p_idx = lax.broadcasted_iota(jnp.int32, (1, HW), 1)
    if W & (W - 1) == 0:
        w_idx = p_idx & (W - 1)
    else:
        w_idx = lax.rem(p_idx, W)
    m_h = {-1: p_idx >= W, 0: None, 1: p_idx < (H - 1) * W}
    m_w = {-1: w_idx >= 1, 0: None, 1: w_idx <= W - 2}

    def shift(v, dh, dw):
        # shifted[r, p] = v[r, p + dh*W + dw]   (circular wrap; callers mask)
        s = dh * W + dw
        if s == 0:
            return v
        return pltpu.roll(v, shift=(-s) % HW, axis=1)

    def tap_mask(dh, dw):
        m = None
        for part in (m_h[dh], m_w[dw]):
            if part is not None:
                m = part if m is None else (m & part)
        return m

    # ---- depthwise 3x3 conv, stride 1, pad 1, groups=C, no bias -------------
    acc = x * wdw[:, 4:5]                         # centre tap (dh=0, dw=0)
    for dh in (-1, 0, 1):
        for dw in (-1, 0, 1):
            if dh == 0 and dw == 0:
                continue
            k = (dh + 1) * 3 + (dw + 1)
            v = shift(x, dh, dw)
            v = jnp.where(tap_mask(dh, dw), v, 0.0)
            acc = acc + v * wdw[:, k:k + 1]
    h = _gelu(acc)                                # (R, HW)

    # ---- Squeeze-and-Excitation (block-diagonal FCs over the packed batch) --
    y = jnp.sum(h, axis=1, keepdims=True) * (1.0 / HW)                        # (R, 1)
    s1 = _gelu(jnp.dot(w1_ref[...], y, preferred_element_type=jnp.float32))   # (Bt*Cr, 1)
    s2 = _sigmoid(jnp.dot(w2_ref[...], s1, preferred_element_type=jnp.float32))  # (R, 1)

    # ---- pointwise 1x1 conv (block-diag weight) + residual -------------------
    h2 = jnp.dot(wpw_ref[...], h * s2, preferred_element_type=jnp.float32)    # (R, HW)
    y_out = x + h2

    if keep_dim:
        o_ref[...] = y_out.astype(o_ref.dtype)    # single full-tile store
        return

    # ---- MaxPool2d(kernel=3, stride=2, padding=1) ----------------------------
    # separable 3x3 neighborhood max via 4 lane rolls, then stride-2 selection
    # as an exact 0/1 matmul; one full-tile store.
    neg = jnp.float32(jnp.finfo(jnp.float32).min)
    hmax = y_out
    hmax = jnp.maximum(hmax, jnp.where(m_w[-1], shift(y_out, 0, -1), neg))
    hmax = jnp.maximum(hmax, jnp.where(m_w[1], shift(y_out, 0, 1), neg))
    m3 = hmax
    m3 = jnp.maximum(m3, jnp.where(m_h[-1], shift(hmax, -1, 0), neg))
    m3 = jnp.maximum(m3, jnp.where(m_h[1], shift(hmax, 1, 0), neg))
    pooled = jnp.dot(m3, sel_ref[...], preferred_element_type=jnp.float32)    # (R, Ho*Wo)
    o_ref[...] = pooled.astype(o_ref.dtype)


# ---------------------------------- wrapper -----------------------------------

def _block_diag(w, bt):
    return jnp.kron(jnp.eye(bt, dtype=w.dtype), w)


def _pick_bt(b):
    for cand in (4, 2, 1):
        if b % cand == 0:
            return cand
    return 1


def feat_extract_pallas(x_nchw, params, keep_dim=False):
    """params = (w_dw (C,1,3,3), w_fc1 (Cr,C), w_fc2 (C,Cr), w_pw (C,C,1,1))."""
    w_dw, w1, w2, w_pw = params
    B, C, H, W = x_nchw.shape
    HW = H * W
    bt = _pick_bt(B)
    R = bt * C
    assert R % 8 == 0, "Bt*C must be a multiple of 8 (sublane tiling)"

    f32 = jnp.float32
    # one-time weight prep (no per-step casts inside the kernel)
    wdw_rows = jnp.tile(w_dw.reshape(C, 9).astype(f32), (bt, 1))      # (R, 9)
    w1_blk = _block_diag(w1.astype(f32), bt)                          # (bt*Cr, R)
    w2_blk = _block_diag(w2.astype(f32), bt)                          # (R, bt*Cr)
    wpw_blk = _block_diag(w_pw[:, :, 0, 0].astype(f32), bt)           # (R, R)

    x_flat = x_nchw.reshape(B * C, HW)            # row = (b, c); lane = h*W + w

    if keep_dim:
        Ho, Wo = H, W
        out_cols = HW
        sel = None
    else:
        Ho, Wo = (H - 1) // 2 + 1, (W - 1) // 2 + 1
        out_cols = Ho * Wo
        po = jnp.arange(out_cols)
        src = (2 * (po // Wo)) * W + 2 * (po % Wo)
        sel = (jnp.arange(HW)[:, None] == src[None, :]).astype(f32)   # (HW, Ho*Wo)

    in_arrays = [x_flat, wdw_rows, w1_blk, w2_blk, wpw_blk]
    in_specs = [
        pl.BlockSpec((R, HW), lambda b: (b, 0)),
        pl.BlockSpec(wdw_rows.shape, lambda b: (0, 0)),
        pl.BlockSpec(w1_blk.shape, lambda b: (0, 0)),
        pl.BlockSpec(w2_blk.shape, lambda b: (0, 0)),
        pl.BlockSpec(wpw_blk.shape, lambda b: (0, 0)),
    ]
    if not keep_dim:
        in_arrays.append(sel)
        in_specs.append(pl.BlockSpec(sel.shape, lambda b: (0, 0)))

    kernel = functools.partial(_feat_extract_kernel, H=H, W=W, keep_dim=keep_dim)

    out_flat = pl.pallas_call(
        kernel,
        out_shape=jax.ShapeDtypeStruct((B * C, out_cols), x_nchw.dtype),
        grid_spec=pltpu.PrefetchScalarGridSpec(
            num_scalar_prefetch=0,
            grid=(B // bt,),
            in_specs=in_specs,
            out_specs=pl.BlockSpec((R, out_cols), lambda b: (b, 0)),
        ),
        compiler_params=pltpu.CompilerParams(
            dimension_semantics=("parallel",)),      # feeds both TCs on v7x when B//bt >= 2
    )(*in_arrays)

    return out_flat.reshape(B, C, Ho, Wo)


# ----------------------------- pure-JAX reference ------------------------------

def feat_extract_ref(x_nchw, params, keep_dim=False):
    w_dw, w1, w2, w_pw = params
    B, C, H, W = x_nchw.shape
    h = lax.conv_general_dilated(
        x_nchw, w_dw, window_strides=(1, 1), padding=((1, 1), (1, 1)),
        feature_group_count=C, dimension_numbers=("NCHW", "OIHW", "NCHW"))
    h = jax.nn.gelu(h, approximate=False)
    y = jnp.mean(h, axis=(2, 3))                                     # (B, C)
    s = jax.nn.gelu(y @ w1.T, approximate=False)
    s = jax.nn.sigmoid(s @ w2.T)
    h = h * s[:, :, None, None]
    h = jnp.einsum("bchw,oc->bohw", h, w_pw[:, :, 0, 0])
    out = x_nchw + h
    if not keep_dim:
        out = lax.reduce_window(out, -jnp.inf, lax.max,
                                (1, 1, 3, 3), (1, 1, 2, 2),
                                ((0, 0), (0, 0), (1, 1), (1, 1)))
    return out


# ------------------------------------ main -------------------------------------

if __name__ == "__main__":
    B, C, H, W = 2, 32, 16, 16
    Cr = int(C * 0.25)

    key = jax.random.PRNGKey(0)
    kx, k1, k2, k3, k4 = jax.random.split(key, 5)
    x = jax.random.normal(kx, (B, C, H, W), jnp.float32)
    w_dw = jax.random.normal(k1, (C, 1, 3, 3), jnp.float32) * 0.2
    w_fc1 = jax.random.normal(k2, (Cr, C), jnp.float32) * 0.2
    w_fc2 = jax.random.normal(k3, (C, Cr), jnp.float32) * 0.2
    w_pw = jax.random.normal(k4, (C, C, 1, 1), jnp.float32) * 0.2
    params = (w_dw, w_fc1, w_fc2, w_pw)

    # keep_dim=False (default FeatExtract behaviour: with max-pool)
    out = jax.block_until_ready(feat_extract_pallas(x, params, keep_dim=False))
    ref = feat_extract_ref(x, params, keep_dim=False)
    assert out.shape == ref.shape == (B, C, H // 2, W // 2)
    err = float(jnp.max(jnp.abs(out - ref)))
    if err > 1e-3:
        raise AssertionError(f"keep_dim=False mismatch vs reference: {err}")

    # keep_dim=True (no pooling)
    out_k = jax.block_until_ready(feat_extract_pallas(x, params, keep_dim=True))
    ref_k = feat_extract_ref(x, params, keep_dim=True)
    assert out_k.shape == ref_k.shape == (B, C, H, W)
    err_k = float(jnp.max(jnp.abs(out_k - ref_k)))
    if err_k > 1e-3:
        raise AssertionError(f"keep_dim=True mismatch vs reference: {err_k}")

    print("KERNEL_OK")
</pallas_src>

<mosaic_0001>
module attributes {stable_mosaic.version = 11 : i64} {
  func.func @_feat_extract_kernel(%arg0: i32, %arg1: memref<64x256xf32, #tpu.memory_space<vmem>>, %arg2: memref<64x9xf32, #tpu.memory_space<vmem>>, %arg3: memref<16x64xf32, #tpu.memory_space<vmem>>, %arg4: memref<64x16xf32, #tpu.memory_space<vmem>>, %arg5: memref<64x64xf32, #tpu.memory_space<vmem>>, %arg6: memref<256x64xf32, #tpu.memory_space<vmem>>, %arg7: memref<64x64xf32, #tpu.memory_space<vmem>>) attributes {dimension_semantics = [#tpu.dimension_semantics<parallel>], iteration_bounds = array<i64: 1>, scalar_prefetch = 0 : i64, scratch_operands = 0 : i64, tpu.core_type = #tpu.core_type<tc>, window_params = [{transform_indices = @transform_0, window_bounds = array<i64: 64, 256>}, {pipeline_mode = #tpu.pipeline_mode<synchronous>, transform_indices = @transform_1, window_bounds = array<i64: 64, 9>}, {pipeline_mode = #tpu.pipeline_mode<synchronous>, transform_indices = @transform_2, window_bounds = array<i64: 16, 64>}, {pipeline_mode = #tpu.pipeline_mode<synchronous>, transform_indices = @transform_3, window_bounds = array<i64: 64, 16>}, {pipeline_mode = #tpu.pipeline_mode<synchronous>, transform_indices = @transform_4, window_bounds = array<i64: 64, 64>}, {pipeline_mode = #tpu.pipeline_mode<synchronous>, transform_indices = @transform_5, window_bounds = array<i64: 256, 64>}, {transform_indices = @transform_6, window_bounds = array<i64: 64, 64>}]} {
    %c0 = arith.constant 0 : index
    %c0_0 = arith.constant 0 : index
    %0 = vector.load %arg1[%c0, %c0_0] : memref<64x256xf32, #tpu.memory_space<vmem>>, vector<64x256xf32>
    %c0_1 = arith.constant 0 : index
    %c0_2 = arith.constant 0 : index
    %1 = vector.load %arg2[%c0_1, %c0_2] : memref<64x9xf32, #tpu.memory_space<vmem>>, vector<64x9xf32>
    %2 = tpu.iota {dimensions = array<i32: 1>} : vector<1x256xi32>
    %c15_i32 = arith.constant 15 : i32
    %3 = vector.broadcast %c15_i32 : i32 to vector<1x256xi32>
    %4 = arith.andi %2, %3 : vector<1x256xi32>
    %c16_i32 = arith.constant 16 : i32
    %5 = vector.broadcast %c16_i32 : i32 to vector<1x256xi32>
    %6 = arith.cmpi sge, %2, %5 : vector<1x256xi32>
    %c240_i32 = arith.constant 240 : i32
    %7 = vector.broadcast %c240_i32 : i32 to vector<1x256xi32>
    %8 = arith.cmpi slt, %2, %7 : vector<1x256xi32>
    %c1_i32 = arith.constant 1 : i32
    %9 = vector.broadcast %c1_i32 : i32 to vector<1x256xi32>
    %10 = arith.cmpi sge, %4, %9 : vector<1x256xi32>
    %c14_i32 = arith.constant 14 : i32
    %11 = vector.broadcast %c14_i32 : i32 to vector<1x256xi32>
    %12 = arith.cmpi sle, %4, %11 : vector<1x256xi32>
    %13 = vector.extract_strided_slice %1 {offsets = [0, 4], sizes = [64, 1], strides = [1, 1]} : vector<64x9xf32> to vector<64x1xf32>
    %14 = vector.broadcast %13 : vector<64x1xf32> to vector<64x256xf32>
    %15 = arith.mulf %0, %14 : vector<64x256xf32>
    %c17_i32 = arith.constant 17 : i32
    %16 = tpu.dynamic_rotate %0 by %c17_i32 dim 1 : vector<64x256xf32>, i32 -> vector<64x256xf32>
    %17 = arith.andi %6, %10 : vector<1x256xi1>
    %cst = arith.constant 0.000000e+00 : f32
    %18 = vector.shape_cast %17 : vector<1x256xi1> to vector<1x256xi1>
    %19 = vector.broadcast %18 : vector<1x256xi1> to vector<64x256xi1>
    %20 = vector.broadcast %cst : f32 to vector<64x256xf32>
    %21 = arith.select %19, %16, %20 : vector<64x256xi1>, vector<64x256xf32>
    %22 = vector.extract_strided_slice %1 {offsets = [0, 0], sizes = [64, 1], strides = [1, 1]} : vector<64x9xf32> to vector<64x1xf32>
    %23 = vector.broadcast %22 : vector<64x1xf32> to vector<64x256xf32>
    %24 = arith.mulf %21, %23 : vector<64x256xf32>
    %25 = arith.addf %15, %24 : vector<64x256xf32>
    %c16_i32_3 = arith.constant 16 : i32
    %26 = tpu.dynamic_rotate %0 by %c16_i32_3 dim 1 : vector<64x256xf32>, i32 -> vector<64x256xf32>
    %cst_4 = arith.constant 0.000000e+00 : f32
    %27 = vector.shape_cast %6 : vector<1x256xi1> to vector<1x256xi1>
    %28 = vector.broadcast %27 : vector<1x256xi1> to vector<64x256xi1>
    %29 = vector.broadcast %cst_4 : f32 to vector<64x256xf32>
    %30 = arith.select %28, %26, %29 : vector<64x256xi1>, vector<64x256xf32>
    %31 = vector.extract_strided_slice %1 {offsets = [0, 1], sizes = [64, 1], strides = [1, 1]} : vector<64x9xf32> to vector<64x1xf32>
    %32 = vector.broadcast %31 : vector<64x1xf32> to vector<64x256xf32>
    %33 = arith.mulf %30, %32 : vector<64x256xf32>
    %34 = arith.addf %25, %33 : vector<64x256xf32>
    %c15_i32_5 = arith.constant 15 : i32
    %35 = tpu.dynamic_rotate %0 by %c15_i32_5 dim 1 : vector<64x256xf32>, i32 -> vector<64x256xf32>
    %36 = arith.andi %6, %12 : vector<1x256xi1>
    %cst_6 = arith.constant 0.000000e+00 : f32
    %37 = vector.shape_cast %36 : vector<1x256xi1> to vector<1x256xi1>
    %38 = vector.broadcast %37 : vector<1x256xi1> to vector<64x256xi1>
    %39 = vector.broadcast %cst_6 : f32 to vector<64x256xf32>
    %40 = arith.select %38, %35, %39 : vector<64x256xi1>, vector<64x256xf32>
    %41 = vector.extract_strided_slice %1 {offsets = [0, 2], sizes = [64, 1], strides = [1, 1]} : vector<64x9xf32> to vector<64x1xf32>
    %42 = vector.broadcast %41 : vector<64x1xf32> to vector<64x256xf32>
    %43 = arith.mulf %40, %42 : vector<64x256xf32>
    %44 = arith.addf %34, %43 : vector<64x256xf32>
    %c1_i32_7 = arith.constant 1 : i32
    %45 = tpu.dynamic_rotate %0 by %c1_i32_7 dim 1 : vector<64x256xf32>, i32 -> vector<64x256xf32>
    %cst_8 = arith.constant 0.000000e+00 : f32
    %46 = vector.shape_cast %10 : vector<1x256xi1> to vector<1x256xi1>
    %47 = vector.broadcast %46 : vector<1x256xi1> to vector<64x256xi1>
    %48 = vector.broadcast %cst_8 : f32 to vector<64x256xf32>
    %49 = arith.select %47, %45, %48 : vector<64x256xi1>, vector<64x256xf32>
    %50 = vector.extract_strided_slice %1 {offsets = [0, 3], sizes = [64, 1], strides = [1, 1]} : vector<64x9xf32> to vector<64x1xf32>
    %51 = vector.broadcast %50 : vector<64x1xf32> to vector<64x256xf32>
    %52 = arith.mulf %49, %51 : vector<64x256xf32>
    %53 = arith.addf %44, %52 : vector<64x256xf32>
    %c255_i32 = arith.constant 255 : i32
    %54 = tpu.dynamic_rotate %0 by %c255_i32 dim 1 : vector<64x256xf32>, i32 -> vector<64x256xf32>
    %cst_9 = arith.constant 0.000000e+00 : f32
    %55 = vector.shape_cast %12 : vector<1x256xi1> to vector<1x256xi1>
    %56 = vector.broadcast %55 : vector<1x256xi1> to vector<64x256xi1>
    %57 = vector.broadcast %cst_9 : f32 to vector<64x256xf32>
    %58 = arith.select %56, %54, %57 : vector<64x256xi1>, vector<64x256xf32>
    %59 = vector.extract_strided_slice %1 {offsets = [0, 5], sizes = [64, 1], strides = [1, 1]} : vector<64x9xf32> to vector<64x1xf32>
    %60 = vector.broadcast %59 : vector<64x1xf32> to vector<64x256xf32>
    %61 = arith.mulf %58, %60 : vector<64x256xf32>
    %62 = arith.addf %53, %61 : vector<64x256xf32>
    %c241_i32 = arith.constant 241 : i32
    %63 = tpu.dynamic_rotate %0 by %c241_i32 dim 1 : vector<64x256xf32>, i32 -> vector<64x256xf32>
    %64 = arith.andi %8, %10 : vector<1x256xi1>
    %cst_10 = arith.constant 0.000000e+00 : f32
    %65 = vector.shape_cast %64 : vector<1x256xi1> to vector<1x256xi1>
    %66 = vector.broadcast %65 : vector<1x256xi1> to vector<64x256xi1>
    %67 = vector.broadcast %cst_10 : f32 to vector<64x256xf32>
    %68 = arith.select %66, %63, %67 : vector<64x256xi1>, vector<64x256xf32>
    %69 = vector.extract_strided_slice %1 {offsets = [0, 6], sizes = [64, 1], strides = [1, 1]} : vector<64x9xf32> to vector<64x1xf32>
    %70 = vector.broadcast %69 : vector<64x1xf32> to vector<64x256xf32>
    %71 = arith.mulf %68, %70 : vector<64x256xf32>
    %72 = arith.addf %62, %71 : vector<64x256xf32>
    %c240_i32_11 = arith.constant 240 : i32
    %73 = tpu.dynamic_rotate %0 by %c240_i32_11 dim 1 : vector<64x256xf32>, i32 -> vector<64x256xf32>
    %cst_12 = arith.constant 0.000000e+00 : f32
    %74 = vector.shape_cast %8 : vector<1x256xi1> to vector<1x256xi1>
    %75 = vector.broadcast %74 : vector<1x256xi1> to vector<64x256xi1>
    %76 = vector.broadcast %cst_12 : f32 to vector<64x256xf32>
    %77 = arith.select %75, %73, %76 : vector<64x256xi1>, vector<64x256xf32>
    %78 = vector.extract_strided_slice %1 {offsets = [0, 7], sizes = [64, 1], strides = [1, 1]} : vector<64x9xf32> to vector<64x1xf32>
    %79 = vector.broadcast %78 : vector<64x1xf32> to vector<64x256xf32>
    %80 = arith.mulf %77, %79 : vector<64x256xf32>
    %81 = arith.addf %72, %80 : vector<64x256xf32>
    %c239_i32 = arith.constant 239 : i32
    %82 = tpu.dynamic_rotate %0 by %c239_i32 dim 1 : vector<64x256xf32>, i32 -> vector<64x256xf32>
    %83 = arith.andi %8, %12 : vector<1x256xi1>
    %cst_13 = arith.constant 0.000000e+00 : f32
    %84 = vector.shape_cast %83 : vector<1x256xi1> to vector<1x256xi1>
    %85 = vector.broadcast %84 : vector<1x256xi1> to vector<64x256xi1>
    %86 = vector.broadcast %cst_13 : f32 to vector<64x256xf32>
    %87 = arith.select %85, %82, %86 : vector<64x256xi1>, vector<64x256xf32>
    %88 = vector.extract_strided_slice %1 {offsets = [0, 8], sizes = [64, 1], strides = [1, 1]} : vector<64x9xf32> to vector<64x1xf32>
    %89 = vector.broadcast %88 : vector<64x1xf32> to vector<64x256xf32>
    %90 = arith.mulf %87, %89 : vector<64x256xf32>
    %91 = arith.addf %81, %90 : vector<64x256xf32>
    %cst_14 = arith.constant 5.000000e-01 : f32
    %92 = vector.broadcast %cst_14 : f32 to vector<64x256xf32>
    %93 = arith.mulf %92, %91 : vector<64x256xf32>
    %cst_15 = arith.constant 0.707106769 : f32
    %94 = vector.broadcast %cst_15 : f32 to vector<64x256xf32>
    %95 = arith.mulf %91, %94 : vector<64x256xf32>
    %cst_16 = arith.constant 0.000000e+00 : f32
    %96 = vector.broadcast %cst_16 : f32 to vector<64x256xf32>
    %97 = arith.cmpf oge, %95, %96 : vector<64x256xf32>
    %cst_17 = arith.constant 1.000000e+00 : f32
    %cst_18 = arith.constant -1.000000e+00 : f32
    %98 = vector.broadcast %cst_17 : f32 to vector<64x256xf32>
    %99 = vector.broadcast %cst_18 : f32 to vector<64x256xf32>
    %100 = arith.select %97, %98, %99 : vector<64x256xi1>, vector<64x256xf32>
    %101 = math.absf %95 : vector<64x256xf32>
    %cst_19 = arith.constant 0.327591091 : f32
    %102 = vector.broadcast %cst_19 : f32 to vector<64x256xf32>
    %103 = arith.mulf %102, %101 : vector<64x256xf32>
    %cst_20 = arith.constant 1.000000e+00 : f32
    %104 = vector.broadcast %cst_20 : f32 to vector<64x256xf32>
    %105 = arith.addf %104, %103 : vector<64x256xf32>
    %cst_21 = arith.constant 1.000000e+00 : f32
    %106 = vector.broadcast %cst_21 : f32 to vector<64x256xf32>
    %107 = arith.divf %106, %105 : vector<64x256xf32>
    %cst_22 = arith.constant 1.06140542 : f32
    %108 = vector.broadcast %cst_22 : f32 to vector<64x256xf32>
    %109 = arith.mulf %108, %107 : vector<64x256xf32>
    %cst_23 = arith.constant -1.45315206 : f32
    %110 = vector.broadcast %cst_23 : f32 to vector<64x256xf32>
    %111 = arith.addf %109, %110 : vector<64x256xf32>
    %112 = arith.mulf %111, %107 : vector<64x256xf32>
    %cst_24 = arith.constant 1.42141378 : f32
    %113 = vector.broadcast %cst_24 : f32 to vector<64x256xf32>
    %114 = arith.addf %112, %113 : vector<64x256xf32>
    %115 = arith.mulf %114, %107 : vector<64x256xf32>
    %cst_25 = arith.constant -0.284496725 : f32
    %116 = vector.broadcast %cst_25 : f32 to vector<64x256xf32>
    %117 = arith.addf %115, %116 : vector<64x256xf32>
    %118 = arith.mulf %117, %107 : vector<64x256xf32>
    %cst_26 = arith.constant 0.254829586 : f32
    %119 = vector.broadcast %cst_26 : f32 to vector<64x256xf32>
    %120 = arith.addf %118, %119 : vector<64x256xf32>
    %121 = arith.mulf %120, %107 : vector<64x256xf32>
    %cst_27 = arith.constant 0.000000e+00 : f32
    %122 = vector.broadcast %cst_27 : f32 to vector<64x256xf32>
    %123 = arith.subf %122, %101 : vector<64x256xf32>
    %124 = arith.mulf %123, %101 : vector<64x256xf32>
    %125 = math.exp %124 : vector<64x256xf32>
    %126 = arith.mulf %121, %125 : vector<64x256xf32>
    %cst_28 = arith.constant 1.000000e+00 : f32
    %127 = vector.broadcast %cst_28 : f32 to vector<64x256xf32>
    %128 = arith.subf %127, %126 : vector<64x256xf32>
    %129 = arith.mulf %100, %128 : vector<64x256xf32>
    %cst_29 = arith.constant 1.000000e+00 : f32
    %130 = vector.broadcast %cst_29 : f32 to vector<64x256xf32>
    %131 = arith.addf %130, %129 : vector<64x256xf32>
    %132 = arith.mulf %93, %131 : vector<64x256xf32>
    %cst_30 = arith.constant dense<0.000000e+00> : vector<64xf32>
    %133 = vector.multi_reduction <add>, %132, %cst_30 [1] : vector<64x256xf32> to vector<64xf32>
    %134 = vector.shape_cast %133 : vector<64xf32> to vector<64x1xf32>
    %cst_31 = arith.constant 3.906250e-03 : f32
    %135 = vector.broadcast %cst_31 : f32 to vector<64x1xf32>
    %136 = arith.mulf %134, %135 : vector<64x1xf32>
    %c0_32 = arith.constant 0 : index
    %c0_33 = arith.constant 0 : index
    %137 = vector.load %arg3[%c0_32, %c0_33] : memref<16x64xf32, #tpu.memory_space<vmem>>, vector<16x64xf32>
    %cst_34 = arith.constant dense<0.000000e+00> : vector<16x1xf32>
    %138 = tpu.matmul %137, %136, %cst_34 {dimension_numbers = #tpu.dot_dimension_numbers<[1], [0], [0], [1], [0, 0, 1, 1], [], []>} : vector<16x64xf32>, vector<64x1xf32>, vector<16x1xf32> -> vector<16x1xf32>
    %cst_35 = arith.constant 5.000000e-01 : f32
    %139 = vector.broadcast %cst_35 : f32 to vector<16x1xf32>
    %140 = arith.mulf %139, %138 : vector<16x1xf32>
    %cst_36 = arith.constant 0.707106769 : f32
    %141 = vector.broadcast %cst_36 : f32 to vector<16x1xf32>
    %142 = arith.mulf %138, %141 : vector<16x1xf32>
    %cst_37 = arith.constant 0.000000e+00 : f32
    %143 = vector.broadcast %cst_37 : f32 to vector<16x1xf32>
    %144 = arith.cmpf oge, %142, %143 : vector<16x1xf32>
    %cst_38 = arith.constant 1.000000e+00 : f32
    %cst_39 = arith.constant -1.000000e+00 : f32
    %145 = vector.broadcast %cst_38 : f32 to vector<16x1xf32>
    %146 = vector.broadcast %cst_39 : f32 to vector<16x1xf32>
    %147 = arith.select %144, %145, %146 : vector<16x1xi1>, vector<16x1xf32>
    %148 = math.absf %142 : vector<16x1xf32>
    %cst_40 = arith.constant 0.327591091 : f32
    %149 = vector.broadcast %cst_40 : f32 to vector<16x1xf32>
    %150 = arith.mulf %149, %148 : vector<16x1xf32>
    %cst_41 = arith.constant 1.000000e+00 : f32
    %151 = vector.broadcast %cst_41 : f32 to vector<16x1xf32>
    %152 = arith.addf %151, %150 : vector<16x1xf32>
    %cst_42 = arith.constant 1.000000e+00 : f32
    %153 = vector.broadcast %cst_42 : f32 to vector<16x1xf32>
    %154 = arith.divf %153, %152 : vector<16x1xf32>
    %cst_43 = arith.constant 1.06140542 : f32
    %155 = vector.broadcast %cst_43 : f32 to vector<16x1xf32>
    %156 = arith.mulf %155, %154 : vector<16x1xf32>
    %cst_44 = arith.constant -1.45315206 : f32
    %157 = vector.broadcast %cst_44 : f32 to vector<16x1xf32>
    %158 = arith.addf %156, %157 : vector<16x1xf32>
    %159 = arith.mulf %158, %154 : vector<16x1xf32>
    %cst_45 = arith.constant 1.42141378 : f32
    %160 = vector.broadcast %cst_45 : f32 to vector<16x1xf32>
    %161 = arith.addf %159, %160 : vector<16x1xf32>
    %162 = arith.mulf %161, %154 : vector<16x1xf32>
    %cst_46 = arith.constant -0.284496725 : f32
    %163 = vector.broadcast %cst_46 : f32 to vector<16x1xf32>
    %164 = arith.addf %162, %163 : vector<16x1xf32>
    %165 = arith.mulf %164, %154 : vector<16x1xf32>
    %cst_47 = arith.constant 0.254829586 : f32
    %166 = vector.broadcast %cst_47 : f32 to vector<16x1xf32>
    %167 = arith.addf %165, %166 : vector<16x1xf32>
    %168 = arith.mulf %167, %154 : vector<16x1xf32>
    %cst_48 = arith.constant 0.000000e+00 : f32
    %169 = vector.broadcast %cst_48 : f32 to vector<16x1xf32>
    %170 = arith.subf %169, %148 : vector<16x1xf32>
    %171 = arith.mulf %170, %148 : vector<16x1xf32>
    %172 = math.exp %171 : vector<16x1xf32>
    %173 = arith.mulf %168, %172 : vector<16x1xf32>
    %cst_49 = arith.constant 1.000000e+00 : f32
    %174 = vector.broadcast %cst_49 : f32 to vector<16x1xf32>
    %175 = arith.subf %174, %173 : vector<16x1xf32>
    %176 = arith.mulf %147, %175 : vector<16x1xf32>
    %cst_50 = arith.constant 1.000000e+00 : f32
    %177 = vector.broadcast %cst_50 : f32 to vector<16x1xf32>
    %178 = arith.addf %177, %176 : vector<16x1xf32>
    %179 = arith.mulf %140, %178 : vector<16x1xf32>
    %c0_51 = arith.constant 0 : index
    %c0_52 = arith.constant 0 : index
    %180 = vector.load %arg4[%c0_51, %c0_52] : memref<64x16xf32, #tpu.memory_space<vmem>>, vector<64x16xf32>
    %cst_53 = arith.constant dense<0.000000e+00> : vector<64x1xf32>
    %181 = tpu.matmul %180, %179, %cst_53 {dimension_numbers = #tpu.dot_dimension_numbers<[1], [0], [0], [1], [0, 0, 1, 1], [], []>} : vector<64x16xf32>, vector<16x1xf32>, vector<64x1xf32> -> vector<64x1xf32>
    %cst_54 = arith.constant 0.000000e+00 : f32
    %182 = vector.broadcast %cst_54 : f32 to vector<64x1xf32>
    %183 = arith.subf %182, %181 : vector<64x1xf32>
    %184 = math.exp %183 : vector<64x1xf32>
    %cst_55 = arith.constant 1.000000e+00 : f32
    %185 = vector.broadcast %cst_55 : f32 to vector<64x1xf32>
    %186 = arith.addf %185, %184 : vector<64x1xf32>
    %cst_56 = arith.constant 1.000000e+00 : f32
    %187 = vector.broadcast %cst_56 : f32 to vector<64x1xf32>
    %188 = arith.divf %187, %186 : vector<64x1xf32>
    %c0_57 = arith.constant 0 : index
    %c0_58 = arith.constant 0 : index
    %189 = vector.load %arg5[%c0_57, %c0_58] : memref<64x64xf32, #tpu.memory_space<vmem>>, vector<64x64xf32>
    %190 = vector.broadcast %188 : vector<64x1xf32> to vector<64x256xf32>
    %191 = arith.mulf %132, %190 : vector<64x256xf32>
    %cst_59 = arith.constant dense<0.000000e+00> : vector<64x256xf32>
    %192 = tpu.matmul %189, %191, %cst_59 {dimension_numbers = #tpu.dot_dimension_numbers<[1], [0], [0], [1], [0, 0, 1, 1], [], []>} : vector<64x64xf32>, vector<64x256xf32>, vector<64x256xf32> -> vector<64x256xf32>
    %193 = arith.addf %0, %192 : vector<64x256xf32>
    %c1_i32_60 = arith.constant 1 : i32
    %194 = tpu.dynamic_rotate %193 by %c1_i32_60 dim 1 : vector<64x256xf32>, i32 -> vector<64x256xf32>
    %cst_61 = arith.constant -3.40282347E+38 : f32
    %195 = vector.shape_cast %10 : vector<1x256xi1> to vector<1x256xi1>
    %196 = vector.broadcast %195 : vector<1x256xi1> to vector<64x256xi1>
    %197 = vector.broadcast %cst_61 : f32 to vector<64x256xf32>
    %198 = arith.select %196, %194, %197 : vector<64x256xi1>, vector<64x256xf32>
    %199 = arith.maximumf %193, %198 : vector<64x256xf32>
    %c255_i32_62 = arith.constant 255 : i32
    %200 = tpu.dynamic_rotate %193 by %c255_i32_62 dim 1 : vector<64x256xf32>, i32 -> vector<64x256xf32>
    %cst_63 = arith.constant -3.40282347E+38 : f32
    %201 = vector.shape_cast %12 : vector<1x256xi1> to vector<1x256xi1>
    %202 = vector.broadcast %201 : vector<1x256xi1> to vector<64x256xi1>
    %203 = vector.broadcast %cst_63 : f32 to vector<64x256xf32>
    %204 = arith.select %202, %200, %203 : vector<64x256xi1>, vector<64x256xf32>
    %205 = arith.maximumf %199, %204 : vector<64x256xf32>
    %c16_i32_64 = arith.constant 16 : i32
    %206 = tpu.dynamic_rotate %205 by %c16_i32_64 dim 1 : vector<64x256xf32>, i32 -> vector<64x256xf32>
    %cst_65 = arith.constant -3.40282347E+38 : f32
    %207 = vector.shape_cast %6 : vector<1x256xi1> to vector<1x256xi1>
    %208 = vector.broadcast %207 : vector<1x256xi1> to vector<64x256xi1>
    %209 = vector.broadcast %cst_65 : f32 to vector<64x256xf32>
    %210 = arith.select %208, %206, %209 : vector<64x256xi1>, vector<64x256xf32>
    %211 = arith.maximumf %205, %210 : vector<64x256xf32>
    %c240_i32_66 = arith.constant 240 : i32
    %212 = tpu.dynamic_rotate %205 by %c240_i32_66 dim 1 : vector<64x256xf32>, i32 -> vector<64x256xf32>
    %cst_67 = arith.constant -3.40282347E+38 : f32
    %213 = vector.shape_cast %8 : vector<1x256xi1> to vector<1x256xi1>
    %214 = vector.broadcast %213 : vector<1x256xi1> to vector<64x256xi1>
    %215 = vector.broadcast %cst_67 : f32 to vector<64x256xf32>
    %216 = arith.select %214, %212, %215 : vector<64x256xi1>, vector<64x256xf32>
    %217 = arith.maximumf %211, %216 : vector<64x256xf32>
    %c0_68 = arith.constant 0 : index
    %c0_69 = arith.constant 0 : index
    %218 = vector.load %arg6[%c0_68, %c0_69] : memref<256x64xf32, #tpu.memory_space<vmem>>, vector<256x64xf32>
    %cst_70 = arith.constant dense<0.000000e+00> : vector<64x64xf32>
    %219 = tpu.matmul %217, %218, %cst_70 {dimension_numbers = #tpu.dot_dimension_numbers<[1], [0], [0], [1], [0, 0, 1, 1], [], []>} : vector<64x256xf32>, vector<256x64xf32>, vector<64x64xf32> -> vector<64x64xf32>
    %c0_71 = arith.constant 0 : index
    %c0_72 = arith.constant 0 : index
    %220 = vector.load %arg7[%c0_71, %c0_72] : memref<64x64xf32, #tpu.memory_space<vmem>>, vector<64x64xf32>
    tpu.vector_store %arg7[%c0_71, %c0_72], %219 {strides = array<i32>} : memref<64x64xf32, #tpu.memory_space<vmem>>, vector<64x64xf32>,
    return
  }
  func.func @transform_0(%arg0: i32) -> (i32, i32) {
    %c0_i32 = arith.constant 0 : i32
    %c0_i32_0 = arith.constant 0 : i32
    return %arg0, %c0_i32 : i32, i32
  }
  func.func @transform_1(%arg0: i32) -> (i32, i32) {
    %c0_i32 = arith.constant 0 : i32
    %c0_i32_0 = arith.constant 0 : i32
    %c0_i32_1 = arith.constant 0 : i32
    return %c0_i32, %c0_i32_0 : i32, i32
  }
  func.func @transform_2(%arg0: i32) -> (i32, i32) {
    %c0_i32 = arith.constant 0 : i32
    %c0_i32_0 = arith.constant 0 : i32
    %c0_i32_1 = arith.constant 0 : i32
    return %c0_i32, %c0_i32_0 : i32, i32
  }
  func.func @transform_3(%arg0: i32) -> (i32, i32) {
    %c0_i32 = arith.constant 0 : i32
    %c0_i32_0 = arith.constant 0 : i32
    %c0_i32_1 = arith.constant 0 : i32
    return %c0_i32, %c0_i32_0 : i32, i32
  }
  func.func @transform_4(%arg0: i32) -> (i32, i32) {
    %c0_i32 = arith.constant 0 : i32
    %c0_i32_0 = arith.constant 0 : i32
    %c0_i32_1 = arith.constant 0 : i32
    return %c0_i32, %c0_i32_0 : i32, i32
  }
  func.func @transform_5(%arg0: i32) -> (i32, i32) {
    %c0_i32 = arith.constant 0 : i32
    %c0_i32_0 = arith.constant 0 : i32
    %c0_i32_1 = arith.constant 0 : i32
    return %c0_i32, %c0_i32_0 : i32, i32
  }
  func.func @transform_6(%arg0: i32) -> (i32, i32) {
    %c0_i32 = arith.constant 0 : i32
    %c0_i32_0 = arith.constant 0 : i32
    return %arg0, %c0_i32 : i32, i32
  }
}

</mosaic_0001>

<bundles_post_ra>
// kernel: tpu_custom_call.1
= control target key start
LH: loop header
LB: loop body
LE: loop exit
PB: predicated region body
PF: predicated region fallthrough
CT: control target
= control target key end

     0   :  { %v3281_v3 = vmov 4   ;;  %s6855_s0 = inlined_call_operand.vmem [shape: f32[64,256], index: 0, kind: input, shape index: {}]   ;;  %s6856_s1 = inlined_call_operand.vmem [shape: f32[64,9], index: 1, kind: input, shape index: {}]   ;;  %s6857_s2 = inlined_call_operand.vmem [shape: f32[16,64], index: 2, kind: input, shape index: {}]   ;;  %s6858_s3 = inlined_call_operand.vmem [shape: f32[64,16], index: 3, kind: input, shape index: {}]   ;;  %s6859_s4 = inlined_call_operand.vmem [shape: f32[64,64], index: 4, kind: input, shape index: {}]   ;;  %s6860_s5 = inlined_call_operand.vmem [shape: f32[256,64], index: 5, kind: input, shape index: {}]   ;;  %s6861_s6 = inlined_call_operand.hbm [shape: f32[64,64], index: 6, kind: output, shape index: {}]  }
   0x1   :  { %v3340_v0 = vld [vmem:[%s6856_s1 + $0x20] sm:$0xff]  ;;  %v3345_v1 = vld [vmem:[%s6856_s1 + $0x10] sm:$0xff]  ;;  %2896 = vset.pattern.permute.xlu2 %v3281_v3  ;;  %2895 = vset.pattern.permute.xlu1 %v3281_v3 }
   0x2   :  { %7009 = vst [vmem:[#allocation5_spill] sm:$0xff] %v3345_v1  ;;  %v3350_v2 = vld [vmem:[%s6856_s1] sm:$0xff]  ;;  %2894 = vset.pattern.permute.xlu0 %v3281_v3  ;;  %83 = vperm.xlu2 %2896, %v3340_v0  }
   0x3   :  { %73 = vperm.xlu1 %2895, %v3345_v1   ;;  %63 = vperm.xlu0 %2894, %v3350_v2  }
   0x4   :  { %11 = vsyncpa [#allocation3], 0  ;;  %v3358_v4 = vld [vmem:[%s6856_s1 + $0x28] sm:$0xff]  ;;  %v3363_v5 = vld [vmem:[%s6856_s1 + $0x18] sm:$0xff]  ;;  %s3282_s15 = smov 17   ;;  %v6868_v10 = vmov 0  }
   0x5   :  { %v3368_v6 = vld [vmem:[%s6856_s1 + $0x8] sm:$0xff]  ;;  %v3376_v7 = vld [vmem:[%s6855_s0] sm:$0xff]  ;;  %v3381_v8 = vld [vmem:[%s6856_s1 + $0x38] sm:$0xff]  ;;  %s3284_s17 = smov 16   ;;  %v6866_v24 = vmov 2   ;;  %v6873_v25 = vmov 1  }
   0x6   :  { %v3386_v9 = vld [vmem:[%s6856_s1 + $0x30] sm:$0xff]  ;;  %v3401_v12 = vld [vmem:[%s6855_s0 + $0x20] sm:$0xff]  ;;  %v3439_v17 = vld [vmem:[%s6855_s0 + $0x18] sm:$0xff]  ;;  %s3287_s20 = smov 15   ;;  %s3288_s23 = smov 1   ;;  %v6864_v34 = vmov 3  }
   0x7   :  { %v3396_v11 = vld [vmem:[%s6855_s0 + $0x30] sm:$0xff]  ;;  %v3418_v14 = vld [vmem:[%s6855_s0 + $0x60] sm:$0xff]  ;;  %v3449_v19 = vld [vmem:[%s6855_s0 + $0x8] sm:$0xff]  ;;  %s3291_s26 = smov 113   ;;  %v6862_v59 = vmov 5   ;;  %s3293_s27 = smov 112  }
   0x8   :  { %v3406_v13 = vld [vmem:[%s6855_s0 + $0x10] sm:$0xff]  ;;  %v3428_v16 = vld [vmem:[%s6855_s0 + $0x40] sm:$0xff]  ;;  %v3460_v20 = vld [vmem:[%s6855_s0 + $0x68] sm:$0xff]  ;;  %s3295_s28 = smov 111   ;;  %s2833_s14 = sshll.u32 %s6861_s6, 4  ;;  %s2834_s14 = int_to_ptr.hbm [resolvable:$true] %s2833_s14 }
   0x9   :  { %v3423_v15 = vld [vmem:[%s6855_s0 + $0x50] sm:$0xff]  ;;  %v3465_v21 = vld [vmem:[%s6855_s0 + $0x28] sm:$0xff]  ;;  %v3470_v22 = vld [vmem:[%s6855_s0 + $0x78] sm:$0xff]  ;;  %s3300_s16 = smov 128   ;;  %s3301_s18 = smov 8  }
   0xa   :  { %88 = vperm.xlu2 %2896, %v3358_v4   ;;  %v3444_v18 = vld [vmem:[%s6855_s0 + $0x70] sm:$0xff]  ;;  %v3486_v23 = vld [vmem:[%s6855_s0 + $0x58] sm:$0xff]  ;;  %v3503_v26 = vld [vmem:[%s6855_s0 + $0x48] sm:$0xff] }
   0xb   :  { %78 = vperm.xlu1 %2895, %v3363_v5   ;;  %68 = vperm.xlu0 %2894, %v3368_v6   ;;  %v3537_v30 = vld [vmem:[%s6855_s0 + $0x38] sm:$0xff] }
  0x12   :  { %117 = vrot.lane.b32.xlu2 %v3376_v7, %s3282_s15 }
  0x13   :  { %98 = vperm.xlu1 %2895, %v3381_v8   ;;  %93 = vperm.xlu0 %2894, %v3386_v9  }
  0x14   :  { %2898 = vset.pattern.permute.xlu2 %v6868_v10 }
  0x1a   :  { %123 = vrot.lane.b32.xlu2 %v3396_v11, %s3282_s15 }
  0x1b   :  { %121 = vrot.lane.b32.xlu1 %v3401_v12, %s3282_s15  ;;  %119 = vrot.lane.b32.xlu0 %v3406_v13, %s3282_s15 }
  0x1c   :  { %2897 = vset.pattern.permute.xlu0 %v6868_v10  ;;  %2901 = vset.pattern.permute.xlu1 %v6866_v24 }
  0x22   :  { %129 = vrot.lane.b32.xlu2 %v3418_v14, %s3282_s15 }
  0x23   :  { %127 = vrot.lane.b32.xlu1 %v3423_v15, %s3282_s15  ;;  %125 = vrot.lane.b32.xlu0 %v3428_v16, %s3282_s15 }
  0x2a   :  { %135 = vrot.lane.b32.xlu2 %v3439_v17, %s3282_s15 }
  0x2b   :  { %131 = vrot.lane.b32.xlu0 %v3444_v18, %s3282_s15  ;;  %133 = vrot.lane.b32.xlu1 %v3449_v19, %s3282_s15 }
  0x32   :  { %145 = vrot.lane.b32.xlu2 %v3460_v20, %s3282_s15 }
  0x33   :  { %137 = vrot.lane.b32.xlu0 %v3465_v21, %s3282_s15  ;;  %147 = vrot.lane.b32.xlu1 %v3470_v22, %s3282_s15 }
  0x3a   :  { %282 = vrot.lane.b32.xlu2 %v3470_v22, %s3284_s17 }
  0x3b   :  { %217 = vperm.xlu0 %2897, %v3381_v8   ;;  %266 = vrot.lane.b32.xlu1 %v3444_v18, %s3284_s17 }
  0x42   :  { %213 = vperm.xlu2 %2898, %v3386_v9  }
  0x43   :  { %264 = vrot.lane.b32.xlu0 %v3418_v14, %s3284_s17  ;;  %143 = vrot.lane.b32.xlu1 %v3486_v23, %s3282_s15 }
  0x4a   :  { %2899 = vset.pattern.permute.xlu2 %v6873_v25 }
  0x4b   :  { %399 = vrot.lane.b32.xlu0 %v3444_v18, %s3287_s20  ;;  %280 = vrot.lane.b32.xlu1 %v3460_v20, %s3284_s17 }
  0x4c   :  { %350 = vperm.xlu2 %2899, %v3381_v8  }
  0x53   :  { %209 = vperm.xlu0 %2897, %v3358_v4   ;;  %415 = vrot.lane.b32.xlu1 %v3470_v22, %s3287_s20 }
  0x54   :  { %141 = vrot.lane.b32.xlu2 %v3503_v26, %s3282_s15 }
  0x55   :  { %2902 = vset.pattern.permute.xlu2 %v6868_v10 }
  0x5b   :  { %2900 = vset.pattern.permute.xlu0 %v6873_v25  ;;  %262 = vrot.lane.b32.xlu1 %v3423_v15, %s3284_s17 }
  0x5c   :  { %346 = vperm.xlu0 %2900, %v3386_v9   ;;  %278 = vrot.lane.b32.xlu2 %v3486_v23, %s3284_s17  ;;  %v3517_v27 = vpop.permute.xlu2 %83 }
  0x63   :  { %397 = vrot.lane.b32.xlu1 %v3418_v14, %s3287_s20 }
  0x64   :  { %550 = vrot.lane.b32.xlu0 %v3470_v22, %s3288_s23  ;;  %413 = vrot.lane.b32.xlu2 %v3460_v20, %s3287_s20  ;;  %v3525_v28 = vpop.permute.xlu2 %88 }
  0x6b   :  { %485 = vperm.xlu1 %2901, %v3381_v8  }
  0x6c   :  { %260 = vrot.lane.b32.xlu0 %v3428_v16, %s3284_s17  ;;  %534 = vrot.lane.b32.xlu2 %v3444_v18, %s3288_s23  ;;  %v3532_v29 = vpop.permute.xlu2 %117 }
  0x73   :  { %139 = vrot.lane.b32.xlu1 %v3537_v30, %s3282_s15  ;;  %s3290_s15 = smov 127  }
  0x74   :  { %395 = vrot.lane.b32.xlu0 %v3423_v15, %s3287_s20  ;;  %205 = vperm.xlu2 %2902, %v3340_v0   ;;  %v3544_v31 = vpop.permute.xlu2 %123 }
  0x75   :  { %7010 = vst [vmem:[#allocation6_spill] sm:$0xff] %v3544_v31  ;;  %v3546_v32 = vpop.permute.xlu1 %73  ;;  %v3548_v33 = vpop.permute.xlu0 %63  ;;  %2933 = vset.pattern.permute.xlu1 %v6864_v34 }
  0x76   :  { %7011 = vst [vmem:[#allocation7_spill] sm:$0xff] %v3548_v33 }
  0x7b   :  { %276 = vrot.lane.b32.xlu1 %v3503_v26, %s3284_s17 }
  0x7c   :  { %532 = vrot.lane.b32.xlu0 %v3418_v14, %s3288_s23  ;;  %2903 = vset.pattern.permute.xlu2 %v6873_v25  ;;  %v3556_v35 = vpop.permute.xlu2 %129 }
  0x7d   :  { %v3558_v36 = vpop.permute.xlu1 %78  ;;  %v3560_v37 = vpop.permute.xlu0 %68  ;;  %342 = vperm.xlu2 %2903, %v3358_v4  }
  0x83   :  { %411 = vrot.lane.b32.xlu1 %v3486_v23, %s3287_s20 }
  0x84   :  { %667 = vrot.lane.b32.xlu0 %v3444_v18, %s3290_s15  ;;  %v3567_v38 = vpop.permute.xlu2 %135 }
  0x85   :  { %v3569_v39 = vpop.permute.xlu1 %98  ;;  %v3571_v40 = vpop.permute.xlu0 %93  ;;  %2904 = vset.pattern.permute.xlu2 %v6866_v24 }
  0x86   :  { %481 = vperm.xlu2 %2904, %v3386_v9  }
  0x8b   :  { %548 = vrot.lane.b32.xlu1 %v3460_v20, %s3288_s23 }
  0x8c   :  { %258 = vrot.lane.b32.xlu0 %v3396_v11, %s3284_s17  ;;  %v3579_v41 = vpop.permute.xlu2 %145 }
  0x8d   :  { %v3581_v42 = vpop.permute.xlu1 %121  ;;  %v3583_v43 = vpop.permute.xlu0 %119 }
  0x8e   :  { %7012 = vst [vmem:[#allocation8_spill] sm:$0xff] %v3581_v42  ;;  %2905 = vset.pattern.permute.xlu2 %v6864_v34 }
  0x8f   :  { %618 = vperm.xlu2 %2905, %v3381_v8  }
  0x93   :  { %683 = vrot.lane.b32.xlu1 %v3470_v22, %s3290_s15 }
  0x94   :  { %393 = vrot.lane.b32.xlu0 %v3428_v16, %s3287_s20  ;;  %v3591_v44 = vpop.permute.xlu2 %282 }
  0x95   :  { %v3593_v45 = vpop.permute.xlu1 %127  ;;  %v3595_v46 = vpop.permute.xlu0 %125 }
  0x96   :  { %7013 = vst [vmem:[#allocation9_spill] sm:$0xff] %v3593_v45 }
  0x97   :  { %7014 = vst [vmem:[#allocation10_spill] sm:$0xff] %v3595_v46  ;;  %2906 = vset.pattern.permute.xlu2 %v6868_v10 }
  0x98   :  { %201 = vperm.xlu2 %2906, %v3363_v5  }
  0x9b   :  { %274 = vrot.lane.b32.xlu1 %v3537_v30, %s3284_s17 }
  0x9c   :  { %530 = vrot.lane.b32.xlu0 %v3423_v15, %s3288_s23  ;;  %v3603_v47 = vpop.permute.xlu2 %213 }
  0x9d   :  { %v3605_v48 = vpop.permute.xlu0 %131  ;;  %v3607_v49 = vpop.permute.xlu1 %133 }
  0xa0   :  { %2907 = vset.pattern.permute.xlu2 %v6873_v25 }
  0xa1   :  { %338 = vperm.xlu2 %2907, %v3340_v0  }
  0xa3   :  { %409 = vrot.lane.b32.xlu1 %v3503_v26, %s3287_s20 }
  0xa4   :  { %665 = vrot.lane.b32.xlu0 %v3418_v14, %s3290_s15 }
  0xa5   :  { %v3615_v50 = vpop.permute.xlu0 %137  ;;  %v3617_v51 = vpop.permute.xlu1 %147 }
  0xa6   :  { %v3619_v52 = vpop.permute.xlu2 %350 }
  0xa7   :  { %7015 = vst [vmem:[#allocation11_spill] sm:$0xff] %v3619_v52 }
  0xa9   :  { %2908 = vset.pattern.permute.xlu2 %v6866_v24 }
  0xaa   :  { %477 = vperm.xlu2 %2908, %v3358_v4  }
  0xab   :  { %546 = vrot.lane.b32.xlu1 %v3486_v23, %s3288_s23 }
  0xac   :  { %800 = vrot.lane.b32.xlu0 %v3444_v18, %s3291_s26 }
  0xad   :  { %v3627_v53 = vpop.permute.xlu0 %217  ;;  %v3629_v54 = vpop.permute.xlu1 %266 }
  0xae   :  { %v3631_v55 = vpop.permute.xlu2 %141 }
  0xaf   :  { %7016 = vst [vmem:[#allocation12_spill] sm:$0xff] %v3631_v55 }
  0xb2   :  { %2909 = vset.pattern.permute.xlu2 %v6864_v34 }
  0xb3   :  { %681 = vrot.lane.b32.xlu1 %v3460_v20, %s3290_s15  ;;  %614 = vperm.xlu2 %2909, %v3386_v9  }
  0xb4   :  { %256 = vrot.lane.b32.xlu0 %v3401_v12, %s3284_s17 }
  0xb5   :  { %v3639_v56 = vpop.permute.xlu0 %264  ;;  %v3641_v57 = vpop.permute.xlu1 %143 }
  0xb6   :  { %7017 = vst [vmem:[#allocation13_spill] sm:$0xff] %v3639_v56  ;;  %v3643_v58 = vpop.permute.xlu2 %278 }
  0xb7   :  { %7018 = vst [vmem:[#allocation14_spill] sm:$0xff] %v3641_v57  ;;  %v6946_v57 = vmov 8  }
  0xb8   :  { %7019 = vst [vmem:[#allocation15_spill] sm:$0xff] %v3643_v58 }
  0xbb   :  { %816 = vrot.lane.b32.xlu1 %v3470_v22, %s3291_s26  ;;  %2910 = vset.pattern.permute.xlu2 %v6862_v59 }
  0xbc   :  { %391 = vrot.lane.b32.xlu0 %v3396_v11, %s3287_s20  ;;  %751 = vperm.xlu2 %2910, %v3381_v8  }
  0xbd   :  { %v3651_v60 = vpop.permute.xlu0 %399  ;;  %v3653_v61 = vpop.permute.xlu1 %280 }
  0xbe   :  { %7020 = vst [vmem:[#allocation16_spill] sm:$0xff] %v3651_v60  ;;  %v3655_v62 = vpop.permute.xlu2 %413  ;;  %v6890_v60 = vmov 6  }
  0xbf   :  { %7021 = vst [vmem:[#allocation17_spill] sm:$0xff] %v3653_v61  ;;  %v6918_v61 = vmov 7  }
  0xc0   :  { %7022 = vst [vmem:[#allocation18_spill] sm:$0xff] %v3655_v62 }
  0xc3   :  { %272 = vrot.lane.b32.xlu1 %v3465_v21, %s3284_s17 }
  0xc4   :  { %528 = vrot.lane.b32.xlu0 %v3428_v16, %s3288_s23  ;;  %2911 = vset.pattern.permute.xlu2 %v6868_v10 }
  0xc5   :  { %v3662_v63 = vpop.permute.xlu0 %209  ;;  %v3664_v3 = vpop.permute.xlu1 %415  ;;  %197 = vperm.xlu2 %2911, %v3345_v1  }
  0xc6   :  { %7023 = vst [vmem:[#allocation19_spill] sm:$0xff] %v3662_v63  ;;  %v3667_v59 = vpop.permute.xlu2 %534 }
  0xc7   :  { %7024 = vst [vmem:[#allocation20_spill] sm:$0xff] %v3664_v3 }
  0xc8   :  { %7025 = vst [vmem:[#allocation21_spill] sm:$0xff] %v3667_v59  ;;  %v7031_v59 = vmov 2  }
  0xcb   :  { %407 = vrot.lane.b32.xlu1 %v3537_v30, %s3287_s20 }
  0xcc   :  { %663 = vrot.lane.b32.xlu0 %v3423_v15, %s3290_s15 }
  0xcd   :  { %v3673_v34 = vpop.permute.xlu1 %262  ;;  %2912 = vset.pattern.permute.xlu2 %v6873_v25 }
  0xce   :  { %7026 = vst [vmem:[#allocation22_spill] sm:$0xff] %v3673_v34  ;;  %v3676_v24 = vpop.permute.xlu0 %346  ;;  %334 = vperm.xlu2 %2912, %v3363_v5   ;;  %v3679_v10 = vpop.permute.xlu2 %205 }
  0xcf   :  { %7027 = vst [vmem:[#allocation23_spill] sm:$0xff] %v3676_v24  ;;  %v7039_v24 = vmov 5  }
  0xd0   :  { %7028 = vst [vmem:[#allocation24_spill] sm:$0xff] %v3679_v10 }
  0xd3   :  { %544 = vrot.lane.b32.xlu1 %v3503_v26, %s3288_s23 }
  0xd4   :  { %798 = vrot.lane.b32.xlu0 %v3418_v14, %s3291_s26 }
  0xd5   :  { %v3685_v31 = vpop.permute.xlu1 %397 }
  0xd6   :  { %7029 = vst [vmem:[#allocation25_spill] sm:$0xff] %v3685_v31  ;;  %v3687_v62 = vpop.permute.xlu0 %550  ;;  %2913 = vset.pattern.permute.xlu2 %v7031_v59  ;;  %v7035_v31 = vmov 3  }
  0xd7   :  { %7030 = vst [vmem:[#allocation26_spill] sm:$0xff] %v3687_v62  ;;  %473 = vperm.xlu2 %2913, %v3340_v0   ;;  %v3691_v25 = vpop.permute.xlu2 %342 }
  0xd8   :  { %7032 = vst [vmem:[#allocation27_spill] sm:$0xff] %v3691_v25 }
  0xdb   :  { %679 = vrot.lane.b32.xlu1 %v3486_v23, %s3290_s15 }
  0xdc   :  { %935 = vrot.lane.b32.xlu0 %v3444_v18, %s3293_s27 }
  0xdd   :  { %v3697_v10 = vpop.permute.xlu1 %485 }
  0xde   :  { %7033 = vst [vmem:[#allocation28_spill] sm:$0xff] %v3697_v10  ;;  %v3699_v34 = vpop.permute.xlu0 %260 }
  0xdf   :  { %7034 = vst [vmem:[#allocation29_spill] sm:$0xff] %v3699_v34  ;;  %2914 = vset.pattern.permute.xlu2 %v7035_v31 }
  0xe0   :  { %610 = vperm.xlu2 %2914, %v3358_v4   ;;  %v3703_v62 = vpop.permute.xlu2 %481 }
  0xe1   :  { %7036 = vst [vmem:[#allocation30_spill] sm:$0xff] %v3703_v62 }
  0xe3   :  { %814 = vrot.lane.b32.xlu1 %v3460_v20, %s3291_s26 }
  0xe4   :  { %254 = vrot.lane.b32.xlu0 %v3406_v13, %s3284_s17 }
  0xe5   :  { %v3709_v25 = vpop.permute.xlu1 %139 }
  0xe6   :  { %7037 = vst [vmem:[#allocation31_spill] sm:$0xff] %v3709_v25  ;;  %v3711_v58 = vpop.permute.xlu0 %395 }
  0xe7   :  { %7038 = vst [vmem:[#allocation32_spill] sm:$0xff] %v3711_v58 }
  0xe8   :  { %2915 = vset.pattern.permute.xlu2 %v7039_v24 }
  0xe9   :  { %747 = vperm.xlu2 %2915, %v3386_v9   ;;  %v3715_v34 = vpop.permute.xlu2 %618 }
  0xea   :  { %7040 = vst [vmem:[#allocation33_spill] sm:$0xff] %v3715_v34 }
  0xeb   :  { %951 = vrot.lane.b32.xlu1 %v3470_v22, %s3293_s27 }
  0xec   :  { %389 = vrot.lane.b32.xlu0 %v3401_v12, %s3287_s20 }
  0xed   :  { %v3721_v62 = vpop.permute.xlu1 %276 }
  0xee   :  { %7041 = vst [vmem:[#allocation34_spill] sm:$0xff] %v3721_v62  ;;  %v3723_v10 = vpop.permute.xlu0 %532  ;;  %v7046_v62 = vmov 0  }
  0xef   :  { %7042 = vst [vmem:[#allocation35_spill] sm:$0xff] %v3723_v10 }
  0xf1   :  { %2916 = vset.pattern.permute.xlu2 %v6890_v60 }
  0xf2   :  { %886 = vperm.xlu2 %2916, %v3381_v8   ;;  %v3727_v58 = vpop.permute.xlu2 %201 }
  0xf3   :  { %7043 = vst [vmem:[#allocation36_spill] sm:$0xff] %v3727_v58  ;;  %270 = vrot.lane.b32.xlu1 %v3439_v17, %s3284_s17 }
  0xf4   :  { %526 = vrot.lane.b32.xlu0 %v3396_v11, %s3288_s23 }
  0xf5   :  { %v3733_v25 = vpop.permute.xlu1 %411 }
  0xf6   :  { %7044 = vst [vmem:[#allocation37_spill] sm:$0xff] %v3733_v25  ;;  %v3735_v34 = vpop.permute.xlu0 %667  ;;  %v7050_v25 = vmov 1  }
  0xf7   :  { %7045 = vst [vmem:[#allocation38_spill] sm:$0xff] %v3735_v34 }
  0xfa   :  { %2917 = vset.pattern.permute.xlu2 %v7046_v62 }
  0xfb   :  { %405 = vrot.lane.b32.xlu1 %v3465_v21, %s3287_s20  ;;  %193 = vperm.xlu2 %2917, %v3368_v6   ;;  %v3741_v60 = vpop.permute.xlu2 %338 }
  0xfc   :  { %7047 = vst [vmem:[#allocation39_spill] sm:$0xff] %v3741_v60  ;;  %661 = vrot.lane.b32.xlu0 %v3428_v16, %s3290_s15 }
  0xfd   :  { %v3745_v10 = vpop.permute.xlu1 %548 }
  0xfe   :  { %7048 = vst [vmem:[#allocation40_spill] sm:$0xff] %v3745_v10  ;;  %v3747_v58 = vpop.permute.xlu0 %258 }
  0xff   :  { %7049 = vst [vmem:[#allocation41_spill] sm:$0xff] %v3747_v58 }
 0x103   :  { %542 = vrot.lane.b32.xlu1 %v3537_v30, %s3288_s23  ;;  %2918 = vset.pattern.permute.xlu2 %v7050_v25 }
 0x104   :  { %796 = vrot.lane.b32.xlu0 %v3423_v15, %s3291_s26  ;;  %330 = vperm.xlu2 %2918, %v3345_v1   ;;  %v3755_v34 = vpop.permute.xlu2 %477 }
 0x105   :  { %7051 = vst [vmem:[#allocation42_spill] sm:$0xff] %v3755_v34  ;;  %v3757_v60 = vpop.permute.xlu1 %683 }
 0x106   :  { %7052 = vst [vmem:[#allocation43_spill] sm:$0xff] %v3757_v60  ;;  %v3759_v3 = vpop.permute.xlu0 %393  ;;  %v7065_v60 = vmov 6  }
 0x107   :  { %7053 = vst [vmem:[#allocation44_spill] sm:$0xff] %v3759_v3 }
 0x10b   :  { %677 = vrot.lane.b32.xlu1 %v3503_v26, %s3290_s15 }
 0x10c   :  { %933 = vrot.lane.b32.xlu0 %v3418_v14, %s3293_s27  ;;  %2919 = vset.pattern.permute.xlu2 %v7031_v59 }
 0x10d   :  { %v3766_v10 = vpop.permute.xlu1 %274  ;;  %469 = vperm.xlu2 %2919, %v3363_v5   ;;  %v3769_v58 = vpop.permute.xlu2 %614 }
 0x10e   :  { %7054 = vst [vmem:[#allocation45_spill] sm:$0xff] %v3766_v10  ;;  %v3771_v63 = vpop.permute.xlu0 %530 }
 0x10f   :  { %7055 = vst [vmem:[#allocation46_spill] sm:$0xff] %v3769_v58 }
 0x110   :  { %7056 = vst [vmem:[#allocation47_spill] sm:$0xff] %v3771_v63 }
 0x113   :  { %812 = vrot.lane.b32.xlu1 %v3486_v23, %s3291_s26 }
 0x114   :  { %1068 = vrot.lane.b32.xlu0 %v3444_v18, %s3295_s28 }
 0x115   :  { %v3777_v34 = vpop.permute.xlu1 %409  ;;  %2920 = vset.pattern.permute.xlu2 %v7035_v31 }
 0x116   :  { %7057 = vst [vmem:[#allocation48_spill] sm:$0xff] %v3777_v34  ;;  %v3780_v3 = vpop.permute.xlu0 %665  ;;  %606 = vperm.xlu2 %2920, %v3340_v0   ;;  %v3783_v10 = vpop.permute.xlu2 %751 }
 0x117   :  { %7058 = vst [vmem:[#allocation49_spill] sm:$0xff] %v3780_v3 }
 0x118   :  { %7059 = vst [vmem:[#allocation50_spill] sm:$0xff] %v3783_v10 }
 0x11b   :  { %949 = vrot.lane.b32.xlu1 %v3460_v20, %s3293_s27 }
 0x11c   :  { %252 = vrot.lane.b32.xlu0 %v3376_v7, %s3284_s17 }
 0x11d   :  { %v3789_v63 = vpop.permute.xlu1 %546 }
 0x11e   :  { %7060 = vst [vmem:[#allocation51_spill] sm:$0xff] %v3789_v63  ;;  %v3791_v58 = vpop.permute.xlu0 %800  ;;  %2921 = vset.pattern.permute.xlu2 %v7039_v24 }
 0x11f   :  { %7061 = vst [vmem:[#allocation52_spill] sm:$0xff] %v3791_v58  ;;  %743 = vperm.xlu2 %2921, %v3358_v4   ;;  %v3795_v34 = vpop.permute.xlu2 %197 }
 0x120   :  { %7062 = vst [vmem:[#allocation53_spill] sm:$0xff] %v3795_v34 }
 0x123   :  { %1084 = vrot.lane.b32.xlu1 %v3470_v22, %s3295_s28 }
 0x124   :  { %387 = vrot.lane.b32.xlu0 %v3406_v13, %s3287_s20 }
 0x125   :  { %v3801_v3 = vpop.permute.xlu1 %681 }
 0x126   :  { %7063 = vst [vmem:[#allocation54_spill] sm:$0xff] %v3801_v3  ;;  %v3803_v10 = vpop.permute.xlu0 %256 }
 0x127   :  { %7064 = vst [vmem:[#allocation55_spill] sm:$0xff] %v3803_v10  ;;  %2922 = vset.pattern.permute.xlu2 %v7065_v60 }
 0x128   :  { %882 = vperm.xlu2 %2922, %v3386_v9   ;;  %v3807_v63 = vpop.permute.xlu2 %334 }
 0x129   :  { %7066 = vst [vmem:[#allocation56_spill] sm:$0xff] %v3807_v63 }
 0x12b   :  { %268 = vrot.lane.b32.xlu1 %v3449_v19, %s3284_s17 }
 0x12c   :  { %524 = vrot.lane.b32.xlu0 %v3401_v12, %s3288_s23 }
 0x12d   :  { %v3813_v34 = vpop.permute.xlu1 %816 }
 0x12e   :  { %7067 = vst [vmem:[#allocation57_spill] sm:$0xff] %v3813_v34  ;;  %v3815_v58 = vpop.permute.xlu0 %391 }
 0x12f   :  { %7068 = vst [vmem:[#allocation58_spill] sm:$0xff] %v3815_v58 }
 0x130   :  { %2923 = vset.pattern.permute.xlu2 %v6918_v61 }
 0x131   :  { %1019 = vperm.xlu2 %2923, %v3381_v8   ;;  %v3819_v3 = vpop.permute.xlu2 %473 }
 0x132   :  { %7069 = vst [vmem:[#allocation59_spill] sm:$0xff] %v3819_v3 }
 0x133   :  { %403 = vrot.lane.b32.xlu1 %v3439_v17, %s3287_s20 }
 0x134   :  { %659 = vrot.lane.b32.xlu0 %v3396_v11, %s3290_s15 }
 0x135   :  { %v3825_v63 = vpop.permute.xlu1 %272 }
 0x136   :  { %7070 = vst [vmem:[#allocation60_spill] sm:$0xff] %v3825_v63  ;;  %v3827_v10 = vpop.permute.xlu0 %528 }
 0x137   :  { %7071 = vst [vmem:[#allocation61_spill] sm:$0xff] %v3827_v10 }
 0x139   :  { %2924 = vset.pattern.permute.xlu2 %v7046_v62 }
 0x13a   :  { %189 = vperm.xlu2 %2924, %v3350_v2   ;;  %v3831_v58 = vpop.permute.xlu2 %610 }
 0x13b   :  { %7072 = vst [vmem:[#allocation62_spill] sm:$0xff] %v3831_v58  ;;  %540 = vrot.lane.b32.xlu1 %v3465_v21, %s3288_s23 }
 0x13c   :  { %794 = vrot.lane.b32.xlu0 %v3428_v16, %s3291_s26 }
 0x13d   :  { %v3837_v61 = vpop.permute.xlu1 %407 }
 0x13e   :  { %7073 = vst [vmem:[#allocation63_spill] sm:$0xff] %v3837_v61  ;;  %v3839_v3 = vpop.permute.xlu0 %663 }
 0x13f   :  { %7074 = vst [vmem:[#allocation64_spill] sm:$0xff] %v3839_v3 }
 0x142   :  { %2925 = vset.pattern.permute.xlu2 %v7050_v25 }
 0x143   :  { %675 = vrot.lane.b32.xlu1 %v3537_v30, %s3290_s15  ;;  %326 = vperm.xlu2 %2925, %v3368_v6   ;;  %v3845_v62 = vpop.permute.xlu2 %747 }
 0x144   :  { %7075 = vst [vmem:[#allocation65_spill] sm:$0xff] %v3845_v62  ;;  %931 = vrot.lane.b32.xlu0 %v3423_v15, %s3293_s27 }
 0x145   :  { %v3849_v58 = vpop.permute.xlu1 %544 }
 0x146   :  { %7076 = vst [vmem:[#allocation66_spill] sm:$0xff] %v3849_v58  ;;  %v3851_v10 = vpop.permute.xlu0 %798 }
 0x147   :  { %7077 = vst [vmem:[#allocation67_spill] sm:$0xff] %v3851_v10 }
 0x14b   :  { %810 = vrot.lane.b32.xlu1 %v3503_v26, %s3291_s26  ;;  %2926 = vset.pattern.permute.xlu2 %v7031_v59 }
 0x14c   :  { %1066 = vrot.lane.b32.xlu0 %v3418_v14, %s3295_s28  ;;  %465 = vperm.xlu2 %2926, %v3345_v1   ;;  %v3859_v25 = vpop.permute.xlu2 %886 }
 0x14d   :  { %7078 = vst [vmem:[#allocation68_spill] sm:$0xff] %v3859_v25  ;;  %v3861_v62 = vpop.permute.xlu1 %679 }
 0x14e   :  { %7079 = vst [vmem:[#allocation69_spill] sm:$0xff] %v3861_v62  ;;  %v3863_v3 = vpop.permute.xlu0 %935 }
 0x14f   :  { %7080 = vst [vmem:[#allocation70_spill] sm:$0xff] %v3863_v3 }
 0x153   :  { %947 = vrot.lane.b32.xlu1 %v3486_v23, %s3293_s27 }
 0x154   :  { %322 = vperm.xlu0 %2900, %v3350_v2   ;;  %2927 = vset.pattern.permute.xlu2 %v7035_v31 }
 0x155   :  { %v3869_v10 = vpop.permute.xlu1 %814  ;;  %602 = vperm.xlu2 %2927, %v3363_v5   ;;  %v3872_v58 = vpop.permute.xlu2 %193 }
 0x156   :  { %7081 = vst [vmem:[#allocation71_spill] sm:$0xff] %v3869_v10  ;;  %v3874_v61 = vpop.permute.xlu0 %254 }
 0x157   :  { %7082 = vst [vmem:[#allocation72_spill] sm:$0xff] %v3872_v58  ;;  %v7086_v58 = vmov 7  }
 0x15b   :  { %1082 = vrot.lane.b32.xlu1 %v3460_v20, %s3295_s28 }
 0x15c   :  { %2932 = vset.pattern.permute.xlu0 %v7031_v59 }
 0x15d   :  { %v3879_v62 = vpop.permute.xlu1 %951  ;;  %461 = vperm.xlu0 %2932, %v3368_v6   ;;  %2928 = vset.pattern.permute.xlu2 %v7039_v24 }
 0x15e   :  { %7083 = vst [vmem:[#allocation73_spill] sm:$0xff] %v3879_v62  ;;  %v3883_v63 = vpop.permute.xlu0 %389  ;;  %739 = vperm.xlu2 %2928, %v3340_v0   ;;  %v3886_v10 = vpop.permute.xlu2 %330 }
 0x15f   :  { %7084 = vst [vmem:[#allocation74_spill] sm:$0xff] %v3886_v10 }
 0x163   :  { %385 = vrot.lane.b32.xlu1 %v3376_v7, %s3287_s20 }
 0x165   :  { %v271_v25 = vpop.permute.xlu1 %270  ;;  %673 = vrot.lane.b32.xlu0 %v3465_v21, %s3290_s15 }
 0x166   :  { %v3892_v3 = vpop.permute.xlu0 %526  ;;  %2929 = vset.pattern.permute.xlu2 %v7065_v60  ;;  %2944 = vset.pattern.permute.xlu0 %v7035_v31 }
 0x167   :  { %878 = vperm.xlu2 %2929, %v3358_v4   ;;  %v3897_v62 = vpop.permute.xlu2 %469 }
 0x168   :  { %7085 = vst [vmem:[#allocation75_spill] sm:$0xff] %v3897_v62 }
 0x16b   :  { %522 = vrot.lane.b32.xlu1 %v3406_v13, %s3288_s23 }
 0x16d   :  { %v3901_v10 = vpop.permute.xlu1 %405  ;;  %808 = vrot.lane.b32.xlu0 %v3537_v30, %s3291_s26 }
 0x16e   :  { %v3905_v34 = vpop.permute.xlu0 %661 }
 0x16f   :  { %2930 = vset.pattern.permute.xlu2 %v7086_v58 }
 0x170   :  { %1015 = vperm.xlu2 %2930, %v3386_v9   ;;  %v3909_v56 = vpop.permute.xlu2 %606 }
 0x171   :  { %7087 = vst [vmem:[#allocation76_spill] sm:$0xff] %v3909_v56 }
 0x173   :  { %598 = vperm.xlu1 %2933, %v3345_v1  }
 0x175   :  { %v3912_v45 = vpop.permute.xlu1 %542  ;;  %945 = vrot.lane.b32.xlu0 %v3503_v26, %s3293_s27 }
 0x176   :  { %v3916_v62 = vpop.permute.xlu0 %796 }
 0x177   :  { %7088 = vst [vmem:[#allocation77_spill] sm:$0xff] %v3916_v62 }
 0x178   :  { %2931 = vset.pattern.permute.xlu2 %v6946_v57 }
 0x179   :  { %1154 = vperm.xlu2 %2931, %v3381_v8   ;;  %v3920_v46 = vpop.permute.xlu2 %743 }
 0x17a   :  { %7089 = vst [vmem:[#allocation78_spill] sm:$0xff] %v3920_v46  ;;  %v48_v46 = vlaneseq }
 0x17b   :  { %2934 = vset.pattern.permute.xlu1 %v7039_v24 }
 0x17c   :  { %735 = vperm.xlu1 %2934, %v3363_v5  }
 0x17d   :  { %v3924_v56 = vpop.permute.xlu1 %677  ;;  %1080 = vrot.lane.b32.xlu0 %v3486_v23, %s3295_s28 }
 0x17e   :  { %v3928_v1 = vpop.permute.xlu0 %933 }
 0x17f   :  { %7090 = vst [vmem:[#allocation79_spill] sm:$0xff] %v3928_v1 }
 0x181   :  { %401 = vrot.lane.b32.xlu2 %v3449_v19, %s3287_s20 }
 0x182   :  { %v3932_v62 = vpop.permute.xlu2 %882  ;;  %2938 = vset.pattern.permute.xlu2 %v7031_v59  ;;  %v3951_v59 = vand.u32 127, %v48_v46  ;;  %v7099_v46 = vmov 8  }
 0x183   :  { %7091 = vst [vmem:[#allocation80_spill] sm:$0xff] %v3932_v62 }
 0x184   :  { %2935 = vset.pattern.permute.xlu1 %v7065_v60  ;;  %7095 = vst [vmem:[#allocation84_spill] sm:$0xff] %v3951_v59  ;;  %vm6963_vm0 = vcmp.lt.s32.totalorder %v3951_v59, 111  ;;  %vm6982_vm1 = vcmp.lt.s32.totalorder %v3951_v59, 16  ;;  %vm6981_vm2 = vcmp.ge.s32.totalorder %v3951_v59, 16  ;;  %v3997_v42 = vadd.s32 128, %v3951_v59 }
 0x185   :  { %v3936_v8 = vpop.permute.xlu1 %812  ;;  %874 = vperm.xlu1 %2935, %v3340_v0   ;;  %520 = vrot.lane.b32.xlu0 %v3376_v7, %s3288_s23  ;;  %vm417_vm3 = vcmp.lt.s32.totalorder %v3951_v59, 15  ;;  %vm6992_vm7 = vcmp.lt.s32.totalorder %v3951_v59, 1  ;;  %vm149_vm8 = vcmp.lt.s32.totalorder %v3951_v59, 17  ;;  %vm7008_vm12 = vcmp.lt.s32.totalorder %v3951_v59, 127 }
 0x186   :  { %7092 = vst [vmem:[#allocation81_spill] sm:$0xff] %v3936_v8  ;;  %v1069_v5 = vpop.permute.xlu0 %1068  ;;  %vm6969_vm13 = vcmp.lt.s32.totalorder %v3951_v59, 113  ;;  %vm6983_vm14 = vcmp.lt.s32.totalorder %v3997_v42, 240 }
 0x187   :  { %7104 = vst [vmem:[#allocation92_spill] sm:$0xff] %v3997_v42 }
 0x189   :  { %538 = vrot.lane.b32.xlu2 %v3439_v17, %s3288_s23 }
 0x18b   :  { %v3943_v57 = vpop.permute.xlu2 %1019 }
 0x18c   :  { %7093 = vst [vmem:[#allocation82_spill] sm:$0xff] %v3943_v57 }
 0x18d   :  { %v3945_v1 = vpop.permute.xlu1 %949  ;;  %2936 = vset.pattern.permute.xlu1 %v7086_v58  ;;  %655 = vrot.lane.b32.xlu0 %v3406_v13, %s3290_s15 }
 0x18e   :  { %7094 = vst [vmem:[#allocation83_spill] sm:$0xff] %v3945_v1  ;;  %1011 = vperm.xlu1 %2936, %v3358_v4   ;;  %v253_v0 = vpop.permute.xlu0 %252 }
 0x191   :  { %657 = vrot.lane.b32.xlu2 %v3401_v12, %s3290_s15 }
 0x194   :  { %v3956_v62 = vpop.permute.xlu2 %189 }
 0x195   :  { %7096 = vst [vmem:[#allocation85_spill] sm:$0xff] %v3956_v62  ;;  %v1085_v57 = vpop.permute.xlu1 %1084  ;;  %790 = vrot.lane.b32.xlu0 %v3401_v12, %s3291_s26  ;;  %v294_v62 = vsel %vm6982_vm1, %v271_v25, %v3874_v61 }
 0x196   :  { %v3962_v58 = vsel %vm6963_vm0, %v1069_v5, %v1085_v57  ;;  %v3966_v4 = vsel %vm6963_vm0, %v1085_v57, %v1069_v5  ;;  %2937 = vset.pattern.permute.xlu1 %v7099_v46  ;;  %v388_v1 = vpop.permute.xlu0 %387  ;;  %v286_v57 = vsel %vm6982_vm1, %v3874_v61, %v271_v25  ;;  %v51_v61 = vand.u32 15, %v3951_v59 }
 0x197   :  { %7097 = vst [vmem:[#allocation86_spill] sm:$0xff] %v3962_v58  ;;  %1150 = vperm.xlu1 %2937, %v3386_v9   ;;  %v307_v9 = vsel %vm6981_vm2, %v294_v62, 0.0  ;;  %v52_v62 = vand.u32 15, %v3997_v42  ;;  %v428_v25 = vsel %vm417_vm3, %v3901_v10, %v3883_v63  ;;  %vm6984_vm0 = vcmp.lt.s32.totalorder %v3951_v59, 112 }
 0x198   :  { %7098 = vst [vmem:[#allocation87_spill] sm:$0xff] %v3966_v4  ;;  %vm4006_vm4 = vcmp.le.s32.totalorder %v51_v61, 14  ;;  %vm4072_vm9 = vcmp.ge.s32.totalorder %v51_v61, 1  ;;  %v4096_v61 = vmul.f32 %v3525_v28, %v3486_v23 }
 0x199   :  { %792 = vrot.lane.b32.xlu2 %v3396_v11, %s3291_s26  ;;  %vm4019_vm5 = vcmp.le.s32.totalorder %v52_v62, 14  ;;  %vm4027_vm6 = vmand %vm6981_vm2, %vm4006_vm4  ;;  %vm4076_vm10 = vcmp.ge.s32.totalorder %v52_v62, 1 }
 0x19a   :  { %vm4136_vm11 = vmand %vm6981_vm2, %vm4072_vm9 }
 0x19b   :  { %vm4335_vm15 = vmand %vm6983_vm14, %vm4076_vm10 }
 0x19d   :  { %v269_v58 = vpop.permute.xlu1 %268  ;;  %927 = vrot.lane.b32.xlu0 %v3396_v11, %s3293_s27  ;;  %v327_v5 = vpop.permute.xlu2 %326 }
 0x19e   :  { %v3986_v46 = vsel %vm6982_vm1, %v253_v0, %v269_v58  ;;  %v3990_v4 = vsel %vm6982_vm1, %v269_v58, %v253_v0  ;;  %v3992_v8 = vmul.f32 %v327_v5, %v307_v9  ;;  %v3994_v55 = vmul.f32 %v327_v5, %v286_v57  ;;  %v525_v52 = vpop.permute.xlu0 %524 }
 0x19f   :  { %7100 = vst [vmem:[#allocation88_spill] sm:$0xff] %v3986_v46  ;;  %536 = vrot.lane.b32.xlu1 %v3449_v19, %s3288_s23  ;;  %v7105_v58 = vmov 0  ;;  %v420_v19 = vsel %vm417_vm3, %v3883_v63, %v3901_v10  ;;  %v7108_v0 = vmov 0 }
 0x1a0   :  { %7101 = vst [vmem:[#allocation89_spill] sm:$0xff] %v3990_v4  ;;  %2945 = vset.pattern.permute.xlu1 %v7039_v24  ;;  %v7106_v58 = vsel %vm4006_vm4, 4294967295, %v7105_v58  ;;  %v7109_v0 = vsel %vm4019_vm5, 4294967295, %v7108_v0 }
 0x1a1   :  { %7102 = vst [vmem:[#allocation90_spill] sm:$0xff] %v3992_v8  ;;  %929 = vrot.lane.b32.xlu2 %v3428_v16, %s3293_s27  ;;  %v445_v8 = vsel %vm4019_vm5, %v420_v19, 0.0 }
 0x1a2   :  { %7103 = vst [vmem:[#allocation91_spill] sm:$0xff] %v3994_v55  ;;  %v444_v55 = vsel %vm4027_vm6, %v428_v25, 0.0  ;;  %v7114_v25 = vmov 0 }
 0x1a3   :  { %7107 = vst [vmem:[#allocation93_spill] sm:$0xff] %v7106_v58  ;;  %v7115_v25 = vsel %vm4072_vm9, 4294967295, %v7114_v25 }
 0x1a4   :  { %7110 = vst [vmem:[#allocation94_spill] sm:$0xff] %v7109_v0 }
 0x1a5   :  { %v404_v9 = vpop.permute.xlu1 %403  ;;  %1062 = vrot.lane.b32.xlu0 %v3428_v16, %s3295_s28  ;;  %7116 = vst [vmem:[#allocation96_spill] sm:$0xff] %v7115_v25 }
 0x1a6   :  { %v4035_v5 = vsel %vm417_vm3, %v388_v1, %v404_v9  ;;  %v4039_v10 = vsel %vm417_vm3, %v404_v9, %v388_v1  ;;  %v660_v63 = vpop.permute.xlu0 %659  ;;  %v466_v46 = vpop.permute.xlu2 %465  ;;  %v556_v1 = vsel %vm6992_vm7, %v3892_v3, %v3912_v45  ;;  %v7117_v9 = vmov 0 }
 0x1a7   :  { %v4045_v4 = vmul.f32 %v466_v46, %v444_v55  ;;  %v4047_v24 = vmul.f32 %v466_v46, %v445_v8  ;;  %671 = vrot.lane.b32.xlu1 %v3439_v17, %s3290_s15  ;;  %v564_v55 = vsel %vm6992_vm7, %v3912_v45, %v3892_v3  ;;  %v4064_v8 = vmul.f32 %v3517_v27, %v3428_v16 }
 0x1a8   :  { %v4068_v46 = vmul.f32 %v3517_v27, %v3503_v26  ;;  %v7118_v9 = vsel %vm4076_vm10, 4294967295, %v7117_v9  ;;  %v4092_v3 = vmul.f32 %v3525_v28, %v3423_v15  ;;  %v579_v62 = vsel %vm4072_vm9, %v564_v55, 0.0 }
 0x1a9   :  { %7113 = vst [vmem:[#allocation95_spill] sm:$0xff] %v4047_v24  ;;  %1064 = vrot.lane.b32.xlu2 %v3423_v15, %s3295_s28  ;;  %v4106_v24 = vmul.f32 %v3546_v32, %v3401_v12  ;;  %v4110_v15 = vmul.f32 %v3546_v32, %v3465_v21  ;;  %v156_v12 = vsel %vm149_vm8, %v3556_v35, %v3579_v41 }
 0x1aa   :  { %7119 = vst [vmem:[#allocation97_spill] sm:$0xff] %v7118_v9  ;;  %v164_v32 = vsel %vm149_vm8, %v3579_v41, %v3556_v35  ;;  %v4151_v35 = vmul.f32 %v3560_v37, %v3439_v17  ;;  %v115_v41 = vmul.f32 %v3569_v39, %v3444_v18  ;;  %v4173_v18 = vsel %vm149_vm8, %v3567_v38, %v3583_v43 }
 0x1ad   :  { %v541_v19 = vpop.permute.xlu1 %540  ;;  %590 = vperm.xlu0 %2944, %v3350_v2  }
 0x1ae   :  { %v4082_v16 = vsel %vm6992_vm7, %v525_v52, %v541_v19  ;;  %v4086_v27 = vsel %vm6992_vm7, %v541_v19, %v525_v52  ;;  %v4088_v45 = vpop.permute.xlu0 %794  ;;  %v580_v52 = vsel %vm4076_vm10, %v556_v1, 0.0  ;;  %v4122_v1 = vmul.f32 %v3558_v36, %v3396_v11 }
 0x1af   :  { %7120 = vst [vmem:[#allocation98_spill] sm:$0xff] %v4082_v16  ;;  %806 = vrot.lane.b32.xlu1 %v3465_v21, %s3291_s26  ;;  %v603_v19 = vpop.permute.xlu2 %602  ;;  %v4118_v16 = vmul.f32 %v3548_v33, %v3376_v7  ;;  %v4143_v11 = vmul.f32 %v3558_v36, %v3537_v30  ;;  %v4163_v36 = vsel %vm149_vm8, %v3583_v43, %v3567_v38  ;;  %v7141_v33 = vld [vmem:[#allocation17_spill] sm:$0xff] }
 0x1b0   :  { %v4112_v23 = vmul.f32 %v603_v19, %v579_v62  ;;  %v4114_v28 = vmul.f32 %v603_v19, %v580_v52  ;;  %v4147_v62 = vmul.f32 %v3560_v37, %v3406_v13  ;;  %v113_v52 = vmul.f32 %v3571_v40, %v3418_v14 }
 0x1b1   :  { %7122 = vst [vmem:[#allocation100_spill] sm:$0xff] %v4118_v16  ;;  %457 = vperm.xlu2 %2938, %v3350_v2   ;;  %v114_v2 = vmul.f32 %v3571_v40, %v3460_v20  ;;  %v165_v13 = vsel %vm149_vm8, %v3617_v51, %v3605_v48  ;;  %v184_v14 = vsel %vm4136_vm11, %v164_v32, 0.0  ;;  %v185_v20 = vsel %vm4076_vm10, %v156_v12, 0.0 }
 0x1b2   :  { %7121 = vst [vmem:[#allocation99_spill] sm:$0xff] %v4114_v28  ;;  %v232_v37 = vmul.f32 %v3603_v47, %v184_v14  ;;  %v157_v40 = vsel %vm149_vm8, %v3605_v48, %v3617_v51  ;;  %v690_v38 = vsel %vm7008_vm12, %v3905_v34, %v3924_v56  ;;  %v698_v43 = vsel %vm7008_vm12, %v3924_v56, %v3905_v34  ;;  %v7187_v28 = vld [vmem:[#allocation68_spill] sm:$0xff] }
 0x1b3   :  { %v233_v12 = vmul.f32 %v3603_v47, %v185_v20  ;;  %v186_v32 = vsel %vm4136_vm11, %v165_v13, 0.0  ;;  %v4215_v34 = vsel %vm149_vm8, %v3607_v49, %v3532_v29  ;;  %v715_v13 = vsel %vm4019_vm5, %v698_v43, 0.0 }
 0x1b4   :  { %7125 = vst [vmem:[#allocation101_spill] sm:$0xff] %v4215_v34  ;;  %v292_v56 = vsel %vm6982_vm1, %v3629_v54, %v3591_v44  ;;  %v4251_v43 = vadd.f32 %v232_v37, %v113_v52 }
 0x1b5   :  { %v676_v19 = vpop.permute.xlu1 %675  ;;  %804 = vrot.lane.b32.xlu0 %v3439_v17, %s3291_s26  ;;  %v116_v17 = vmul.f32 %v3569_v39, %v3470_v22  ;;  %v187_v22 = vsel %vm4076_vm10, %v157_v40, 0.0  ;;  %v300_v39 = vsel %vm6982_vm1, %v3591_v44, %v3629_v54  ;;  %v7129_v54 = vld [vmem:[#allocation8_spill] sm:$0xff] }
 0x1b6   :  { %v4200_v48 = vsel %vm7008_vm12, %v660_v63, %v676_v19  ;;  %v4204_v51 = vsel %vm7008_vm12, %v676_v19, %v660_v63  ;;  %v4206_v14 = vpop.permute.xlu0 %931  ;;  %2953 = vset.pattern.permute.xlu0 %v7065_v60  ;;  %v714_v63 = vsel %vm4006_vm4, %v690_v38, 0.0  ;;  %v234_v19 = vmul.f32 %v3627_v53, %v186_v32 }
 0x1b7   :  { %943 = vrot.lane.b32.xlu1 %v3537_v30, %s3293_s27  ;;  %v4249_v38 = vsel %vm149_vm8, %v3532_v29, %v3607_v49  ;;  %v4253_v32 = vadd.f32 %v233_v12, %v114_v2  ;;  %v4269_v29 = vsel %vm149_vm8, %v3615_v50, %v7129_v54  ;;  %v235_v49 = vmul.f32 %v3627_v53, %v187_v22  ;;  %v7130_v2 = vld [vmem:[#allocation11_spill] sm:$0xff]  ;;  %v7132_v12 = vld [vmem:[#allocation10_spill] sm:$0xff] }
 0x1b8   :  { %v740_v20 = vpop.permute.xlu2 %739  ;;  %7128 = vst [vmem:[#allocation104_spill] sm:$0xff] %v4249_v38  ;;  %v319_v52 = vsel %vm6981_vm2, %v300_v39, 0.0  ;;  %v368_v37 = vmul.f32 %v7130_v2, %v292_v56  ;;  %v250_v53 = vadd.f32 %v234_v19, %v115_v41  ;;  %v7135_v39 = vld [vmem:[#allocation81_spill] sm:$0xff] }
 0x1b9   :  { %v4240_v40 = vmul.f32 %v740_v20, %v714_v63  ;;  %v4242_v47 = vmul.f32 %v740_v20, %v715_v13  ;;  %2939 = vset.pattern.permute.xlu2 %v7035_v31  ;;  %v4263_v31 = vsel %vm149_vm8, %v7129_v54, %v3615_v50  ;;  %v7133_v13 = vld [vmem:[#allocation14_spill] sm:$0xff]  ;;  %v7134_v20 = vld [vmem:[#allocation9_spill] sm:$0xff] }
 0x1ba   :  { %594 = vperm.xlu2 %2939, %v3368_v6   ;;  %v7131_v6 = vld [vmem:[#allocation12_spill] sm:$0xff]  ;;  %v155_v44 = vsel %vm149_vm8, %v7134_v20, %v7133_v13  ;;  %v163_v50 = vsel %vm149_vm8, %v7133_v13, %v7134_v20  ;;  %v7136_v54 = vld [vmem:[#allocation77_spill] sm:$0xff]  ;;  %v367_v13 = vmul.f32 %v7130_v2, %v319_v52 }
 0x1bb   :  { %7126 = vst [vmem:[#allocation102_spill] sm:$0xff] %v4240_v40  ;;  %v154_v63 = vsel %vm149_vm8, %v7132_v12, %v7131_v6  ;;  %v162_v56 = vsel %vm149_vm8, %v7131_v6, %v7132_v12  ;;  %v824_v16 = vsel %vm6969_vm13, %v7136_v54, %v7135_v39  ;;  %v832_v41 = vsel %vm6969_vm13, %v7135_v39, %v7136_v54  ;;  %v7140_v54 = vld [vmem:[#allocation13_spill] sm:$0xff]  ;;  %v7146_v52 = vld [vmem:[#allocation16_spill] sm:$0xff]  ;;  %v7185_v40 = vld [vmem:[#allocation70_spill] sm:$0xff] }
 0x1bc   :  { %7127 = vst [vmem:[#allocation103_spill] sm:$0xff] %v4242_v47  ;;  %v251_v12 = vadd.f32 %v235_v49, %v116_v17  ;;  %v182_v20 = vsel %vm4136_vm11, %v163_v50, 0.0  ;;  %v183_v39 = vsel %vm4076_vm10, %v155_v44, 0.0  ;;  %v180_v49 = vsel %vm4136_vm11, %v162_v56, 0.0  ;;  %v7150_v56 = vld [vmem:[#allocation5_spill] sm:$0xff] }
 0x1bd   :  { %v811_v22 = vpop.permute.xlu1 %810  ;;  %941 = vrot.lane.b32.xlu0 %v3465_v21, %s3293_s27 }
 0x1be   :  { %v4306_v19 = vsel %vm6969_vm13, %v4088_v45, %v811_v22  ;;  %v4311_v6 = vsel %vm6969_vm13, %v811_v22, %v4088_v45  ;;  %v4313_v21 = vpop.permute.xlu0 %1066  ;;  %v299_v45 = vsel %vm6982_vm1, %v7141_v33, %v7140_v54  ;;  %v7142_v22 = vld [vmem:[#allocation19_spill] sm:$0xff] }
 0x1bf   :  { %7137 = vst [vmem:[#allocation8_spill] sm:$0xff] %v4306_v19  ;;  %1078 = vrot.lane.b32.xlu1 %v3503_v26, %s3295_s28  ;;  %v230_v34 = vmul.f32 %v7142_v22, %v182_v20  ;;  %v231_v17 = vmul.f32 %v7142_v22, %v183_v39  ;;  %v7145_v26 = vld [vmem:[#allocation20_spill] sm:$0xff]  ;;  %v851_v20 = vsel %vm4072_vm9, %v824_v16, 0.0  ;;  %v852_v39 = vsel %vm4335_vm15, %v832_v41, 0.0 }
 0x1c0   :  { %7138 = vst [vmem:[#allocation11_spill] sm:$0xff] %v4311_v6  ;;  %v425_v2 = vsel %vm417_vm3, %v7146_v52, %v7145_v26  ;;  %v433_v50 = vsel %vm417_vm3, %v7145_v26, %v7146_v52  ;;  %v7149_v6 = vmov 5   ;;  %v384_v26 = vadd.f32 %v368_v37, %v251_v12 }
 0x1c1   :  { %7139 = vst [vmem:[#allocation12_spill] sm:$0xff] %v4313_v21  ;;  %v879_v22 = vpop.permute.xlu2 %878  ;;  %v181_v21 = vsel %vm4076_vm10, %v154_v63, 0.0  ;;  %v291_v16 = vsel %vm6982_vm1, %v7140_v54, %v7141_v33  ;;  %v317_v41 = vsel %vm6981_vm2, %v299_v45, 0.0  ;;  %v383_v52 = vadd.f32 %v367_v13, %v250_v53  ;;  %v7152_v33 = vld [vmem:[#allocation15_spill] sm:$0xff]  ;;  %v7153_v54 = vld [vmem:[#allocation22_spill] sm:$0xff] }
 0x1c2   :  { %v4355_v38 = vmul.f32 %v879_v22, %v851_v20  ;;  %v4357_v47 = vmul.f32 %v879_v22, %v852_v39  ;;  %2940 = vset.pattern.permute.xlu2 %v7149_v6  ;;  %v4368_v63 = vadd.f32 %v230_v34, %v4092_v3  ;;  %v7151_v20 = vld [vmem:[#allocation23_spill] sm:$0xff]  ;;  %v454_v22 = vsel %vm4027_vm6, %v433_v50, 0.0 }
 0x1c3   :  { %731 = vperm.xlu2 %2940, %v7150_v56   ;;  %v365_v39 = vmul.f32 %v7151_v20, %v317_v41  ;;  %v455_v37 = vsel %vm4019_vm5, %v425_v2, 0.0  ;;  %v4376_v12 = vadd.f32 %v231_v17, %v4096_v61  ;;  %v4382_v53 = vsel %vm6982_vm1, %v7153_v54, %v7152_v33  ;;  %v7156_v17 = vld [vmem:[#allocation89_spill] sm:$0xff]  ;;  %v7157_v41 = vld [vmem:[#allocation24_spill] sm:$0xff]  ;;  %v7159_v56 = vld [vmem:[#allocation83_spill] sm:$0xff] }
 0x1c4   :  { %7147 = vst [vmem:[#allocation10_spill] sm:$0xff] %v4355_v38  ;;  %v298_v3 = vsel %vm6982_vm1, %v7152_v33, %v7153_v54  ;;  %v4392_v61 = vmul.f32 %v7151_v20, %v291_v16  ;;  %v305_v2 = vsel %vm6981_vm2, %v7156_v17, 0.0  ;;  %v7158_v16 = vld [vmem:[#allocation79_spill] sm:$0xff]  ;;  %v7161_v54 = vld [vmem:[#allocation88_spill] sm:$0xff]  ;;  %v7164_v38 = vld [vmem:[#allocation26_spill] sm:$0xff] }
 0x1c5   :  { %7148 = vst [vmem:[#allocation14_spill] sm:$0xff] %v4357_v47  ;;  %v948_v34 = vpop.permute.xlu1 %947  ;;  %1076 = vrot.lane.b32.xlu0 %v3537_v30, %s3295_s28  ;;  %v4408_v30 = vmul.f32 %v7157_v41, %v180_v49  ;;  %v968_v20 = vsel %vm6984_vm0, %v7159_v56, %v7158_v16  ;;  %v315_v49 = vsel %vm6981_vm2, %v298_v3, 0.0  ;;  %v7163_v17 = vld [vmem:[#allocation28_spill] sm:$0xff] }
 0x1c6   :  { %v4397_v13 = vsel %vm6984_vm0, %v4206_v14, %v948_v34  ;;  %v4402_v45 = vsel %vm6984_vm0, %v948_v34, %v4206_v14  ;;  %v323_v50 = vpop.permute.xlu0 %322  ;;  %v4422_v14 = vadd.f32 %v365_v39, %v4251_v43  ;;  %v4425_v34 = vmul.f32 %v7157_v41, %v181_v21  ;;  %v7166_v39 = vld [vmem:[#allocation43_spill] sm:$0xff]  ;;  %v7167_v21 = vld [vmem:[#allocation38_spill] sm:$0xff]  ;;  %v7169_v3 = vld [vmem:[#allocation72_spill] sm:$0xff] }
 0x1c7   :  { %7154 = vst [vmem:[#allocation9_spill] sm:$0xff] %v4397_v13  ;;  %v4414_v33 = vmul.f32 %v323_v50, %v305_v2  ;;  %v4417_v13 = vmul.f32 %v323_v50, %v7161_v54  ;;  %653 = vrot.lane.b32.xlu1 %v3376_v7, %s3290_s15  ;;  %v502_v47 = vmul.f32 %v7163_v17, %v454_v22  ;;  %v7165_v2 = vld [vmem:[#allocation21_spill] sm:$0xff]  ;;  %v7168_v22 = vsel %vm4136_vm11, %v4173_v18, 0.0 }
 0x1c8   :  { %7155 = vst [vmem:[#allocation81_spill] sm:$0xff] %v4402_v45  ;;  %v560_v50 = vsel %vm6992_vm7, %v7165_v2, %v7164_v38  ;;  %v568_v7 = vsel %vm6992_vm7, %v7164_v38, %v7165_v2  ;;  %v503_v43 = vmul.f32 %v7163_v17, %v455_v37  ;;  %v693_v41 = vsel %vm7008_vm12, %v7167_v21, %v7166_v39  ;;  %v7171_v2 = vld [vmem:[#allocation18_spill] sm:$0xff]  ;;  %v7172_v45 = vld [vmem:[#allocation25_spill] sm:$0xff] }
 0x1c9   :  { %7160 = vst [vmem:[#allocation77_spill] sm:$0xff] %v4414_v33  ;;  %v222_v54 = vmul.f32 %v7169_v3, %v7168_v22  ;;  %v960_v38 = vsel %vm6984_vm0, %v7158_v16, %v7159_v56  ;;  %v987_v37 = vsel %vm6983_vm14, %v968_v20, 0.0  ;;  %v4463_v18 = vsel %vm417_vm3, %v7172_v45, %v7171_v2 }
 0x1ca   :  { %7162 = vst [vmem:[#allocation13_spill] sm:$0xff] %v4417_v13  ;;  %v7170_v13 = vsel %vm4076_vm10, %v4163_v36, 0.0  ;;  %v1016_v17 = vpop.permute.xlu2 %1015  ;;  %v701_v36 = vsel %vm7008_vm12, %v7166_v39, %v7167_v21  ;;  %v432_v16 = vsel %vm417_vm3, %v7171_v2, %v7172_v45  ;;  %v518_v56 = vadd.f32 %v502_v47, %v383_v52  ;;  %v4485_v39 = vld [vmem:[%s6856_s1 + $0x18] sm:$0xff]  ;;  %v4497_v45 = vld [vmem:[%s6855_s0] sm:$0xff] }
 0x1cb   :  { %v223_v33 = vmul.f32 %v7169_v3, %v7170_v13  ;;  %v4469_v13 = vmul.f32 %v1016_v17, %v960_v38  ;;  %v4471_v22 = vmul.f32 %v1016_v17, %v987_v37  ;;  %2941 = vset.pattern.permute.xlu2 %v7065_v60  ;;  %v587_v20 = vsel %vm4072_vm9, %v568_v7, 0.0  ;;  %7175 = vst [vmem:[#allocation20_spill] sm:$0xff] %v4485_v39  ;;  %v7176_v38 = vld [vmem:[#allocation33_spill] sm:$0xff]  ;;  %v7180_v7 = vld [vmem:[#allocation52_spill] sm:$0xff] }
 0x1cc   :  { %v588_v3 = vsel %vm4076_vm10, %v560_v50, 0.0  ;;  %870 = vperm.xlu2 %2941, %v4485_v39   ;;  %v519_v21 = vadd.f32 %v503_v43, %v384_v26  ;;  %v635_v37 = vmul.f32 %v7176_v38, %v587_v20  ;;  %v720_v47 = vsel %vm4006_vm4, %v693_v41, 0.0  ;;  %7178 = vst [vmem:[#allocation5_spill] sm:$0xff] %v4497_v45  ;;  %v7179_v50 = vld [vmem:[#allocation57_spill] sm:$0xff]  ;;  %v7181_v20 = vld [vmem:[#allocation50_spill] sm:$0xff] }
 0x1cd   :  { %7173 = vst [vmem:[#allocation17_spill] sm:$0xff] %v4469_v13  ;;  %v636_v17 = vmul.f32 %v7176_v38, %v588_v3  ;;  %v4492_v52 = vpop.permute.xlu1 %1082  ;;  %786 = vrot.lane.b32.xlu0 %v4497_v45, %s3291_s26  ;;  %v721_v26 = vsel %vm4019_vm5, %v701_v36, 0.0  ;;  %v826_v43 = vsel %vm6969_vm13, %v7180_v7, %v7179_v50  ;;  %v238_v41 = vadd.f32 %v222_v54, %v4147_v62  ;;  %v4517_v36 = vld [vmem:[%s6856_s1 + $0x8] sm:$0xff]  ;;  %v7186_v45 = vld [vmem:[#allocation73_spill] sm:$0xff] }
 0x1ce   :  { %7174 = vst [vmem:[#allocation19_spill] sm:$0xff] %v4471_v22  ;;  %v239_v2 = vadd.f32 %v223_v33, %v4151_v35  ;;  %v768_v3 = vmul.f32 %v7181_v20, %v720_v47  ;;  %v834_v38 = vsel %vm6969_vm13, %v7179_v50, %v7180_v7  ;;  %v442_v62 = vsel %vm4027_vm6, %v4039_v10, 0.0  ;;  %v7183_v54 = vld [vmem:[#allocation90_spill] sm:$0xff]  ;;  %v7184_v22 = vld [vmem:[#allocation91_spill] sm:$0xff]  ;;  %vm4553_vm13 = vmand %vm6983_vm14, %vm4019_vm5 }
 0x1cf   :  { %7177 = vst [vmem:[#allocation16_spill] sm:$0xff] %v4492_v52  ;;  %727 = vperm.xlu1 %2945, %v4517_v36   ;;  %v443_v35 = vsel %vm4019_vm5, %v4035_v5, 0.0  ;;  %v462_v33 = vpop.permute.xlu0 %461  ;;  %v371_v47 = vadd.f32 %v7183_v54, %v238_v41  ;;  %v651_v52 = vadd.f32 %v635_v37, %v518_v56  ;;  %v769_v19 = vmul.f32 %v7181_v20, %v721_v26  ;;  %v7192_v20 = vld [vmem:[#allocation27_spill] sm:$0xff] }
 0x1d0   :  { %7182 = vst [vmem:[#allocation23_spill] sm:$0xff] %v4517_v36  ;;  %v372_v50 = vadd.f32 %v7184_v22, %v239_v2  ;;  %v490_v7 = vmul.f32 %v462_v33, %v442_v62  ;;  %v491_v13 = vmul.f32 %v462_v33, %v443_v35  ;;  %v855_v36 = vsel %vm4072_vm9, %v826_v43, 0.0  ;;  %v7195_v35 = vld [vmem:[#allocation86_spill] sm:$0xff] }
 0x1d1   :  { %v969_v10 = vsel %vm6984_vm0, %v7186_v45, %v7185_v40  ;;  %v856_v5 = vsel %vm4335_vm15, %v834_v38, 0.0  ;;  %v903_v41 = vmul.f32 %v7187_v28, %v855_v36  ;;  %v452_v56 = vsel %vm4027_vm6, %v432_v16, 0.0 }
 0x1d2   :  { %v4538_v54 = vadd.f32 %v490_v7, %v371_v47  ;;  %v4540_v22 = vadd.f32 %v491_v13, %v372_v50  ;;  %v652_v37 = vadd.f32 %v636_v17, %v519_v21  ;;  %v904_v26 = vmul.f32 %v7187_v28, %v856_v5  ;;  %v7193_v21 = vld [vmem:[#allocation82_spill] sm:$0xff]  ;;  %v7197_v50 = vld [vmem:[#allocation87_spill] sm:$0xff] }
 0x1d3   :  { %v961_v43 = vsel %vm6984_vm0, %v7185_v40, %v7186_v45  ;;  %v1155_v13 = vpop.permute.xlu2 %1154  ;;  %v363_v38 = vmul.f32 %v7192_v20, %v315_v49  ;;  %v784_v16 = vadd.f32 %v768_v3, %v651_v52  ;;  %v989_v28 = vsel %vm6983_vm14, %v969_v10, 0.0  ;;  %v4571_v49 = vld [vmem:[%s6856_s1 + $0x20] sm:$0xff]  ;;  %v4577_v52 = vld [vmem:[%s6855_s0 + $0x10] sm:$0xff] }
 0x1d4   :  { %7188 = vst [vmem:[#allocation15_spill] sm:$0xff] %v4538_v54  ;;  %v1036_v17 = vmul.f32 %v7193_v21, %v961_v43  ;;  %v7194_v36 = vmov 7   ;;  %v364_v40 = vmul.f32 %v7192_v20, %v4382_v53  ;;  %v785_v45 = vadd.f32 %v769_v19, %v652_v37  ;;  %v7196_v19 = vld [vmem:[#allocation30_spill] sm:$0xff]  ;;  %v7199_v43 = vld [vmem:[#allocation31_spill] sm:$0xff] }
 0x1d5   :  { %7189 = vst [vmem:[#allocation22_spill] sm:$0xff] %v4540_v22  ;;  %2942 = vset.pattern.permute.xlu2 %v7194_v36  ;;  %v1037_v62 = vmul.f32 %v7193_v21, %v989_v28  ;;  %v1123_v33 = vsel %vm4006_vm4, %v7195_v35, 0.0  ;;  %v386_v47 = vpop.permute.xlu1 %385  ;;  %923 = vrot.lane.b32.xlu0 %v4577_v52, %s3293_s27  ;;  %v500_v53 = vmul.f32 %v7196_v19, %v452_v56  ;;  %v1124_v7 = vsel %vm4553_vm13, %v7197_v50, 0.0  ;;  %v7198_v37 = vld [vmem:[#allocation6_spill] sm:$0xff]  ;;  %v7219_v54 = vld [vmem:[#allocation39_spill] sm:$0xff] }
 0x1d6   :  { %1007 = vperm.xlu2 %2942, %v4571_v49   ;;  %v919_v3 = vadd.f32 %v903_v41, %v784_v16  ;;  %v1171_v10 = vmul.f32 %v1155_v13, %v1123_v33  ;;  %v4587_v5 = vadd.f32 %v4392_v61, %v4253_v32  ;;  %v161_v20 = vsel %vm149_vm8, %v7199_v43, %v7198_v37 }
 0x1d7   :  { %v920_v28 = vadd.f32 %v904_v26, %v785_v45  ;;  %v1172_v21 = vmul.f32 %v1155_v13, %v1124_v7  ;;  %2946 = vset.pattern.permute.xlu1 %v7065_v60  ;;  %v4594_v56 = vpop.permute.xlu0 %673  ;;  %v4598_v41 = vadd.f32 %v4408_v30, %v4064_v8  ;;  %v4602_v16 = vadd.f32 %v4425_v34, %v4068_v46  ;;  %v4611_v26 = vld [vmem:[%s6856_s1 + $0x10] sm:$0xff] }
 0x1d8   :  { %v153_v32 = vsel %vm149_vm8, %v7198_v37, %v7199_v43  ;;  %v1052_v61 = vadd.f32 %v1036_v17, %v919_v3  ;;  %7200 = vst [vmem:[#allocation89_spill] sm:$0xff] %v4611_v26  ;;  %866 = vperm.xlu1 %2946, %v4611_v26   ;;  %v4615_v8 = vadd.f32 %v363_v38, %v4368_v63  ;;  %v453_v46 = vsel %vm4019_vm5, %v4463_v18, 0.0  ;;  %v7202_v63 = vld [vmem:[#allocation34_spill] sm:$0xff]  ;;  %v7203_v38 = vld [vmem:[#allocation29_spill] sm:$0xff]  ;;  %v7207_v3 = vld [vmem:[#allocation36_spill] sm:$0xff] }
 0x1d9   :  { %v4618_v30 = vadd.f32 %v364_v40, %v4376_v12  ;;  %v1053_v34 = vadd.f32 %v1037_v62, %v920_v28  ;;  %v4624_v13 = vmul.f32 %v7196_v19, %v453_v46  ;;  %v4627_v17 = vadd.f32 %v500_v53, %v4422_v14  ;;  %v7204_v40 = vld [vmem:[#allocation55_spill] sm:$0xff]  ;;  %v7205_v62 = vld [vmem:[#allocation60_spill] sm:$0xff] }
 0x1da   :  { %v178_v45 = vsel %vm4136_vm11, %v161_v20, 0.0  ;;  %v4631_v35 = vadd.f32 %v1171_v10, %v1052_v61  ;;  %v4637_v12 = vsel %vm6982_vm1, %v7203_v38, %v7202_v63  ;;  %v179_v18 = vsel %vm4076_vm10, %v153_v32, 0.0  ;;  %v7208_v10 = vld [vmem:[#allocation37_spill] sm:$0xff]  ;;  %v7209_v37 = vld [vmem:[#allocation32_spill] sm:$0xff] }
 0x1db   :  { %v295_v14 = vsel %vm6982_vm1, %v7205_v62, %v7204_v40  ;;  %v4645_v33 = vadd.f32 %v1172_v21, %v1053_v34  ;;  %v402_v19 = vpop.permute.xlu2 %401  ;;  %v297_v53 = vsel %vm6982_vm1, %v7202_v63, %v7203_v38  ;;  %v226_v50 = vmul.f32 %v7207_v3, %v178_v45  ;;  %v7211_v21 = vld [vmem:[#allocation53_spill] sm:$0xff] }
 0x1dc   :  { %7201 = vst [vmem:[#allocation24_spill] sm:$0xff] %v4631_v35  ;;  %v227_v7 = vmul.f32 %v7207_v3, %v179_v18  ;;  %v4657_v43 = vsel %vm417_vm3, %v7209_v37, %v7208_v10  ;;  %v177_v20 = vsel %vm4076_vm10, %v4263_v31, 0.0  ;;  %v7210_v28 = vsel %vm4136_vm11, %v4269_v29, 0.0  ;;  %v4679_v31 = vld [vmem:[%s6855_s0 + $0x20] sm:$0xff]  ;;  %v3233_v18 = vld [vmem:[%s6856_s1 + $0x28] sm:$0xff] }
 0x1dd   :  { %7206 = vst [vmem:[#allocation79_spill] sm:$0xff] %v4645_v33  ;;  %v224_v32 = vmul.f32 %v7211_v21, %v7210_v28  ;;  %v4669_v61 = vsel %vm417_vm3, %v386_v47, %v402_v19  ;;  %v4673_v46 = vsel %vm417_vm3, %v402_v19, %v386_v47  ;;  %v523_v34 = vpop.permute.xlu1 %522  ;;  %v7213_v45 = vmov 8   ;;  %1058 = vrot.lane.b32.xlu0 %v4679_v31, %s3295_s28  ;;  %v7215_v19 = vld [vmem:[#allocation41_spill] sm:$0xff] }
 0x1de   :  { %7212 = vst [vmem:[#allocation83_spill] sm:$0xff] %v4669_v61  ;;  %2943 = vset.pattern.permute.xlu2 %v7213_v45  ;;  %v4687_v29 = vsel %vm417_vm3, %v7208_v10, %v7209_v37  ;;  %v225_v47 = vmul.f32 %v7211_v21, %v177_v20  ;;  %v309_v63 = vsel %vm6981_vm2, %v295_v14, 0.0  ;;  %v4693_v38 = vmul.f32 0.70710677, %v4631_v35  ;;  %v7216_v3 = vld [vmem:[#allocation45_spill] sm:$0xff]  ;;  %v7217_v37 = vld [vmem:[#allocation74_spill] sm:$0xff] }
 0x1df   :  { %1146 = vperm.xlu2 %2943, %v3233_v18   ;;  %v296_v28 = vsel %vm6982_vm1, %v7216_v3, %v7215_v19  ;;  %v287_v10 = vsel %vm6982_vm1, %v7204_v40, %v7205_v62  ;;  %v357_v14 = vmul.f32 %v7217_v37, %v309_v63  ;;  %v4708_v20 = vmul.f32 0.70710677, %v4645_v33  ;;  %v4710_v21 = vpop.permute.xlu0 %808 }
 0x1e0   :  { %7214 = vst [vmem:[#allocation88_spill] sm:$0xff] %v4693_v38  ;;  %v242_v35 = vadd.f32 %v226_v50, %v4122_v1  ;;  %v243_v18 = vadd.f32 %v227_v7, %v4143_v11  ;;  %v313_v26 = vsel %vm6981_vm2, %v297_v53, 0.0  ;;  %v358_v22 = vmul.f32 %v7217_v37, %v287_v10  ;;  %2947 = vset.pattern.permute.xlu1 %v7194_v36  ;;  %v7220_v11 = vld [vmem:[#allocation35_spill] sm:$0xff]  ;;  %v7221_v53 = vld [vmem:[#allocation40_spill] sm:$0xff] }
 0x1e1   :  { %7218 = vst [vmem:[#allocation28_spill] sm:$0xff] %v4708_v20  ;;  %v361_v40 = vmul.f32 %v7219_v54, %v313_v26  ;;  %v450_v62 = vsel %vm4027_vm6, %v4687_v29, 0.0  ;;  %v240_v1 = vadd.f32 %v224_v32, %v4106_v24  ;;  %1003 = vperm.xlu1 %2947, %v4485_v39   ;;  %v4731_v50 = vsel %vm6992_vm7, %v7221_v53, %v7220_v11  ;;  %v7223_v32 = vld [vmem:[#allocation56_spill] sm:$0xff]  ;;  %v7224_v39 = vld [vmem:[#allocation58_spill] sm:$0xff] }
 0x1e2   :  { %v241_v26 = vadd.f32 %v225_v47, %v4110_v15  ;;  %v311_v7 = vsel %vm6981_vm2, %v296_v28, 0.0  ;;  %v4737_v29 = vand.u32 2147483647, %v4693_v38  ;;  %v288_v24 = vsel %vm6982_vm1, %v7215_v19, %v7216_v3  ;;  %v7225_v15 = vld [vmem:[#allocation63_spill] sm:$0xff] }
 0x1e3   :  { %v359_v10 = vmul.f32 %v7223_v32, %v311_v7  ;;  %v373_v37 = vadd.f32 %v357_v14, %v240_v1  ;;  %v4745_v63 = vand.u32 2147483647, %v4708_v20  ;;  %v539_v33 = vpop.permute.xlu2 %538  ;;  %v429_v47 = vsel %vm417_vm3, %v7225_v15, %v7224_v39  ;;  %v7231_v20 = vld [vmem:[#allocation48_spill] sm:$0xff] }
 0x1e4   :  { %7222 = vst [vmem:[#allocation26_spill] sm:$0xff] %v4737_v29  ;;  %v374_v28 = vadd.f32 %v358_v22, %v241_v26  ;;  %v4753_v38 = vsel %vm6992_vm7, %v523_v34, %v539_v33  ;;  %v4757_v19 = vsel %vm6992_vm7, %v539_v33, %v523_v34  ;;  %v421_v3 = vsel %vm417_vm3, %v7224_v39, %v7225_v15  ;;  %v7228_v26 = vld [vmem:[#allocation98_spill] sm:$0xff]  ;;  %v4773_v33 = vld [vmem:[%s6856_s1] sm:$0xff]  ;;  %v7229_v34 = vld [vmem:[#allocation95_spill] sm:$0xff] }
 0x1e5   :  { %7226 = vst [vmem:[#allocation21_spill] sm:$0xff] %v4753_v38  ;;  %v508_v14 = vadd.f32 %v4045_v4, %v373_v37  ;;  %v599_v1 = vpop.permute.xlu1 %598  ;;  %v577_v22 = vsel %vm4072_vm9, %v4086_v27, 0.0  ;;  %v578_v7 = vsel %vm4076_vm10, %v7228_v26, 0.0  ;;  %858 = vperm.xlu0 %2953, %v4773_v33   ;;  %v1283_v4 = vmul.f32 0.3275911, %v4737_v29  ;;  %v4781_v27 = vld [vmem:[%s6855_s0 + $0x8] sm:$0xff] }
 0x1e6   :  { %7227 = vst [vmem:[#allocation43_spill] sm:$0xff] %v4757_v19  ;;  %v509_v39 = vadd.f32 %v7229_v34, %v374_v28  ;;  %v625_v37 = vmul.f32 %v599_v1, %v577_v22  ;;  %v626_v15 = vmul.f32 %v599_v1, %v578_v7  ;;  %v7230_v26 = vld [vmem:[#allocation44_spill] sm:$0xff]  ;;  %v360_v19 = vmul.f32 %v7223_v32, %v288_v24  ;;  %v7232_v34 = vld [vmem:[#allocation75_spill] sm:$0xff] }
 0x1e7   :  { %669 = vrot.lane.b32.xlu2 %v4781_v27, %s3290_s15  ;;  %v430_v38 = vsel %vm417_vm3, %v7231_v20, %v7230_v26  ;;  %v446_v28 = vsel %vm4027_vm6, %v429_v47, 0.0  ;;  %v1284_v1 = vmul.f32 0.3275911, %v4745_v63  ;;  %v4793_v22 = vpop.permute.xlu0 %945  ;;  %v447_v7 = vsel %vm4019_vm5, %v421_v3, 0.0 }
 0x1e8   :  { %2949 = vset.pattern.permute.xlu2 %v7149_v6  ;;  %v494_v29 = vmul.f32 %v7232_v34, %v446_v28  ;;  %v4799_v60 = vadd.f32 %v625_v37, %v508_v14  ;;  %v4801_v61 = vadd.f32 %v626_v15, %v509_v39  ;;  %v362_v24 = vmul.f32 %v7219_v54, %v4637_v12 }
 0x1e9   :  { %v377_v32 = vadd.f32 %v361_v40, %v4598_v41  ;;  %v422_v47 = vsel %vm417_vm3, %v7230_v26, %v7231_v20  ;;  %v495_v6 = vmul.f32 %v7232_v34, %v447_v7  ;;  %2948 = vset.pattern.permute.xlu1 %v7213_v45  ;;  %v559_v3 = vsel %vm6992_vm7, %v7220_v11, %v7221_v53  ;;  %v7233_v40 = vld [vmem:[#allocation42_spill] sm:$0xff]  ;;  %v7237_v7 = vld [vmem:[#allocation99_spill] sm:$0xff] }
 0x1ea   :  { %v585_v54 = vsel %vm4072_vm9, %v4731_v50, 0.0  ;;  %v375_v12 = vadd.f32 %v359_v10, %v242_v35  ;;  %v4819_v41 = vadd.f32 1.0, %v1283_v4  ;;  %1142 = vperm.xlu1 %2948, %v4571_v49   ;;  %v498_v20 = vmul.f32 %v7233_v40, %v450_v62  ;;  %v7236_v50 = vld [vmem:[#allocation61_spill] sm:$0xff]  ;;  %v4851_v4 = vld [vmem:[%s6855_s0 + $0x18] sm:$0xff] }
 0x1eb   :  { %v376_v14 = vadd.f32 %v360_v19, %v243_v18  ;;  %v448_v39 = vsel %vm4027_vm6, %v430_v38, 0.0  ;;  %v4825_v37 = vadd.f32 1.0, %v1284_v1  ;;  %v658_v15 = vpop.permute.xlu2 %657  ;;  %v449_v11 = vsel %vm4019_vm5, %v422_v47, 0.0  ;;  %v7234_v18 = vld [vmem:[#allocation59_spill] sm:$0xff]  ;;  %v7235_v38 = vld [vmem:[#allocation66_spill] sm:$0xff] }
 0x1ec   :  { %v510_v53 = vadd.f32 %v494_v29, %v375_v12  ;;  %v4832_v35 = vsel %vm7008_vm12, %v658_v15, %v4594_v56  ;;  %v4837_v49 = vsel %vm7008_vm12, %v4594_v56, %v658_v15  ;;  %v496_v62 = vmul.f32 %v7234_v18, %v448_v39 }
 0x1ed   :  { %v557_v10 = vsel %vm6992_vm7, %v7236_v50, %v7235_v38  ;;  %v565_v29 = vsel %vm6992_vm7, %v7235_v38, %v7236_v50  ;;  %v511_v19 = vadd.f32 %v495_v6, %v376_v14  ;;  %1072 = vrot.lane.b32.xlu0 %v4851_v4, %s3295_s28  ;;  %3122 = vrcp.f32 %v4819_v41  ;;  %v7241_v38 = vld [vmem:[#allocation76_spill] sm:$0xff] }
 0x1ee   :  { %v643_v56 = vadd.f32 %v4112_v23, %v510_v53  ;;  %v736_v26 = vpop.permute.xlu1 %735  ;;  %v712_v28 = vsel %vm4006_vm4, %v4200_v48, 0.0  ;;  %v713_v1 = vsel %vm4019_vm5, %v4204_v51, 0.0  ;;  %2958 = vset.pattern.permute.xlu0 %v7213_v45  ;;  %3124 = vrcp.f32 %v4825_v37  ;;  %v7240_v51 = vld [vmem:[#allocation46_spill] sm:$0xff] }
 0x1ef   :  { %788 = vrot.lane.b32.xlu2 %v4577_v52, %s3291_s26  ;;  %v644_v34 = vadd.f32 %v7237_v7, %v511_v19  ;;  %v760_v23 = vmul.f32 %v736_v26, %v712_v28  ;;  %v761_v47 = vmul.f32 %v736_v26, %v713_v1  ;;  %v4868_v6 = vpop.permute.xlu0 %1080  ;;  %v7239_v48 = vsel %vm4019_vm5, %v4657_v43, 0.0  ;;  %v7243_v28 = vld [vmem:[#allocation51_spill] sm:$0xff] }
 0x1f0   :  { %7238 = vst [vmem:[#allocation38_spill] sm:$0xff] %v4868_v6  ;;  %v499_v12 = vmul.f32 %v7233_v40, %v7239_v48  ;;  %v633_v14 = vmul.f32 %v7240_v51, %v585_v54  ;;  %v497_v39 = vmul.f32 %v7234_v18, %v449_v11  ;;  %v581_v15 = vsel %vm4072_vm9, %v565_v29, 0.0  ;;  %v7242_v54 = vld [vmem:[#allocation47_spill] sm:$0xff]  ;;  %v7248_v48 = vld [vmem:[#allocation64_spill] sm:$0xff] }
 0x1f1   :  { %v582_v53 = vsel %vm4076_vm10, %v557_v10, 0.0  ;;  %v629_v50 = vmul.f32 %v7241_v38, %v581_v15  ;;  %v4882_v19 = vadd.f32 %v760_v23, %v643_v56  ;;  %v4884_v26 = vadd.f32 %v761_v47, %v644_v34  ;;  %v7246_v34 = vld [vmem:[#allocation5_spill] sm:$0xff] }
 0x1f2   :  { %v517_v43 = vadd.f32 %v4624_v13, %v4587_v5  ;;  %v378_v40 = vadd.f32 %v362_v24, %v4602_v16  ;;  %v566_v11 = vsel %vm6992_vm7, %v7243_v28, %v7242_v54  ;;  %v630_v18 = vmul.f32 %v7241_v38, %v582_v53  ;;  %802 = vrot.lane.b32.xlu1 %v4781_v27, %s3291_s26  ;;  %v7247_v47 = vld [vmem:[#allocation69_spill] sm:$0xff]  ;;  %v7250_v53 = vld [vmem:[#allocation8_spill] sm:$0xff] }
 0x1f3   :  { %v514_v10 = vadd.f32 %v498_v20, %v4615_v8  ;;  %v586_v29 = vsel %vm4076_vm10, %v559_v3, 0.0  ;;  %v558_v5 = vsel %vm6992_vm7, %v7242_v54, %v7243_v28  ;;  %v512_v16 = vadd.f32 %v496_v62, %v377_v32  ;;  %v793_v13 = vpop.permute.xlu2 %792  ;;  %2954 = vset.pattern.permute.xlu1 %v7194_v36  ;;  %v4904_v24 = vpop.eup %3122  ;;  %v7252_v28 = vld [vmem:[#allocation103_spill] sm:$0xff] }
 0x1f4   :  { %v515_v56 = vadd.f32 %v499_v12, %v4618_v30  ;;  %v513_v1 = vadd.f32 %v497_v39, %v378_v40  ;;  %vm7244_vm3 = vcmp.lt.s32.totalorder %v3951_v59, 113  ;;  %v4917_v20 = vpop.eup %3124  ;;  %v634_v32 = vmul.f32 %v7240_v51, %v586_v29  ;;  %v7249_v51 = vld [vmem:[#allocation102_spill] sm:$0xff] }
 0x1f5   :  { %v4910_v8 = vsel %vm7244_vm3, %v793_v13, %v4710_v21  ;;  %vm7245_vm8 = vmmov %vm7244_vm3  ;;  %v649_v62 = vadd.f32 %v633_v14, %v4627_v17  ;;  %v583_v30 = vsel %vm4072_vm9, %v566_v11, 0.0  ;;  %v645_v7 = vadd.f32 %v629_v50, %v512_v16  ;;  %1054 = vrot.lane.b32.xlu0 %v7246_v34, %s3295_s28  ;;  %v7251_v50 = vld [vmem:[#allocation11_spill] sm:$0xff]  ;;  %v7254_v16 = vld [vmem:[#allocation49_spill] sm:$0xff] }
 0x1f6   :  { %v4915_v3 = vsel %vm7245_vm8, %v4710_v21, %v793_v13  ;;  %v584_v23 = vsel %vm4076_vm10, %v558_v5, 0.0  ;;  %v691_v21 = vsel %vm7008_vm12, %v7248_v48, %v7247_v47  ;;  %v699_v17 = vsel %vm7008_vm12, %v7247_v47, %v7248_v48  ;;  %v7253_v5 = vld [vmem:[#allocation54_spill] sm:$0xff]  ;;  %vm7259_vm8 = vmmov %vm7244_vm3 }
 0x1f7   :  { %v646_v12 = vadd.f32 %v630_v18, %v513_v1  ;;  %925 = vrot.lane.b32.xlu2 %v4679_v31, %s3293_s27  ;;  %v778_v14 = vadd.f32 %v7249_v51, %v645_v7  ;;  %v1512_v39 = vmul.f32 %v4904_v24, %v4819_v41  ;;  %v875_v15 = vpop.permute.xlu1 %874  ;;  %v849_v38 = vsel %vm4072_vm9, %v7250_v53, 0.0  ;;  %v4946_v54 = vpop.permute.xlu0 %520  ;;  %v7255_v7 = vld [vmem:[#allocation62_spill] sm:$0xff] }
 0x1f8   :  { %v850_v40 = vsel %vm4335_vm15, %v7251_v50, 0.0  ;;  %v1527_v31 = vmul.f32 %v4917_v20, %v4825_v37  ;;  %v897_v18 = vmul.f32 %v875_v15, %v849_v38  ;;  %v692_v13 = vsel %vm7008_vm12, %v7254_v16, %v7253_v5  ;;  %v7256_v38 = vld [vmem:[#allocation71_spill] sm:$0xff] }
 0x1f9   :  { %v779_v11 = vadd.f32 %v7252_v28, %v646_v12  ;;  %v898_v29 = vmul.f32 %v875_v15, %v850_v40  ;;  %v700_v1 = vsel %vm7008_vm12, %v7253_v5, %v7254_v16  ;;  %v631_v47 = vmul.f32 %v7255_v7, %v583_v30  ;;  %v7257_v50 = vld [vmem:[#allocation67_spill] sm:$0xff]  ;;  %v7258_v40 = vld [vmem:[#allocation78_spill] sm:$0xff] }
 0x1fa   :  { %v632_v48 = vmul.f32 %v7255_v7, %v584_v23  ;;  %v716_v12 = vsel %vm4006_vm4, %v691_v21, 0.0  ;;  %v717_v51 = vsel %vm4019_vm5, %v699_v17, 0.0  ;;  %v4965_v15 = vadd.f32 %v897_v18, %v778_v14  ;;  %939 = vrot.lane.b32.xlu1 %v4851_v4, %s3293_s27  ;;  %v7260_v7 = vld [vmem:[#allocation65_spill] sm:$0xff] }
 0x1fb   :  { %v4967_v53 = vadd.f32 %v898_v29, %v779_v11  ;;  %v825_v30 = vsel %vm7244_vm3, %v7257_v50, %v7256_v38  ;;  %v764_v23 = vmul.f32 %v7258_v40, %v716_v12  ;;  %v765_v28 = vmul.f32 %v7258_v40, %v717_v51  ;;  %v930_v5 = vpop.permute.xlu2 %929  ;;  %v7262_v40 = vld [vmem:[#allocation81_spill] sm:$0xff] }
 0x1fc   :  { %v1513_v21 = vsub.f32 1.0, %v1512_v39  ;;  %v833_v17 = vsel %vm7259_vm8, %v7256_v38, %v7257_v50  ;;  %v1528_v14 = vsub.f32 1.0, %v1527_v31  ;;  %v4984_v4 = vsel %vm6984_vm0, %v930_v5, %v4793_v22 }
 0x1fd   :  { %v4989_v11 = vsel %vm6984_vm0, %v4793_v22, %v930_v5  ;;  %v647_v18 = vadd.f32 %v631_v47, %v514_v10  ;;  %v648_v29 = vadd.f32 %v632_v48, %v515_v56  ;;  %v718_v39 = vsel %vm4006_vm4, %v692_v13, 0.0  ;;  %1126 = vperm.xlu0 %2958, %v4773_v33   ;;  %v3237_v22 = vld [vmem:[%s6855_s0 + $0x30] sm:$0xff] }
 0x1fe   :  { %v719_v16 = vsel %vm4019_vm5, %v700_v1, 0.0  ;;  %v650_v31 = vadd.f32 %v634_v32, %v517_v43  ;;  %v766_v12 = vmul.f32 %v7260_v7, %v718_v39  ;;  %v853_v38 = vsel %vm4072_vm9, %v825_v30, 0.0  ;;  %v7261_v1 = vld [vmem:[#allocation80_spill] sm:$0xff] }
 0x1ff   :  { %v767_v51 = vmul.f32 %v7260_v7, %v719_v16  ;;  %1060 = vrot.lane.b32.xlu2 %v3237_v22, %s3295_s28  ;;  %v780_v10 = vadd.f32 %v764_v23, %v647_v18  ;;  %v781_v56 = vadd.f32 %v765_v28, %v648_v29  ;;  %v854_v13 = vsel %vm4335_vm15, %v833_v17, 0.0  ;;  %v5007_v32 = vpop.permute.xlu0 %655  ;;  %v7263_v23 = vld [vmem:[#allocation10_spill] sm:$0xff]  ;;  %v7265_v17 = vld [vmem:[#allocation9_spill] sm:$0xff]  ;;  %v7266_v22 = vld [vmem:[#allocation104_spill] sm:$0xff] }
 0x200   :  { %v1514_v43 = vmul.f32 %v4904_v24, %v1513_v21  ;;  %v901_v47 = vmul.f32 %v7261_v1, %v853_v38  ;;  %v902_v48 = vmul.f32 %v7261_v1, %v854_v13  ;;  %v1529_v50 = vmul.f32 %v4917_v20, %v1528_v14  ;;  %v1012_v30 = vpop.permute.xlu1 %1011  ;;  %v7264_v18 = vld [vmem:[#allocation14_spill] sm:$0xff]  ;;  %v7267_v14 = vld [vmem:[#allocation101_spill] sm:$0xff] }
 0x201   :  { %v985_v5 = vsel %vm6983_vm14, %v7262_v40, 0.0  ;;  %v915_v28 = vadd.f32 %v7263_v23, %v780_v10  ;;  %v916_v29 = vadd.f32 %v7264_v18, %v781_v56  ;;  %v1032_v39 = vmul.f32 %v1012_v30, %v7265_v17  ;;  %v7269_v1 = vld [vmem:[#allocation85_spill] sm:$0xff]  ;;  %v3238_v10 = vld [vmem:[%s6855_s0 + $0x28] sm:$0xff]  ;;  %v7271_v18 = vld [vmem:[#allocation16_spill] sm:$0xff] }
 0x202   :  { %v1033_v21 = vmul.f32 %v1012_v30, %v985_v5  ;;  %v782_v16 = vadd.f32 %v766_v12, %v649_v62  ;;  %v783_v7 = vadd.f32 %v767_v51, %v650_v31  ;;  %v173_v38 = vsel %vm4076_vm10, %v7266_v22, 0.0  ;;  %1074 = vrot.lane.b32.xlu1 %v3238_v10, %s3295_s28  ;;  %v7282_v10 = vld [vmem:[#allocation19_spill] sm:$0xff] }
 0x203   :  { %v7268_v13 = vsel %vm4136_vm11, %v7267_v14, 0.0  ;;  %v5030_v56 = vadd.f32 %v1032_v39, %v915_v28  ;;  %v5034_v31 = vpop.permute.xlu2 %1064  ;;  %v1515_v12 = vadd.f32 %v4904_v24, %v1514_v43  ;;  %vm1517_vm3 = vweird.f32 %v4904_v24  ;;  %v7272_v43 = vld [vmem:[#allocation12_spill] sm:$0xff] }
 0x204   :  { %v220_v6 = vmul.f32 %v7269_v1, %v7268_v13  ;;  %v5032_v62 = vadd.f32 %v1033_v21, %v916_v29  ;;  %v917_v55 = vadd.f32 %v901_v47, %v782_v16  ;;  %v1522_v51 = vand.u32 2147483648, %v4819_v41  ;;  %v7277_v29 = vld [vmem:[#allocation7_spill] sm:$0xff]  ;;  %v7278_v21 = vld [vmem:[#allocation100_spill] sm:$0xff] }
 0x205   :  { %v1530_v30 = vadd.f32 %v4917_v20, %v1529_v50  ;;  %vm1532_vm11 = vweird.f32 %v4917_v20  ;;  %v918_v40 = vadd.f32 %v902_v48, %v783_v7  ;;  %vm1516_vm8 = vweird.f32 %v4819_v41 }
 0x206   :  { %v1520_v5 = vand.u32 2147483647, %v4819_v41  ;;  %v1537_v23 = vand.u32 2147483648, %v4825_v37  ;;  %v7270_v28 = vmov 0   ;;  %vm7273_vm2 = vcmp.lt.s32.totalorder %v3951_v59, 111  ;;  %vm5054_vm14 = vmor %vm1516_vm8, %vm1517_vm3 }
 0x207   :  { %2959 = vset.pattern.permute.xlu0 %v7270_v28  ;;  %v1093_v47 = vsel %vm7273_vm2, %v7272_v43, %v7271_v18  ;;  %vm7274_vm1 = vmmov %vm7273_vm2  ;;  %723 = vperm.xlu2 %2949, %v4773_v33   ;;  %vm1531_vm0 = vweird.f32 %v4825_v37  ;;  %v1535_v41 = vand.u32 2147483647, %v4825_v37  ;;  %v102_v17 = vmul.f32 %v4781_v27, %v7277_v29  ;;  %v5064_v7 = vpop.permute.xlu0 %790  ;;  %v7281_v37 = vld [vmem:[#allocation17_spill] sm:$0xff] }
 0x208   :  { %v1101_v50 = vsel %vm7274_vm1, %v7271_v18, %v7272_v43  ;;  %v221_v39 = vmul.f32 %v7269_v1, %v173_v38  ;;  %v236_v16 = vadd.f32 %v220_v6, %v7278_v21  ;;  %v1519_v22 = vsel %vm5054_vm14, %v4904_v24, %v1515_v12  ;;  %vm5071_vm1 = vmor %vm1531_vm0, %vm1532_vm11 }
 0x209   :  { %v1050_v13 = vadd.f32 %v7281_v37, %v917_v55  ;;  %v1051_v18 = vadd.f32 %v7282_v10, %v918_v40  ;;  %v1523_v43 = vor.u32 1.1754944e-38, %v1522_v51  ;;  %v1534_v6 = vsel %vm5071_vm1, %v4917_v20, %v1530_v30  ;;  %v1151_v38 = vpop.permute.xlu1 %1150  ;;  %v7283_v30 = vld [vmem:[#allocation83_spill] sm:$0xff] }
 0x20a   :  { %v1121_v1 = vsel %vm4006_vm4, %v1093_v47, 0.0  ;;  %v1122_v24 = vsel %vm4553_vm13, %v1101_v50, 0.0  ;;  %vm1521_vm0 = vcmp.eq.f32.partialorder %v1520_v5, 8.507059e+37  ;;  %v1538_v12 = vor.u32 1.1754944e-38, %v1537_v23  ;;  %921 = vrot.lane.b32.xlu1 %v7246_v34, %s3293_s27 }
 0x20b   :  { %v1169_v48 = vmul.f32 %v1151_v38, %v1121_v1  ;;  %v1170_v29 = vmul.f32 %v1151_v38, %v1122_v24  ;;  %v5086_v55 = vsel %vm1521_vm0, %v1523_v43, %v1519_v22  ;;  %vm1536_vm2 = vcmp.eq.f32.partialorder %v1535_v41, 8.507059e+37  ;;  %v458_v47 = vpop.permute.xlu2 %457  ;;  %v7286_v22 = vld [vmem:[#allocation77_spill] sm:$0xff]  ;;  %v7291_v43 = vld [vmem:[#allocation23_spill] sm:$0xff] }
 0x20c   :  { %v237_v51 = vadd.f32 %v221_v39, %v102_v17  ;;  %v440_v20 = vsel %vm4027_vm6, %v4673_v46, 0.0  ;;  %v441_v40 = vsel %vm4019_vm5, %v7283_v30, 0.0  ;;  %v5094_v5 = vsel %vm1536_vm2, %v1538_v12, %v1534_v6  ;;  %v7287_v17 = vld [vmem:[#allocation13_spill] sm:$0xff] }
 0x20d   :  { %v5096_v23 = vadd.f32 %v1169_v48, %v1050_v13  ;;  %v5098_v50 = vadd.f32 %v1170_v29, %v1051_v18  ;;  %v488_v34 = vmul.f32 %v458_v47, %v440_v20  ;;  %v489_v21 = vmul.f32 %v458_v47, %v441_v40  ;;  %v7292_v47 = vld [vmem:[#allocation43_spill] sm:$0xff] }
 0x20e   :  { %v369_v41 = vadd.f32 %v7286_v22, %v236_v16  ;;  %v370_v39 = vadd.f32 %v7287_v17, %v237_v51  ;;  %v1555_v57 = vmul.f32 1.0614054, %v5086_v55  ;;  %v7290_v37 = vmov 6  }
 0x20f   :  { %7284 = vst [vmem:[#allocation72_spill] sm:$0xff] %v5096_v23  ;;  %v5104_v46 = vmul.f32 0.70710677, %v5096_v23  ;;  %v5107_v14 = vmul.f32 0.70710677, %v5098_v50  ;;  %2950 = vset.pattern.permute.xlu2 %v7290_v37  ;;  %v5114_v18 = vpop.permute.xlu0 %927  ;;  %vm7302_vm14 = vcmp.lt.s32.totalorder %v3951_v59, 113 }
 0x210   :  { %7285 = vst [vmem:[#allocation18_spill] sm:$0xff] %v5098_v50  ;;  %v5110_v13 = vadd.f32 %v488_v34, %v369_v41  ;;  %v5112_v10 = vadd.f32 %v489_v21, %v370_v39  ;;  %862 = vperm.xlu2 %2950, %v7291_v43   ;;  %v1556_v16 = vmul.f32 1.0614054, %v5094_v5  ;;  %v1571_v24 = vadd.f32 -1.4531521, %v1555_v57  ;;  %v7293_v21 = vld [vmem:[#allocation21_spill] sm:$0xff]  ;;  %vm7303_vm3 = vmmov %vm7302_vm14 }
 0x211   :  { %7288 = vst [vmem:[#allocation25_spill] sm:$0xff] %v5104_v46  ;;  %v5119_v6 = vand.u32 2147483647, %v5104_v46  ;;  %v5122_v38 = vand.u32 2147483647, %v5107_v14  ;;  %v537_v1 = vpop.permute.xlu1 %536  ;;  %v575_v34 = vsel %vm4072_vm9, %v7292_v47, 0.0 }
 0x212   :  { %7289 = vst [vmem:[#allocation33_spill] sm:$0xff] %v5107_v14  ;;  %995 = vperm.xlu1 %2954, %v7291_v43   ;;  %v553_v29 = vsel %vm6992_vm7, %v4946_v54, %v537_v1  ;;  %v561_v51 = vsel %vm6992_vm7, %v537_v1, %v4946_v54  ;;  %v1572_v20 = vadd.f32 -1.4531521, %v1556_v16  ;;  %v576_v22 = vsel %vm4076_vm10, %v7293_v21, 0.0  ;;  %v7294_v54 = vld [vmem:[#allocation15_spill] sm:$0xff]  ;;  %v7296_v16 = vld [vmem:[#allocation22_spill] sm:$0xff] }
 0x213   :  { %v1281_v12 = vmul.f32 0.3275911, %v5119_v6  ;;  %v1282_v48 = vmul.f32 0.3275911, %v5122_v38  ;;  %v1587_v57 = vmul.f32 %v1571_v24, %v5086_v55  ;;  %v7299_v47 = vld [vmem:[#allocation89_spill] sm:$0xff]  ;;  %v7300_v21 = vld [vmem:[#allocation26_spill] sm:$0xff] }
 0x214   :  { %v595_v41 = vpop.permute.xlu2 %594  ;;  %v710_v50 = vsel %vm4006_vm4, %v4832_v35, 0.0  ;;  %v574_v35 = vsel %vm4076_vm10, %v553_v29, 0.0 }
 0x215   :  { %v5133_v30 = vadd.f32 1.0, %v1281_v12  ;;  %v5135_v40 = vadd.f32 1.0, %v1282_v48  ;;  %v623_v17 = vmul.f32 %v595_v41, %v575_v34  ;;  %v624_v39 = vmul.f32 %v595_v41, %v576_v22 }
 0x216   :  { %v1588_v48 = vmul.f32 %v1572_v20, %v5094_v5  ;;  %v1603_v24 = vadd.f32 1.4214138, %v1587_v57  ;;  %v1699_v22 = vsub.f32 0.0, %v7300_v21  ;;  %v1700_v57 = vsub.f32 0.0, %v4745_v63 }
 0x217   :  { %3126 = vrcp.f32 %v5133_v30  ;;  %v5147_v37 = vadd.f32 %v623_v17, %v7294_v54  ;;  %v5150_v1 = vadd.f32 %v624_v39, %v7296_v16  ;;  %v5152_v12 = vpop.permute.xlu0 %1062  ;;  %vm1486_vm8 = vweird.f32 %v5133_v30 }
 0x218   :  { %3128 = vrcp.f32 %v5135_v40  ;;  %7298 = vst [vmem:[#allocation50_spill] sm:$0xff] %v5152_v12  ;;  %2951 = vset.pattern.permute.xlu2 %v7194_v36  ;;  %v1604_v20 = vadd.f32 1.4214138, %v1588_v48  ;;  %v1619_v48 = vmul.f32 %v1603_v24, %v5086_v55  ;;  %vm1501_vm0 = vweird.f32 %v5135_v40 }
 0x219   :  { %7295 = vst [vmem:[#allocation57_spill] sm:$0xff] %v5147_v37  ;;  %999 = vperm.xlu2 %2951, %v7299_v47   ;;  %v672_v34 = vpop.permute.xlu1 %671 }
 0x21a   :  { %7297 = vst [vmem:[#allocation52_spill] sm:$0xff] %v5150_v1  ;;  %v5161_v41 = vsel %vm7008_vm12, %v5007_v32, %v672_v34  ;;  %v5166_v17 = vsel %vm7008_vm12, %v672_v34, %v5007_v32  ;;  %2955 = vset.pattern.permute.xlu1 %v7213_v45  ;;  %v711_v32 = vsel %vm4019_vm5, %v4837_v49, 0.0  ;;  %v573_v1 = vsel %vm4072_vm9, %v561_v51, 0.0 }
 0x21b   :  { %1134 = vperm.xlu1 %2955, %v7299_v47   ;;  %v1715_v47 = vmul.f32 %v1699_v22, %v7300_v21  ;;  %v1620_v49 = vmul.f32 %v1604_v20, %v5094_v5  ;;  %v1635_v29 = vadd.f32 -0.28449672, %v1619_v48  ;;  %v1505_v20 = vand.u32 2147483647, %v5135_v40 }
 0x21d   :  { %v5170_v39 = vpop.eup %3126  ;;  %v732_v34 = vpop.permute.xlu2 %731 }
 0x21e   :  { %v5173_v54 = vpop.eup %3128  ;;  %v1482_v16 = vmul.f32 %v5170_v39, %v5133_v30  ;;  %v758_v12 = vmul.f32 %v732_v34, %v710_v50  ;;  %v759_v14 = vmul.f32 %v732_v34, %v711_v32  ;;  %v7301_v32 = vld [vmem:[#allocation20_spill] sm:$0xff]  ;;  %vm1487_vm6 = vweird.f32 %v5170_v39 }
 0x21f   :  { %v1497_v23 = vmul.f32 %v5173_v54, %v5135_v40  ;;  %v591_v37 = vpop.permute.xlu0 %590  ;;  %vm1502_vm11 = vweird.f32 %v5173_v54  ;;  %vm5232_vm1 = vmor %vm1486_vm8, %vm1487_vm6  ;;  %v848_v34 = vsel %vm4335_vm15, %v4915_v3, 0.0  ;;  %v1745_v3 = vmul.f32 1.442695, %v1715_v47 }
 0x220   :  { %v1483_v46 = vsub.f32 1.0, %v1482_v16  ;;  %v5193_v24 = vadd.f32 %v758_v12, %v4799_v60  ;;  %v5196_v21 = vadd.f32 %v759_v14, %v4801_v61  ;;  %v621_v22 = vmul.f32 %v591_v37, %v573_v1  ;;  %vm5249_vm2 = vmor %vm1501_vm0, %vm1502_vm11 }
 0x221   :  { %v1498_v43 = vsub.f32 1.0, %v1497_v23  ;;  %2952 = vset.pattern.permute.xlu2 %v7213_v45  ;;  %v622_v16 = vmul.f32 %v591_v37, %v574_v35  ;;  %v807_v51 = vpop.permute.xlu1 %806  ;;  %v1490_v37 = vand.u32 2147483647, %v5133_v30  ;;  %3130 = vpow2.f32 %v1745_v3  ;;  %v7311_v35 = vld [vmem:[#allocation38_spill] sm:$0xff] }
 0x222   :  { %v1484_v50 = vmul.f32 %v5170_v39, %v1483_v46  ;;  %1138 = vperm.xlu2 %2952, %v7301_v32   ;;  %v5204_v60 = vadd.f32 %v621_v22, %v5110_v13  ;;  %v5209_v61 = vsel %vm7302_vm14, %v5064_v7, %v807_v51  ;;  %v5214_v46 = vsel %vm7303_vm3, %v807_v51, %v5064_v7 }
 0x223   :  { %v1499_v23 = vmul.f32 %v5173_v54, %v1498_v43  ;;  %v5217_v14 = vadd.f32 %v622_v16, %v5112_v10  ;;  %1070 = vrot.lane.b32.xlu1 %v4781_v27, %s3295_s28  ;;  %v1492_v13 = vand.u32 2147483648, %v5133_v30  ;;  %v1507_v7 = vand.u32 2147483648, %v5135_v40 }
 0x224   :  { %v1485_v43 = vadd.f32 %v5170_v39, %v1484_v50  ;;  %2960 = vset.pattern.permute.xlu1 %v7270_v28  ;;  %v1716_v10 = vmul.f32 %v1700_v57, %v4745_v63  ;;  %v847_v30 = vsel %vm4072_vm9, %v4910_v8, 0.0  ;;  %v1636_v63 = vadd.f32 -0.28449672, %v1620_v49 }
 0x225   :  { %v1500_v1 = vadd.f32 %v5173_v54, %v1499_v23  ;;  %v1493_v50 = vor.u32 1.1754944e-38, %v1492_v13  ;;  %v1651_v49 = vmul.f32 %v1635_v29, %v5086_v55  ;;  %vm1491_vm6 = vcmp.eq.f32.partialorder %v1490_v37, 8.507059e+37 }
 0x226   :  { %v871_v48 = vpop.permute.xlu2 %870  ;;  %v1489_v57 = vsel %vm5232_vm1, %v5170_v39, %v1485_v43  ;;  %v1508_v16 = vor.u32 1.1754944e-38, %v1507_v7  ;;  %vm1506_vm14 = vcmp.eq.f32.partialorder %v1505_v20, 8.507059e+37  ;;  %vm7308_vm3 = vcmp.lt.s32.totalorder %v3951_v59, 112 }
 0x227   :  { %v895_v40 = vmul.f32 %v871_v48, %v847_v30  ;;  %v896_v22 = vmul.f32 %v871_v48, %v848_v34  ;;  %v1504_v8 = vsel %vm5249_vm2, %v5173_v54, %v1500_v1  ;;  %v5265_v23 = vsel %vm1491_vm6, %v1493_v50, %v1489_v57  ;;  %vm7309_vm11 = vmmov %vm7308_vm3 }
 0x228   :  { %v1747_v47 = vmul.f32 1.442695, %v1716_v10  ;;  %v1667_v29 = vadd.f32 0.2548296, %v1651_v49  ;;  %v1553_v43 = vmul.f32 1.0614054, %v5265_v23 }
 0x229   :  { %v5258_v39 = vadd.f32 %v895_v40, %v4882_v19  ;;  %v5261_v51 = vadd.f32 %v896_v22, %v4884_v26  ;;  %v944_v32 = vpop.permute.xlu1 %943  ;;  %v5278_v26 = vsel %vm1506_vm14, %v1508_v16, %v1504_v8  ;;  %vm7310_vm8 = vcmp.lt.s32.totalorder %v3997_v42, 240 }
 0x22a   :  { %937 = vrot.lane.b32.xlu2 %v4781_v27, %s3293_s27  ;;  %v5270_v54 = vsel %vm7308_vm3, %v5114_v18, %v944_v32  ;;  %v5275_v19 = vsel %vm7309_vm11, %v944_v32, %v5114_v18  ;;  %v1652_v27 = vmul.f32 %v1636_v63, %v5094_v5  ;;  %v1554_v13 = vmul.f32 1.0614054, %v5278_v26 }
 0x22b   :  { %2956 = vset.pattern.permute.xlu2 %v7194_v36  ;;  %3132 = vpow2.f32 %v1747_v47  ;;  %v983_v37 = vsel %vm7310_vm8, %v4989_v11, 0.0  ;;  %v1683_v10 = vmul.f32 %v1667_v29, %v5086_v55  ;;  %v1569_v12 = vadd.f32 -1.4531521, %v1553_v43  ;;  %v3131_v11 = vpop.eup %3130 }
 0x22c   :  { %v1668_v1 = vadd.f32 0.2548296, %v1652_v27  ;;  %v1570_v30 = vadd.f32 -1.4531521, %v1554_v13  ;;  %vm7312_vm1 = vcmp.lt.s32.totalorder %v3951_v59, 111  ;;  %v7315_v27 = vld [vmem:[#allocation28_spill] sm:$0xff] }
 0x22d   :  { %v1585_v57 = vmul.f32 %v1569_v12, %v5265_v23  ;;  %v1092_v40 = vsel %vm7312_vm1, %v5034_v31, %v7311_v35  ;;  %vm7313_vm0 = vmmov %vm7312_vm1  ;;  %vm1236_vm6 = vcmp.ge.f32.partialorder %v7315_v27, 0.0  ;;  %v6993_v29 = vmov -1.0  }
 0x22e   :  { %v1684_v63 = vmul.f32 %v1668_v1, %v5094_v5  ;;  %v1119_v5 = vsel %vm4006_vm4, %v1092_v40, 0.0  ;;  %vm7321_vm14 = vcmp.lt.s32.totalorder %v3951_v59, 113 }
 0x22f   :  { %v1601_v49 = vadd.f32 1.4214138, %v1585_v57  ;;  %vm7322_vm3 = vmmov %vm7321_vm14 }
 0x230   :  { %v1008_v18 = vpop.permute.xlu2 %1007 }
 0x231   :  { %v1030_v36 = vmul.f32 %v1008_v18, %v4984_v4  ;;  %v1031_v7 = vmul.f32 %v1008_v18, %v983_v37  ;;  %v5288_v20 = vpop.permute.xlu1 %1078  ;;  %v1763_v4 = vmul.f32 %v3131_v11, %v1683_v10  ;;  %v3133_v55 = vpop.eup %3132 }
 0x232   :  { %1056 = vrot.lane.b32.xlu2 %v4577_v52, %s3295_s28  ;;  %v1100_v52 = vsel %vm7313_vm0, %v7311_v35, %v5034_v31  ;;  %v1764_v22 = vmul.f32 %v3133_v55, %v1684_v63  ;;  %v708_v55 = vsel %vm4006_vm4, %v5161_v41, 0.0  ;;  %v709_v35 = vsel %vm4019_vm5, %v5166_v17, 0.0 }
 0x233   :  { %v5293_v34 = vadd.f32 %v1030_v36, %v4965_v15  ;;  %v5296_v48 = vadd.f32 %v1031_v7, %v4967_v53  ;;  %v1586_v15 = vmul.f32 %v1570_v30, %v5278_v26  ;;  %v7314_v53 = vld [vmem:[#allocation88_spill] sm:$0xff]  ;;  %v1120_v50 = vsel %vm4553_vm13, %v1100_v52, 0.0  ;;  %v805_v30 = vpop.permute.xlu0 %804 }
 0x234   :  { %vm1235_vm2 = vcmp.ge.f32.partialorder %v7314_v53, 0.0  ;;  %v1779_v3 = vsub.f32 1.0, %v1763_v4  ;;  %v1780_v18 = vsub.f32 1.0, %v1764_v22  ;;  %v1617_v36 = vmul.f32 %v1601_v49, %v5265_v23  ;;  %v7316_v49 = vld [vmem:[#allocation23_spill] sm:$0xff] }
 0x235   :  { %v1602_v31 = vadd.f32 1.4214138, %v1586_v15  ;;  %v1251_v43 = vsel %vm1235_vm2, 1.0, %v6993_v29  ;;  %v1697_v7 = vsub.f32 0.0, %v5119_v6  ;;  %vm7324_vm0 = vcmp.lt.s32.totalorder %v3997_v42, 240 }
 0x236   :  { %v1795_v1 = vmul.f32 %v1779_v3, %v1251_v43  ;;  %v1633_v52 = vadd.f32 -0.28449672, %v1617_v36  ;;  %v7318_v43 = vld [vmem:[#allocation52_spill] sm:$0xff] }
 0x237   :  { %v1618_v12 = vmul.f32 %v1602_v31, %v5278_v26  ;;  %v1713_v15 = vmul.f32 %v1697_v7, %v5119_v6 }
 0x238   :  { %v1811_v40 = vadd.f32 1.0, %v1795_v1  ;;  %v7319_v1 = vld [vmem:[#allocation24_spill] sm:$0xff] }
 0x239   :  { %v1147_v8 = vpop.permute.xlu2 %1146  ;;  %v654_v47 = vpop.permute.xlu1 %653  ;;  %v1203_v36 = vmul.f32 0.5, %v7319_v1 }
 0x23a   :  { %v1167_v16 = vmul.f32 %v1147_v8, %v1119_v5  ;;  %v1168_v32 = vmul.f32 %v1147_v8, %v1120_v50  ;;  %991 = vperm.xlu2 %2956, %v4773_v33   ;;  %v1634_v50 = vadd.f32 -0.28449672, %v1618_v12  ;;  %v1649_v12 = vmul.f32 %v1633_v52, %v5265_v23 }
 0x23c   :  { %v5318_v13 = vadd.f32 %v1167_v16, %v5030_v56  ;;  %v5321_v37 = vadd.f32 %v1168_v32, %v5032_v62  ;;  %v1252_v56 = vsel %vm1236_vm6, 1.0, %v6993_v29  ;;  %v1698_v62 = vsub.f32 0.0, %v5122_v38 }
 0x23d   :  { %v1796_v4 = vmul.f32 %v1780_v18, %v1252_v56  ;;  %v1741_v56 = vmul.f32 1.442695, %v1713_v15  ;;  %v1665_v15 = vadd.f32 0.2548296, %v1649_v12 }
 0x23e   :  { %v5326_v33 = vmul.f32 0.70710677, %v5318_v13  ;;  %v5329_v10 = vmul.f32 0.70710677, %v5321_v37  ;;  %v1714_v6 = vmul.f32 %v1698_v62, %v5122_v38  ;;  %v1650_v38 = vmul.f32 %v1634_v50, %v5278_v26 }
 0x23f   :  { %v1812_v31 = vadd.f32 1.0, %v1796_v4  ;;  %v5373_v4 = vmul.f32 %v1811_v40, %v1203_v36  ;;  %v845_v40 = vsel %vm4072_vm9, %v5209_v61, 0.0 }
 0x240   :  { %v5335_v11 = vand.u32 2147483647, %v5326_v33  ;;  %v5338_v63 = vand.u32 2147483647, %v5329_v10  ;;  %v1743_v62 = vmul.f32 1.442695, %v1714_v6 }
 0x241   :  { %v670_v57 = vpop.permute.xlu2 %669  ;;  %v728_v5 = vpop.permute.xlu1 %727  ;;  %v1666_v50 = vadd.f32 0.2548296, %v1650_v38 }
 0x242   :  { %v1279_v53 = vmul.f32 0.3275911, %v5335_v11  ;;  %v1280_v22 = vmul.f32 0.3275911, %v5338_v63  ;;  %2957 = vset.pattern.permute.xlu2 %v7213_v45  ;;  %v5352_v8 = vsel %vm7008_vm12, %v654_v47, %v670_v57  ;;  %v5356_v41 = vsel %vm7008_vm12, %v670_v57, %v654_v47  ;;  %v7317_v45 = vld [vmem:[#allocation57_spill] sm:$0xff]  ;;  %v7320_v47 = vld [vmem:[#allocation79_spill] sm:$0xff] }
 0x243   :  { %v756_v17 = vmul.f32 %v728_v5, %v708_v55  ;;  %v757_v3 = vmul.f32 %v728_v5, %v709_v35  ;;  %1130 = vperm.xlu2 %2957, %v7316_v49   ;;  %v1204_v7 = vmul.f32 0.5, %v7320_v47  ;;  %v5377_v55 = vpop.permute.xlu0 %941  ;;  %v846_v5 = vsel %vm4335_vm15, %v5214_v46, 0.0 }
 0x244   :  { %v1295_v16 = vadd.f32 1.0, %v1279_v53  ;;  %v5360_v32 = vadd.f32 1.0, %v1280_v22  ;;  %v1682_v1 = vmul.f32 %v1666_v50, %v5278_v26  ;;  %v981_v26 = vsel %vm7324_vm0, %v5275_v19, 0.0 }
 0x245   :  { %v5363_v27 = vadd.f32 %v756_v17, %v7317_v45  ;;  %v5366_v18 = vadd.f32 %v757_v3, %v7318_v43  ;;  %v5375_v57 = vmul.f32 %v1812_v31, %v1204_v7 }
 0x246   :  { %3134 = vrcp.f32 %v1295_v16  ;;  %v1460_v47 = vand.u32 2147483647, %v1295_v16  ;;  %v1462_v7 = vand.u32 2147483648, %v1295_v16  ;;  %vm1456_vm2 = vweird.f32 %v1295_v16 }
 0x247   :  { %3136 = vrcp.f32 %v5360_v32 }
 0x248   :  { %3138 = vpow2.f32 %v1741_v56  ;;  %v7323_v56 = vld [vmem:[#allocation25_spill] sm:$0xff] }
 0x249   :  { %v789_v35 = vpop.permute.xlu2 %788  ;;  %3140 = vpow2.f32 %v1743_v62  ;;  %vm1233_vm11 = vcmp.ge.f32.partialorder %v7323_v56, 0.0 }
 0x24a   :  { %v5381_v53 = vsel %vm7321_vm14, %v789_v35, %v805_v30  ;;  %v5385_v52 = vsel %vm7322_vm3, %v805_v30, %v789_v35  ;;  %v867_v22 = vpop.permute.xlu1 %866  ;;  %v1850_v30 = vadd.f32 %v5375_v57, %v5373_v4  ;;  %vm1461_vm14 = vcmp.eq.f32.partialorder %v1460_v47, 8.507059e+37 }
 0x24b   :  { %2961 = vset.pattern.permute.xlu2 %v7270_v28  ;;  %v893_v3 = vmul.f32 %v867_v22, %v845_v40  ;;  %v894_v49 = vmul.f32 %v867_v22, %v846_v5  ;;  %v1681_v28 = vmul.f32 %v1665_v15, %v5265_v23  ;;  %v1475_v23 = vand.u32 2147483647, %v5360_v32  ;;  %v5410_v15 = vpop.permute.xlu0 %1076 }
 0x24c   :  { %v3135_v17 = vpop.eup %3134  ;;  %vm1471_vm3 = vweird.f32 %v5360_v32 }
 0x24d   :  { %v3137_v6 = vpop.eup %3136  ;;  %v1452_v31 = vmul.f32 %v3135_v17, %v1295_v16  ;;  %v5398_v61 = vadd.f32 %v893_v3, %v5193_v24  ;;  %v5401_v43 = vadd.f32 %v894_v49, %v5196_v21  ;;  %1851 = vadd.xlane.f32.xlu1 %v1850_v30  ;;  %vm1457_vm8 = vweird.f32 %v3135_v17 }
 0x24e   :  { %v1467_v45 = vmul.f32 %v3137_v6, %v5360_v32  ;;  %v3139_v12 = vpop.eup %3138  ;;  %v1477_v24 = vand.u32 2147483648, %v5360_v32  ;;  %vm1472_vm1 = vweird.f32 %v3137_v6  ;;  %vm1458_vm6 = vmor %vm1456_vm2, %vm1457_vm8  ;;  %v1463_v3 = vor.u32 1.1754944e-38, %v1462_v7  ;;  %v7325_v32 = vld [vmem:[#allocation33_spill] sm:$0xff]  ;;  %v7326_v7 = vld [vmem:[#allocation50_spill] sm:$0xff] }
 0x24f   :  { %v1453_v46 = vsub.f32 1.0, %v1452_v31  ;;  %v3141_v21 = vpop.eup %3140  ;;  %v1761_v22 = vmul.f32 %v3139_v12, %v1681_v28  ;;  %vm1473_vm7 = vmor %vm1471_vm3, %vm1472_vm1  ;;  %vm1476_vm0 = vcmp.eq.f32.partialorder %v1475_v23, 8.507059e+37  ;;  %vm1234_vm8 = vcmp.ge.f32.partialorder %v7325_v32, 0.0 }
 0x250   :  { %v1468_v36 = vsub.f32 1.0, %v1467_v45  ;;  %v1762_v40 = vmul.f32 %v3141_v21, %v1682_v1  ;;  %v1478_v28 = vor.u32 1.1754944e-38, %v1477_v24  ;;  %vm7327_vm1 = vcmp.lt.s32.totalorder %v3951_v59, 111 }
 0x251   :  { %v1454_v38 = vmul.f32 %v3135_v17, %v1453_v46  ;;  %v5406_v62 = vpop.permute.xlu2 %925  ;;  %v1777_v46 = vsub.f32 1.0, %v1761_v22  ;;  %v1695_v12 = vsub.f32 0.0, %v5335_v11  ;;  %v1249_v24 = vsel %vm1233_vm11, 1.0, %v6993_v29  ;;  %vm7331_vm3 = vmmov %vm7327_vm1 }
 0x252   :  { %v1469_v35 = vmul.f32 %v3137_v6, %v1468_v36  ;;  %vm1231_vm11 = vcmp.ge.f32.partialorder %v5326_v33, 0.0  ;;  %vm1232_vm2 = vcmp.ge.f32.partialorder %v5329_v10, 0.0  ;;  %v1199_v10 = vmul.f32 0.5, %v5318_v13 }
 0x253   :  { %v1455_v5 = vadd.f32 %v3135_v17, %v1454_v38  ;;  %v1004_v50 = vpop.permute.xlu1 %1003  ;;  %v1793_v23 = vmul.f32 %v1777_v46, %v1249_v24  ;;  %v1711_v56 = vmul.f32 %v1695_v12, %v5335_v11 }
 0x254   :  { %v1470_v49 = vadd.f32 %v3137_v6, %v1469_v35  ;;  %v1028_v30 = vmul.f32 %v1004_v50, %v5270_v54  ;;  %v1029_v31 = vmul.f32 %v1004_v50, %v981_v26  ;;  %v1778_v35 = vsub.f32 1.0, %v1762_v40 }
 0x255   :  { %v1459_v45 = vsel %vm1458_vm6, %v3135_v17, %v1455_v5  ;;  %v1250_v5 = vsel %vm1234_vm8, 1.0, %v6993_v29  ;;  %vm7332_vm8 = vmmov %vm7327_vm1 }
 0x256   :  { %v5418_v36 = vsel %vm1461_vm14, %v1463_v3, %v1459_v45  ;;  %v1474_v19 = vsel %vm1473_vm7, %v3137_v6, %v1470_v49  ;;  %v5421_v16 = vadd.f32 %v1028_v30, %v5258_v39  ;;  %v5424_v1 = vadd.f32 %v1029_v31, %v5261_v51  ;;  %vm7328_vm7 = vmmov %vm7327_vm1  ;;  %v5453_v30 = vpop.permute.xlu0 %786 }
 0x257   :  { %v5426_v47 = vsel %vm1476_vm0, %v1478_v28, %v1474_v19  ;;  %v1551_v54 = vmul.f32 1.0614054, %v5418_v36  ;;  %v1091_v6 = vsel %vm7327_vm1, %v7326_v7, %v5288_v20  ;;  %v1696_v39 = vsub.f32 0.0, %v5338_v63 }
 0x258   :  { %v1552_v17 = vmul.f32 1.0614054, %v5426_v47  ;;  %v1099_v21 = vsel %vm7328_vm7, %v5288_v20, %v7326_v7  ;;  %v1117_v50 = vsel %vm4006_vm4, %v1091_v6, 0.0  ;;  %v1794_v46 = vmul.f32 %v1778_v35, %v1250_v5 }
 0x259   :  { %v5437_v38 = vpop.permute.xlu2 %1060  ;;  %v1567_v51 = vadd.f32 -1.4531521, %v1551_v54  ;;  %v1712_v49 = vmul.f32 %v1696_v39, %v5338_v63  ;;  %v1118_v20 = vsel %vm4553_vm13, %v1099_v21, 0.0  ;;  %v1809_v54 = vadd.f32 1.0, %v1793_v23 }
 0x25a   :  { %v1568_v22 = vadd.f32 -1.4531521, %v1552_v17  ;;  %v706_v63 = vsel %vm4006_vm4, %v5352_v8, 0.0  ;;  %v1737_v6 = vmul.f32 1.442695, %v1711_v56 }
 0x25b   :  { %v1583_v26 = vmul.f32 %v1567_v51, %v5418_v36  ;;  %v1739_v12 = vmul.f32 1.442695, %v1712_v49 }
 0x25c   :  { %v1584_v3 = vmul.f32 %v1568_v22, %v5426_v47  ;;  %v1143_v31 = vpop.permute.xlu1 %1142  ;;  %3142 = vpow2.f32 %v1737_v6 }
 0x25d   :  { %v1599_v40 = vadd.f32 1.4214138, %v1583_v26  ;;  %v1165_v45 = vmul.f32 %v1143_v31, %v1117_v50  ;;  %v1166_v28 = vmul.f32 %v1143_v31, %v1118_v20  ;;  %v7329_v26 = vld [vmem:[#allocation72_spill] sm:$0xff]  ;;  %v7330_v50 = vld [vmem:[#allocation18_spill] sm:$0xff]  ;;  %3144 = vpow2.f32 %v1739_v12 }
 0x25e   :  { %v1600_v19 = vadd.f32 1.4214138, %v1584_v3  ;;  %v1201_v5 = vmul.f32 0.5, %v7329_v26  ;;  %v1202_v3 = vmul.f32 0.5, %v7330_v50  ;;  %v844_v12 = vsel %vm4335_vm15, %v5385_v52, 0.0 }
 0x25f   :  { %v1615_v32 = vmul.f32 %v1599_v40, %v5418_v36  ;;  %v5459_v17 = vadd.f32 %v1165_v45, %v5293_v34  ;;  %v5462_v11 = vadd.f32 %v1166_v28, %v5296_v48  ;;  %v707_v34 = vsel %vm4019_vm5, %v5356_v41, 0.0 }
 0x260   :  { %v1616_v7 = vmul.f32 %v1600_v19, %v5426_v47  ;;  %v1810_v48 = vadd.f32 1.0, %v1794_v46  ;;  %v5496_v28 = vmul.f32 %v1809_v54, %v1201_v5  ;;  %v5500_v19 = vpop.permute.xlu0 %923  ;;  %v843_v54 = vsel %vm4072_vm9, %v5381_v53, 0.0 }
 0x261   :  { %v724_v39 = vpop.permute.xlu2 %723  ;;  %v1631_v51 = vadd.f32 -0.28449672, %v1615_v32  ;;  %v5469_v24 = vmul.f32 0.70710677, %v5459_v17  ;;  %v5472_v21 = vmul.f32 0.70710677, %v5462_v11 }
 0x262   :  { %v754_v35 = vmul.f32 %v724_v39, %v706_v63  ;;  %v755_v22 = vmul.f32 %v724_v39, %v707_v34  ;;  %v1632_v8 = vadd.f32 -0.28449672, %v1616_v7  ;;  %v5498_v46 = vmul.f32 %v1810_v48, %v1202_v3  ;;  %v3143_v34 = vpop.eup %3142 }
 0x263   :  { %v1647_v23 = vmul.f32 %v1631_v51, %v5418_v36  ;;  %v5481_v56 = vand.u32 2147483647, %v5469_v24  ;;  %v5484_v49 = vand.u32 2147483647, %v5472_v21  ;;  %v3145_v53 = vpop.eup %3144  ;;  %v1247_v50 = vsel %vm1231_vm11, 1.0, %v6993_v29 }
 0x264   :  { %v5487_v31 = vadd.f32 %v754_v35, %v5204_v60  ;;  %v5490_v41 = vadd.f32 %v755_v22, %v5217_v14  ;;  %v5492_v20 = vpop.permute.xlu1 %802  ;;  %v1648_v32 = vmul.f32 %v1632_v8, %v5426_v47  ;;  %v1847_v51 = vadd.f32 %v5498_v46, %v5496_v28 }
 0x265   :  { %v1277_v40 = vmul.f32 0.3275911, %v5481_v56  ;;  %v1278_v45 = vmul.f32 0.3275911, %v5484_v49  ;;  %v1663_v60 = vadd.f32 0.2548296, %v1647_v23 }
 0x266   :  { %v1664_v7 = vadd.f32 0.2548296, %v1648_v32 }
 0x267   :  { %v5503_v63 = vadd.f32 1.0, %v1277_v40  ;;  %v5505_v14 = vadd.f32 1.0, %v1278_v45  ;;  %v1679_v6 = vmul.f32 %v1663_v60, %v5418_v36  ;;  %v1248_v45 = vsel %vm1232_vm2, 1.0, %v6993_v29 }
 0x268   :  { %v1680_v36 = vmul.f32 %v1664_v7, %v5426_v47  ;;  %v5532_v32 = vpop.permute.xlu0 %1058 }
 0x269   :  { %3146 = vrcp.f32 %v5503_v63  ;;  %v1759_v22 = vmul.f32 %v3143_v34, %v1679_v6  ;;  %v1200_v6 = vmul.f32 0.5, %v5321_v37  ;;  %v1430_v34 = vand.u32 2147483647, %v5503_v63 }
 0x26a   :  { %v863_v39 = vpop.permute.xlu2 %862  ;;  %3148 = vrcp.f32 %v5505_v14  ;;  %v1760_v26 = vmul.f32 %v3145_v53, %v1680_v36  ;;  %v1447_v53 = vand.u32 2147483648, %v5505_v14  ;;  %v1445_v37 = vand.u32 2147483647, %v5505_v14 }
 0x26b   :  { %v891_v48 = vmul.f32 %v863_v39, %v843_v54  ;;  %v892_v35 = vmul.f32 %v863_v39, %v844_v12  ;;  %v1775_v5 = vsub.f32 1.0, %v1759_v22  ;;  %vm1426_vm0 = vweird.f32 %v5503_v63 }
 0x26c   :  { %1848 = vadd.xlane.f32.xlu2 %v1847_v51  ;;  %v5526_v23 = vpop.permute.xlu1 %939  ;;  %v1776_v3 = vsub.f32 1.0, %v1760_v26  ;;  %v1090_v26 = vsel %vm7331_vm3, %v5437_v38, %v5410_v15  ;;  %vm1441_vm7 = vweird.f32 %v5505_v14  ;;  %vm1431_vm11 = vcmp.eq.f32.partialorder %v1430_v34, 8.507059e+37 }
 0x26d   :  { %v5521_v8 = vadd.f32 %v891_v48, %v5363_v27  ;;  %v5524_v52 = vadd.f32 %v892_v35, %v5366_v18  ;;  %v1791_v40 = vmul.f32 %v1775_v5, %v1247_v50  ;;  %v1432_v48 = vand.u32 2147483648, %v5503_v63 }
 0x26e   :  { %v1792_v60 = vmul.f32 %v1776_v3, %v1248_v45  ;;  %v1098_v3 = vsel %vm7332_vm8, %v5410_v15, %v5437_v38  ;;  %vm1446_vm3 = vcmp.eq.f32.partialorder %v1445_v37, 8.507059e+37  ;;  %v1694_v15 = vsub.f32 0.0, %v5484_v49 }
 0x26f   :  { %v3147_v33 = vpop.eup %3146  ;;  %v1807_v7 = vadd.f32 1.0, %v1791_v40  ;;  %v1433_v40 = vor.u32 1.1754944e-38, %v1432_v48  ;;  %vm7336_vm8 = vcmp.lt.s32.totalorder %v3997_v42, 240 }
 0x270   :  { %v3149_v47 = vpop.eup %3148  ;;  %v1422_v27 = vmul.f32 %v3147_v33, %v5503_v63  ;;  %v1808_v51 = vadd.f32 1.0, %v1792_v60  ;;  %vm1427_vm6 = vweird.f32 %v3147_v33  ;;  %v1448_v60 = vor.u32 1.1754944e-38, %v1447_v53  ;;  %v859_v38 = vpop.permute.xlu0 %858 }
 0x271   :  { %v1437_v18 = vmul.f32 %v3149_v47, %v5505_v14  ;;  %v5543_v22 = vmul.f32 %v1807_v7, %v1199_v10  ;;  %vm1442_vm14 = vweird.f32 %v3149_v47  ;;  %vm1428_vm1 = vmor %vm1426_vm0, %vm1427_vm6  ;;  %v1693_v7 = vsub.f32 0.0, %v5481_v56 }
 0x272   :  { %v1423_v54 = vsub.f32 1.0, %v1422_v27  ;;  %v5551_v5 = vmul.f32 %v1808_v51, %v1200_v6  ;;  %vm1443_vm2 = vmor %vm1441_vm7, %vm1442_vm14  ;;  %vm7333_vm6 = vcmp.lt.s32.totalorder %v3951_v59, 112  ;;  %vm7334_vm14 = vcmp.lt.s32.totalorder %v3951_v59, 113 }
 0x273   :  { %v5537_v12 = vpop.permute.xlu2 %999  ;;  %v1438_v39 = vsub.f32 1.0, %v1437_v18  ;;  %v819_v34 = vsel %vm7334_vm14, %v5453_v30, %v5492_v20  ;;  %v1709_v37 = vmul.f32 %v1693_v7, %v5481_v56  ;;  %vm7335_vm0 = vmmov %vm7334_vm14 }
 0x274   :  { %v1424_v35 = vmul.f32 %v3147_v33, %v1423_v54  ;;  %v5541_v36 = vpop.permute.xlu1 %1074  ;;  %v1844_v27 = vadd.f32 %v5551_v5, %v5543_v22  ;;  %v1115_v54 = vsel %vm4006_vm4, %v1090_v26, 0.0  ;;  %v827_v26 = vsel %vm7335_vm0, %v5492_v20, %v5453_v30  ;;  %vm7337_vm7 = vmmov %vm7333_vm6 }
 0x275   :  { %v1439_v13 = vmul.f32 %v3149_v47, %v1438_v39  ;;  %v842_v30 = vsel %vm4335_vm15, %v827_v26, 0.0  ;;  %v1733_v20 = vmul.f32 1.442695, %v1709_v37  ;;  %vm7338_vm15 = vmmov %vm7333_vm6 }
 0x276   :  { %v1425_v50 = vadd.f32 %v3147_v33, %v1424_v35  ;;  %1845 = vadd.xlane.f32.xlu0 %v1844_v27  ;;  %vm7341_vm14 = vmmov %vm7336_vm8 }
 0x277   :  { %v1440_v45 = vadd.f32 %v3149_v47, %v1439_v13  ;;  %3150 = vpow2.f32 %v1733_v20 }
 0x278   :  { %v1429_v18 = vsel %vm1428_vm1, %v3147_v33, %v1425_v50  ;;  %v964_v33 = vsel %vm7333_vm6, %v5377_v55, %v5406_v62  ;;  %vm1229_vm1 = vcmp.ge.f32.partialorder %v5469_v24, 0.0 }
 0x279   :  { %v5562_v63 = vsel %vm1431_vm11, %v1433_v40, %v1429_v18  ;;  %v1444_v10 = vsel %vm1443_vm2, %v3149_v47, %v1440_v45  ;;  %v1116_v47 = vsel %vm4553_vm13, %v1098_v3, 0.0  ;;  %v1710_v3 = vmul.f32 %v1694_v15, %v5484_v49 }
 0x27a   :  { %v5565_v6 = vsel %vm1446_vm3, %v1448_v60, %v1444_v10  ;;  %v1549_v14 = vmul.f32 1.0614054, %v5562_v63  ;;  %v841_v18 = vsel %vm4072_vm9, %v819_v34, 0.0  ;;  %v979_v56 = vsel %vm7336_vm8, %v964_v33, 0.0 }
 0x27b   :  { %v1550_v51 = vmul.f32 1.0614054, %v5565_v6  ;;  %vm1230_vm11 = vcmp.ge.f32.partialorder %v5472_v21, 0.0  ;;  %v1735_v15 = vmul.f32 1.442695, %v1710_v3  ;;  %v889_v24 = vmul.f32 %v859_v38, %v841_v18 }
 0x27c   :  { %v1139_v39 = vpop.permute.xlu2 %1138  ;;  %v5581_v53 = vpop.permute.xlu1 %921  ;;  %v1565_v13 = vadd.f32 -1.4531521, %v1549_v14  ;;  %v5616_v33 = vmul.f32 0.5, %v5459_v17  ;;  %vm7339_vm2 = vcmp.lt.s32.totalorder %v3951_v59, 111 }
 0x27d   :  { %v1163_v48 = vmul.f32 %v1139_v39, %v1115_v54  ;;  %v1164_v35 = vmul.f32 %v1139_v39, %v1116_v47  ;;  %v1566_v50 = vadd.f32 -1.4531521, %v1550_v51  ;;  %v5613_v14 = vpop.permute.xlu0 %1072  ;;  %v5619_v54 = vmul.f32 0.5, %v5462_v11  ;;  %vm7340_vm3 = vmmov %vm7339_vm2 }
 0x27e   :  { %v1581_v27 = vmul.f32 %v1565_v13, %v5562_v63  ;;  %v5622_v47 = vsel %vm1229_vm1, 1.0, %v6993_v29  ;;  %v890_v39 = vmul.f32 %v859_v38, %v842_v30  ;;  %v1027_v11 = vmul.f32 %v5537_v12, %v979_v56  ;;  %vm7342_vm1 = vmmov %vm7333_vm6 }
 0x27f   :  { %v1179_v40 = vadd.f32 %v1163_v48, %v5421_v16  ;;  %v5591_v45 = vadd.f32 %v1164_v35, %v5424_v1  ;;  %v1582_v60 = vmul.f32 %v1566_v50, %v5565_v6  ;;  %v956_v1 = vsel %vm7337_vm7, %v5406_v62, %v5377_v55  ;;  %vm7343_vm7 = vmmov %vm7342_vm1 }
 0x280   :  { %v1597_v7 = vadd.f32 1.4214138, %v1581_v27  ;;  %v5628_v35 = vsel %vm1230_vm11, 1.0, %v6993_v29  ;;  %v1026_v17 = vmul.f32 %v5537_v12, %v956_v1  ;;  %3152 = vpow2.f32 %v1735_v15  ;;  %vm7344_vm11 = vmmov %vm7341_vm14 }
 0x281   :  { %v5602_v49 = vmul.f32 0.70710677, %v1179_v40  ;;  %v5605_v16 = vmul.f32 0.70710677, %v5591_v45  ;;  %v1598_v10 = vadd.f32 1.4214138, %v1582_v60  ;;  %v5633_v13 = vadd.f32 %v889_v24, %v5487_v31 }
 0x282   :  { %v1613_v62 = vmul.f32 %v1597_v7, %v5562_v63  ;;  %v963_v38 = vsel %vm7338_vm15, %v5526_v23, %v5500_v19  ;;  %v1089_v37 = vsel %vm7339_vm2, %v5532_v32, %v5541_v36  ;;  %v1097_v26 = vsel %vm7340_vm3, %v5541_v36, %v5532_v32  ;;  %vm7345_vm15 = vmmov %vm7339_vm2 }
 0x283   :  { %v1259_v44 = vand.u32 2147483647, %v5602_v49  ;;  %v1260_v21 = vand.u32 2147483647, %v5605_v16  ;;  %v1614_v48 = vmul.f32 %v1598_v10, %v5565_v6  ;;  %v5650_v3 = vadd.f32 %v890_v39, %v5490_v41  ;;  %vm7346_vm3 = vmmov %vm7339_vm2 }
 0x284   :  { %v938_v55 = vpop.permute.xlu2 %937  ;;  %v996_v34 = vpop.permute.xlu1 %995  ;;  %v1629_v31 = vadd.f32 -0.28449672, %v1613_v62  ;;  %v955_v27 = vsel %vm7333_vm6, %v5500_v19, %v5526_v23  ;;  %v1042_v60 = vadd.f32 %v1026_v17, %v5398_v61  ;;  %v1043_v30 = vadd.f32 %v1027_v11, %v5401_v43  ;;  %vm7347_vm6 = vmmov %vm7339_vm2 }
 0x285   :  { %v1275_v51 = vmul.f32 0.3275911, %v1259_v44  ;;  %v1691_v50 = vsub.f32 0.0, %v1259_v44  ;;  %v1692_v18 = vsub.f32 0.0, %v1260_v21  ;;  %v1630_v56 = vadd.f32 -0.28449672, %v1614_v48  ;;  %v3151_v23 = vpop.eup %3150  ;;  %v1055_v62 = vpop.permute.xlu0 %1054 }
 0x286   :  { %v977_v32 = vsel %vm7341_vm14, %v963_v38, 0.0  ;;  %v1645_v36 = vmul.f32 %v1629_v31, %v5562_v63  ;;  %v1276_v1 = vmul.f32 0.3275911, %v1260_v21  ;;  %v1113_v41 = vsel %vm4006_vm4, %v1089_v37, 0.0  ;;  %v3153_v15 = vpop.eup %3152 }
 0x287   :  { %v5647_v12 = vadd.f32 1.0, %v1275_v51  ;;  %v1114_v20 = vsel %vm4553_vm13, %v1097_v26, 0.0  ;;  %v1646_v19 = vmul.f32 %v1630_v56, %v5565_v6  ;;  %v5666_v7 = vmul.f32 0.5, %v1179_v40 }
 0x288   :  { %v1707_v61 = vmul.f32 %v1691_v50, %v1259_v44  ;;  %v1661_v10 = vadd.f32 0.2548296, %v1645_v36  ;;  %vm1227_vm0 = vcmp.ge.f32.partialorder %v5602_v49, 0.0  ;;  %vm1228_vm8 = vcmp.ge.f32.partialorder %v5605_v16, 0.0 }
 0x289   :  { %3154 = vrcp.f32 %v5647_v12  ;;  %v1708_v24 = vmul.f32 %v1692_v18, %v1260_v21  ;;  %v1662_v39 = vadd.f32 0.2548296, %v1646_v19  ;;  %v962_v51 = vsel %vm7342_vm1, %v938_v55, %v5581_v53 }
 0x28a   :  { %v1024_v48 = vmul.f32 %v996_v34, %v955_v27  ;;  %v1025_v40 = vmul.f32 %v996_v34, %v977_v32  ;;  %v1677_v11 = vmul.f32 %v1661_v10, %v5562_v63  ;;  %v5675_v44 = vadd.f32 1.0, %v1276_v1 }
 0x28b   :  { %v1678_v49 = vmul.f32 %v1662_v39, %v5565_v6  ;;  %v5679_v26 = vmul.f32 0.5, %v5591_v45  ;;  %v5682_v21 = vsel %vm1227_vm0, 1.0, %v6993_v29  ;;  %v1729_v50 = vmul.f32 1.442695, %v1707_v61 }
 0x28c   :  { %v1057_v43 = vpop.permute.xlu2 %1056  ;;  %v1757_v31 = vmul.f32 %v3151_v23, %v1677_v11  ;;  %v5687_v34 = vsel %vm1228_vm8, 1.0, %v6993_v29  ;;  %v1731_v63 = vmul.f32 1.442695, %v1708_v24  ;;  %v954_v6 = vsel %vm7343_vm7, %v5581_v53, %v938_v55 }
 0x28d   :  { %v1135_v17 = vpop.permute.xlu1 %1134  ;;  %v5699_v45 = vadd.f32 %v1024_v48, %v5521_v8  ;;  %v5702_v32 = vadd.f32 %v1025_v40, %v5524_v52  ;;  %v975_v16 = vsel %vm7344_vm11, %v962_v51, 0.0  ;;  %3156 = vrcp.f32 %v5675_v44  ;;  %v1127_v51 = vpop.permute.xlu0 %1126 }
 0x28e   :  { %v1161_v38 = vmul.f32 %v1135_v17, %v1113_v41  ;;  %v1162_v37 = vmul.f32 %v1135_v17, %v1114_v20  ;;  %v1402_v36 = vand.u32 2147483648, %v5647_v12  ;;  %3158 = vpow2.f32 %v1729_v50 }
 0x28f   :  { %v5693_v56 = vpop.eup %3154  ;;  %v1773_v55 = vsub.f32 1.0, %v1757_v31  ;;  %v1400_v52 = vand.u32 2147483647, %v5647_v12  ;;  %3160 = vpow2.f32 %v1731_v63  ;;  %v1088_v41 = vsel %vm7345_vm15, %v1057_v43, %v5613_v14 }
 0x290   :  { %v5689_v27 = vadd.f32 %v1161_v38, %v1042_v60  ;;  %v5691_v18 = vadd.f32 %v1162_v37, %v1043_v30  ;;  %v1758_v30 = vmul.f32 %v3153_v15, %v1678_v49  ;;  %v1392_v1 = vmul.f32 %v5693_v56, %v5647_v12 }
 0x291   :  { %v1096_v19 = vsel %vm7339_vm2, %v5613_v14, %v1057_v43  ;;  %v1415_v15 = vand.u32 2147483647, %v5675_v44  ;;  %v5728_v40 = vor.u32 1.1754944e-38, %v1402_v36  ;;  %v1789_v14 = vmul.f32 %v1773_v55, %v5622_v47 }
 0x292   :  { %v5708_v60 = vmul.f32 0.70710677, %v5689_v27  ;;  %v5712_v53 = vmul.f32 0.70710677, %v5691_v18  ;;  %v1774_v48 = vsub.f32 1.0, %v1758_v30  ;;  %v1111_v43 = vsel %vm4006_vm4, %v1088_v41, 0.0 }
 0x293   :  { %v5736_v38 = vpop.eup %3156  ;;  %v1393_v37 = vsub.f32 1.0, %v1392_v1  ;;  %vm1396_vm14 = vweird.f32 %v5647_v12  ;;  %vm1397_vm0 = vweird.f32 %v5693_v56  ;;  %vm1411_vm8 = vweird.f32 %v5675_v44 }
 0x294   :  { %v992_v8 = vpop.permute.xlu2 %991  ;;  %v1257_v20 = vand.u32 2147483647, %v5708_v60  ;;  %v5725_v23 = vand.u32 2147483647, %v5712_v53  ;;  %v5744_v63 = vpop.eup %3158  ;;  %v1790_v55 = vmul.f32 %v1774_v48, %v5628_v35  ;;  %v1407_v1 = vmul.f32 %v5736_v38, %v5675_v44  ;;  %vm5820_vm11 = vmor %vm1396_vm14, %vm1397_vm0 }
 0x295   :  { %v1022_v61 = vmul.f32 %v992_v8, %v954_v6  ;;  %v1071_v10 = vpop.permute.xlu1 %1070  ;;  %v1023_v39 = vmul.f32 %v992_v8, %v975_v16  ;;  %v5751_v36 = vpop.eup %3160  ;;  %vm1412_vm1 = vweird.f32 %v5736_v38  ;;  %vm5795_vm7 = vcmp.eq.f32.partialorder %v1415_v15, 8.507059e+37 }
 0x296   :  { %v1273_v24 = vmul.f32 0.3275911, %v1257_v20  ;;  %v1274_v17 = vmul.f32 0.3275911, %v5725_v23  ;;  %v1087_v11 = vsel %vm7346_vm3, %v1055_v62, %v1071_v10  ;;  %v1095_v50 = vsel %vm7347_vm6, %v1071_v10, %v1055_v62  ;;  %vm1413_vm3 = vmor %vm1411_vm8, %vm1412_vm1 }
 0x297   :  { %v1109_v31 = vsel %vm4006_vm4, %v1087_v11, 0.0  ;;  %v1038_v47 = vadd.f32 %v1022_v61, %v5633_v13  ;;  %v1110_v16 = vsel %vm4553_vm13, %v1095_v50, 0.0  ;;  %v1039_v8 = vadd.f32 %v1023_v39, %v5650_v3 }
 0x298   :  { %v5738_v49 = vadd.f32 1.0, %v1273_v24  ;;  %v5746_v6 = vadd.f32 1.0, %v1274_v17  ;;  %v1157_v30 = vmul.f32 %v1127_v51, %v1109_v31  ;;  %v1158_v62 = vmul.f32 %v1127_v51, %v1110_v16 }
 0x299   :  { %v1805_v13 = vadd.f32 1.0, %v1789_v14  ;;  %v1112_v61 = vsel %vm4553_vm13, %v1096_v19, 0.0  ;;  %v1394_v10 = vmul.f32 %v5693_v56, %v1393_v37  ;;  %v1806_v17 = vadd.f32 1.0, %v1790_v55 }
 0x29a   :  { %3162 = vrcp.f32 %v5738_v49  ;;  %v5759_v41 = vadd.f32 %v1157_v30, %v1038_v47  ;;  %v5764_v24 = vadd.f32 %v1158_v62, %v1039_v8  ;;  %v1417_v39 = vand.u32 2147483648, %v5675_v44 }
 0x29b   :  { %3164 = vrcp.f32 %v5746_v6  ;;  %v1689_v35 = vsub.f32 0.0, %v1257_v20  ;;  %v5772_v48 = vmul.f32 %v1805_v13, %v5616_v33  ;;  %v1690_v2 = vsub.f32 0.0, %v5725_v23 }
 0x29c   :  { %v5769_v51 = vmul.f32 0.70710677, %v5759_v41  ;;  %v5776_v19 = vmul.f32 0.70710677, %v5764_v24  ;;  %v5779_v11 = vmul.f32 %v1806_v17, %v5619_v54  ;;  %vm5781_vm13 = vcmp.eq.f32.partialorder %v1400_v52, 8.507059e+37 }
 0x29d   :  { %v1131_v3 = vpop.permute.xlu2 %1130  ;;  %v1408_v50 = vsub.f32 1.0, %v1407_v1  ;;  %v1395_v52 = vadd.f32 %v5693_v56, %v1394_v10  ;;  %v1418_v55 = vor.u32 1.1754944e-38, %v1417_v39  ;;  %v5800_v1 = vmul.f32 0.5, %v5689_v27 }
 0x29e   :  { %7348 = vst [vmem:[#allocation90_spill] sm:$0xff] %v5779_v11  ;;  %v1159_v14 = vmul.f32 %v1131_v3, %v1111_v43  ;;  %v1253_v31 = vand.u32 2147483647, %v5769_v51  ;;  %v1160_v47 = vmul.f32 %v1131_v3, %v1112_v61  ;;  %v1254_v16 = vand.u32 2147483647, %v5776_v19 }
 0x29f   :  { %v1841_v54 = vadd.f32 %v5779_v11, %v5772_v48  ;;  %v1705_v43 = vmul.f32 %v1689_v35, %v1257_v20  ;;  %v1706_v13 = vmul.f32 %v1690_v2, %v5725_v23  ;;  %v1409_v20 = vmul.f32 %v5736_v38, %v1408_v50 }
 0x2a0   :  { %v5788_v33 = vpop.eup %3162  ;;  %v1269_v30 = vmul.f32 0.3275911, %v1253_v31  ;;  %v1685_v8 = vsub.f32 0.0, %v1253_v31  ;;  %v1270_v61 = vmul.f32 0.3275911, %v1254_v16  ;;  %v5804_v17 = vadd.f32 %v1159_v14, %v5699_v45 }
 0x2a1   :  { %1842 = vadd.xlane.f32.xlu2 %v1841_v54  ;;  %v5806_v10 = vpop.eup %3164  ;;  %v1362_v15 = vmul.f32 %v5788_v33, %v5738_v49  ;;  %v5814_v39 = vadd.f32 %v1160_v47, %v5702_v32  ;;  %vm1225_vm15 = vcmp.ge.f32.partialorder %v5708_v60, 0.0  ;;  %v1686_v23 = vsub.f32 0.0, %v1254_v16 }
 0x2a2   :  { %v5811_v3 = vadd.f32 1.0, %v1269_v30  ;;  %v5825_v45 = vadd.f32 1.0, %v1270_v61  ;;  %v1399_v35 = vsel %vm5820_vm11, %v5693_v56, %v1395_v52  ;;  %vm1226_vm2 = vcmp.ge.f32.partialorder %v5712_v53, 0.0 }
 0x2a3   :  { %v1725_v32 = vmul.f32 1.442695, %v1705_v43  ;;  %v1701_v2 = vmul.f32 %v1685_v8, %v1253_v31  ;;  %v1377_v12 = vmul.f32 %v5806_v10, %v5746_v6  ;;  %v1727_v14 = vmul.f32 1.442695, %v1706_v13 }
 0x2a4   :  { %3166 = vrcp.f32 %v5811_v3  ;;  %v5836_v50 = vmul.f32 0.70710677, %v5804_v17  ;;  %v1363_v47 = vsub.f32 1.0, %v1362_v15  ;;  %v5839_v54 = vmul.f32 0.70710677, %v5814_v39 }
 0x2a5   :  { %3168 = vrcp.f32 %v5825_v45  ;;  %v5844_v56 = vsel %vm5781_vm13, %v5728_v40, %v1399_v35  ;;  %v1410_v31 = vadd.f32 %v5736_v38, %v1409_v20  ;;  %v5850_v52 = vsel %vm1225_vm15, 1.0, %v6993_v29 }
 0x2a6   :  { %v1702_v43 = vmul.f32 %v1686_v23, %v1254_v16  ;;  %v5853_v30 = vand.u32 2147483647, %v5836_v50  ;;  %v1547_v37 = vmul.f32 1.0614054, %v5844_v56  ;;  %v5863_v40 = vsel %vm1226_vm2, 1.0, %v6993_v29 }
 0x2a7   :  { %v1717_v8 = vmul.f32 1.442695, %v1701_v2  ;;  %v5866_v60 = vand.u32 2147483647, %v5839_v54  ;;  %v1414_v16 = vsel %vm1413_vm3, %v5736_v38, %v1410_v31  ;;  %v1378_v13 = vsub.f32 1.0, %v1377_v12 }
 0x2a8   :  { %3170 = vpow2.f32 %v1725_v32  ;;  %v1271_v61 = vmul.f32 0.3275911, %v5853_v30  ;;  %v5872_v44 = vsel %vm5795_vm7, %v1418_v55, %v1414_v16  ;;  %v1364_v53 = vmul.f32 %v5788_v33, %v1363_v47 }
 0x2a9   :  { %3172 = vpow2.f32 %v1727_v14  ;;  %v1272_v15 = vmul.f32 0.3275911, %v5866_v60  ;;  %v1548_v27 = vmul.f32 1.0614054, %v5872_v44  ;;  %v1719_v35 = vmul.f32 1.442695, %v1702_v43 }
 0x2aa   :  { %v5874_v20 = vpop.eup %3166  ;;  %v5883_v32 = vadd.f32 1.0, %v1271_v61  ;;  %v1563_v62 = vadd.f32 -1.4531521, %v1547_v37  ;;  %3174 = vpow2.f32 %v1717_v8  ;;  %v1379_v14 = vmul.f32 %v5806_v10, %v1378_v13 }
 0x2ab   :  { %v5879_v23 = vpop.eup %3168  ;;  %v1302_v38 = vmul.f32 %v5874_v20, %v5811_v3  ;;  %v5887_v2 = vadd.f32 1.0, %v1272_v15  ;;  %v1564_v12 = vadd.f32 -1.4531521, %v1548_v27  ;;  %v1365_v37 = vadd.f32 %v5788_v33, %v1364_v53 }
 0x2ac   :  { %v1317_v55 = vmul.f32 %v5879_v23, %v5825_v45  ;;  %3176 = vrcp.f32 %v5883_v32  ;;  %v1579_v31 = vmul.f32 %v1563_v62, %v5844_v56  ;;  %vm1366_vm6 = vweird.f32 %v5738_v49 }
 0x2ad   :  { %v1303_v47 = vsub.f32 1.0, %v1302_v38  ;;  %3178 = vrcp.f32 %v5887_v2  ;;  %v1580_v43 = vmul.f32 %v1564_v12, %v5872_v44  ;;  %vm1367_vm14 = vweird.f32 %v5788_v33 }
 0x2ae   :  { %v1318_v16 = vsub.f32 1.0, %v1317_v55  ;;  %v5895_v61 = vpop.eup %3170  ;;  %3180 = vpow2.f32 %v1719_v35  ;;  %v1595_v13 = vadd.f32 1.4214138, %v1579_v31  ;;  %vm5905_vm13 = vmor %vm1366_vm6, %vm1367_vm14  ;;  %v1370_v35 = vand.u32 2147483647, %v5738_v49 }
 0x2af   :  { %v1304_v8 = vmul.f32 %v5874_v20, %v1303_v47  ;;  %v5899_v27 = vpop.eup %3172  ;;  %v1596_v62 = vadd.f32 1.4214138, %v1580_v43  ;;  %v1372_v12 = vand.u32 2147483648, %v5738_v49  ;;  %v1380_v47 = vadd.f32 %v5806_v10, %v1379_v14 }
 0x2b0   :  { %v1319_v38 = vmul.f32 %v5879_v23, %v1318_v16  ;;  %v1611_v55 = vmul.f32 %v1595_v13, %v5844_v56  ;;  %v5912_v31 = vpop.eup %3174  ;;  %v1369_v43 = vsel %vm5905_vm13, %v5788_v33, %v1365_v37  ;;  %vm1381_vm0 = vweird.f32 %v5746_v6 }
 0x2b1   :  { %v1612_v16 = vmul.f32 %v1596_v62, %v5872_v44  ;;  %vm1382_vm8 = vweird.f32 %v5806_v10  ;;  %vm1371_vm1 = vcmp.eq.f32.partialorder %v1370_v35, 8.507059e+37  ;;  %v1373_v15 = vor.u32 1.1754944e-38, %v1372_v12 }
 0x2b2   :  { %v5920_v13 = vpop.eup %3176  ;;  %v1627_v29 = vadd.f32 -0.28449672, %v1611_v55  ;;  %vm5922_vm7 = vmor %vm1381_vm0, %vm1382_vm8  ;;  %v1385_v14 = vand.u32 2147483647, %v5746_v6  ;;  %v1387_v55 = vand.u32 2147483648, %v5746_v6  ;;  %v1305_v6 = vadd.f32 %v5874_v20, %v1304_v8 }
 0x2b3   :  { %v5927_v62 = vpop.eup %3178  ;;  %v1332_v33 = vmul.f32 %v5920_v13, %v5883_v32  ;;  %v1628_v37 = vadd.f32 -0.28449672, %v1612_v16  ;;  %v1384_v53 = vsel %vm5922_vm7, %v5806_v10, %v1380_v47  ;;  %v5940_v0 = vsel %vm1371_vm1, %v1373_v15, %v1369_v43 }
 0x2b4   :  { %v5935_v35 = vpop.eup %3180  ;;  %v1347_v12 = vmul.f32 %v5927_v62, %v5887_v2  ;;  %v1643_v42 = vmul.f32 %v1627_v29, %v5844_v56  ;;  %vm1386_vm11 = vcmp.eq.f32.partialorder %v1385_v14, 8.507059e+37  ;;  %v1388_v16 = vor.u32 1.1754944e-38, %v1387_v55 }
 0x2b5   :  { %v1333_v58 = vsub.f32 1.0, %v1332_v33  ;;  %v1644_v9 = vmul.f32 %v1628_v37, %v5872_v44  ;;  %v1545_v25 = vmul.f32 1.0614054, %v5940_v0  ;;  %vm1306_vm15 = vweird.f32 %v5811_v3 }
 0x2b6   :  { %v1348_v49 = vsub.f32 1.0, %v1347_v12  ;;  %v1659_v10 = vadd.f32 0.2548296, %v1643_v42  ;;  %v5947_v11 = vsel %vm1386_vm11, %v1388_v16, %v1384_v53  ;;  %vm1307_vm2 = vweird.f32 %v5874_v20 }
 0x2b7   :  { %v1334_v47 = vmul.f32 %v5920_v13, %v1333_v58  ;;  %v1660_v59 = vadd.f32 0.2548296, %v1644_v9  ;;  %v1561_v29 = vadd.f32 -1.4531521, %v1545_v25  ;;  %v1546_v14 = vmul.f32 1.0614054, %v5947_v11  ;;  %vm5957_vm3 = vmor %vm1306_vm15, %vm1307_vm2 }
 0x2b8   :  { %v5950_v15 = vmul.f32 %v5927_v62, %v1348_v49  ;;  %v1675_v43 = vmul.f32 %v1659_v10, %v5844_v56  ;;  %v1310_v58 = vand.u32 2147483647, %v5811_v3  ;;  %v1312_v25 = vand.u32 2147483648, %v5811_v3 }
 0x2b9   :  { %v1676_v42 = vmul.f32 %v1660_v59, %v5872_v44  ;;  %v1577_v8 = vmul.f32 %v1561_v29, %v5940_v0  ;;  %v1562_v37 = vadd.f32 -1.4531521, %v1546_v14  ;;  %v1309_v56 = vsel %vm5957_vm3, %v5874_v20, %v1305_v6 }
 0x2ba   :  { %v1755_v9 = vmul.f32 %v5744_v63, %v1675_v43  ;;  %v1320_v53 = vadd.f32 %v5879_v23, %v1319_v38  ;;  %vm1311_vm6 = vcmp.eq.f32.partialorder %v1310_v58, 8.507059e+37  ;;  %v1313_v55 = vor.u32 1.1754944e-38, %v1312_v25 }
 0x2bb   :  { %v1756_v59 = vmul.f32 %v5751_v36, %v1676_v42  ;;  %v1593_v44 = vadd.f32 1.4214138, %v1577_v8  ;;  %v1578_v16 = vmul.f32 %v1562_v37, %v5947_v11  ;;  %vm1321_vm14 = vweird.f32 %v5825_v45 }
 0x2bc   :  { %v1771_v12 = vsub.f32 1.0, %v1755_v9  ;;  %vm1322_vm13 = vweird.f32 %v5879_v23  ;;  %v5973_v49 = vsel %vm1311_vm6, %v1313_v55, %v1309_v56  ;;  %v1325_v36 = vand.u32 2147483647, %v5825_v45 }
 0x2bd   :  { %v1772_v63 = vsub.f32 1.0, %v1756_v59  ;;  %v1609_v3 = vmul.f32 %v1593_v44, %v5940_v0  ;;  %vm5975_vm0 = vmor %vm1321_vm14, %vm1322_vm13  ;;  %v1594_v6 = vadd.f32 1.4214138, %v1578_v16  ;;  %v1327_v43 = vand.u32 2147483648, %v5825_v45 }
 0x2be   :  { %v1787_v38 = vmul.f32 %v1771_v12, %v5682_v21  ;;  %v1324_v29 = vsel %vm5975_vm0, %v5879_v23, %v1320_v53  ;;  %vm1326_vm8 = vcmp.eq.f32.partialorder %v1325_v36, 8.507059e+37  ;;  %v1541_v9 = vmul.f32 1.0614054, %v5973_v49 }
 0x2bf   :  { %v1788_v14 = vmul.f32 %v1772_v63, %v5687_v34  ;;  %v1625_v8 = vadd.f32 -0.28449672, %v1609_v3  ;;  %v1610_v58 = vmul.f32 %v1594_v6, %v5947_v11  ;;  %v1328_v25 = vor.u32 1.1754944e-38, %v1327_v43 }
 0x2c0   :  { %v1852_v10 = vpop.xlane.xlu1 %1851  ;;  %v1803_v33 = vadd.f32 1.0, %v1787_v38  ;;  %v1335_v56 = vadd.f32 %v5920_v13, %v1334_v47  ;;  %vm1336_vm1 = vweird.f32 %v5883_v32  ;;  %v1557_v53 = vadd.f32 -1.4531521, %v1541_v9 }
 0x2c1   :  { %v1860_v42 = vmul.f32 0.00390625, %v1852_v10  ;;  %v1804_v21 = vadd.f32 1.0, %v1788_v14  ;;  %v1641_v37 = vmul.f32 %v1625_v8, %v5940_v0  ;;  %v1626_v34 = vadd.f32 -0.28449672, %v1610_v58 }
 0x2c2   :  { %v5992_v45 = vmul.f32 %v1803_v33, %v5666_v7  ;;  %v5994_v23 = vsel %vm1326_vm8, %v1328_v25, %v1324_v29  ;;  %vm1337_vm7 = vweird.f32 %v5920_v13  ;;  %v1573_v47 = vmul.f32 %v1557_v53, %v5973_v49 }
 0x2c3   :  { %1878 = vmatpush.msra.mxu3 %v1860_v42  ;;  %v5997_v59 = vmul.f32 %v1804_v21, %v5679_v26  ;;  %v1657_v44 = vadd.f32 0.2548296, %v1641_v37  ;;  %v1542_v55 = vmul.f32 1.0614054, %v5994_v23  ;;  %v1642_v12 = vmul.f32 %v1626_v34, %v5947_v11  ;;  %vm6003_vm11 = vmor %vm1336_vm1, %vm1337_vm7 }
 0x2c4   :  { %v1340_v7 = vand.u32 2147483647, %v5883_v32  ;;  %v1342_v63 = vand.u32 2147483648, %v5883_v32  ;;  %v1339_v36 = vsel %vm6003_vm11, %v5920_v13, %v1335_v56  ;;  %v1589_v10 = vadd.f32 1.4214138, %v1573_v47 }
 0x2c5   :  { %v1838_v26 = vadd.f32 %v5997_v59, %v5992_v45  ;;  %v1673_v3 = vmul.f32 %v1657_v44, %v5940_v0  ;;  %v1558_v20 = vadd.f32 -1.4531521, %v1542_v55  ;;  %v1658_v38 = vadd.f32 0.2548296, %v1642_v12 }
 0x2c6   :  { %vm1341_vm15 = vcmp.eq.f32.partialorder %v1340_v7, 8.507059e+37  ;;  %v1343_v6 = vor.u32 1.1754944e-38, %v1342_v63  ;;  %v1350_v32 = vadd.f32 %v5927_v62, %v5950_v15  ;;  %vm1351_vm2 = vweird.f32 %v5887_v2 }
 0x2c7   :  { %1839 = vadd.xlane.f32.xlu1 %v1838_v26  ;;  %v1753_v29 = vmul.f32 %v5895_v61, %v1673_v3  ;;  %v1574_v43 = vmul.f32 %v1558_v20, %v5994_v23  ;;  %v1674_v0 = vmul.f32 %v1658_v38, %v5947_v11  ;;  %v1605_v14 = vmul.f32 %v1589_v10, %v5973_v49 }
 0x2c8   :  { %v6022_v42 = vsel %vm1341_vm15, %v1343_v6, %v1339_v36  ;;  %vm1352_vm3 = vweird.f32 %v5927_v62  ;;  %v1355_v61 = vand.u32 2147483647, %v5887_v2  ;;  %v1357_v15 = vand.u32 2147483648, %v5887_v2 }
 0x2c9   :  { %v1769_v13 = vsub.f32 1.0, %v1753_v29  ;;  %v1590_v8 = vadd.f32 1.4214138, %v1574_v43  ;;  %vm6025_vm6 = vmor %vm1351_vm2, %vm1352_vm3  ;;  %v1754_v58 = vmul.f32 %v5899_v27, %v1674_v0  ;;  %v1621_v25 = vadd.f32 -0.28449672, %v1605_v14 }
 0x2ca   :  { %v1354_v11 = vsel %vm6025_vm6, %v5927_v62, %v1350_v32  ;;  %v1543_v9 = vmul.f32 1.0614054, %v6022_v42  ;;  %v1688_v21 = vsub.f32 0.0, %v5866_v60  ;;  %v1358_v34 = vor.u32 1.1754944e-38, %v1357_v15 }
 0x2cb   :  { %v1785_v37 = vmul.f32 %v1769_v13, %v5850_v52  ;;  %v1606_v56 = vmul.f32 %v1590_v8, %v5994_v23  ;;  %v1770_v53 = vsub.f32 1.0, %v1754_v58  ;;  %v1637_v44 = vmul.f32 %v1621_v25, %v5973_v49 }
 0x2cc   :  { %vm1356_vm14 = vcmp.eq.f32.partialorder %v1355_v61, 8.507059e+37  ;;  %v1559_v2 = vadd.f32 -1.4531521, %v1543_v9  ;;  %v7367_v27 = vsub.f32 0.0, %v5853_v30  ;;  %v1194_v26 = vmul.f32 0.5, %v5691_v18 }
 0x2cd   :  { %v1801_v12 = vadd.f32 1.0, %v1785_v37  ;;  %v1622_v62 = vadd.f32 -0.28449672, %v1606_v56  ;;  %v1359_v47 = vsel %vm1356_vm14, %v1358_v34, %v1354_v11  ;;  %v1786_v16 = vmul.f32 %v1770_v53, %v5863_v40 }
 0x2ce   :  { %v1703_v55 = vmul.f32 %v7367_v27, %v5853_v30  ;;  %v1653_v7 = vadd.f32 0.2548296, %v1637_v44  ;;  %v1544_v63 = vmul.f32 1.0614054, %v1359_v47  ;;  %v1575_v52 = vmul.f32 %v1559_v2, %v6022_v42 }
 0x2cf   :  { %v6047_v3 = vmul.f32 %v1801_v12, %v5800_v1  ;;  %v1638_v20 = vmul.f32 %v1622_v62, %v5994_v23  ;;  %v1802_v36 = vadd.f32 1.0, %v1786_v16  ;;  %vm1221_vm13 = vcmp.ge.f32.partialorder %v5769_v51, 0.0 }
 0x2d0   :  { %v1669_v38 = vmul.f32 %v1653_v7, %v5973_v49  ;;  %v1560_v30 = vadd.f32 -1.4531521, %v1544_v63  ;;  %v1591_v10 = vadd.f32 1.4214138, %v1575_v52  ;;  %v1704_v40 = vmul.f32 %v1688_v21, %v5866_v60 }
 0x2d1   :  { %v1721_v6 = vmul.f32 1.442695, %v1703_v55  ;;  %v1654_v29 = vadd.f32 0.2548296, %v1638_v20  ;;  %v6053_v43 = vmul.f32 %v1802_v36, %v1194_v26  ;;  %vm1222_vm0 = vcmp.ge.f32.partialorder %v5776_v19, 0.0 }
 0x2d2   :  { %v1749_v18 = vmul.f32 %v5912_v31, %v1669_v38  ;;  %v1576_v32 = vmul.f32 %v1560_v30, %v1359_v47  ;;  %v1607_v1 = vmul.f32 %v1591_v10, %v6022_v42  ;;  %v7368_v60 = vmov -1.0  }
 0x2d3   :  { %v1670_v0 = vmul.f32 %v1654_v29, %v5994_v23  ;;  %v1835_v49 = vadd.f32 %v6053_v43, %v6047_v3  ;;  %v1237_v8 = vsel %vm1221_vm13, 1.0, %v7368_v60  ;;  %3182 = vpow2.f32 %v1721_v6 }
 0x2d4   :  { %v1765_v14 = vsub.f32 1.0, %v1749_v18  ;;  %v1592_v51 = vadd.f32 1.4214138, %v1576_v32  ;;  %v1623_v13 = vadd.f32 -0.28449672, %v1607_v1  ;;  %v1238_v23 = vsel %vm1222_vm0, 1.0, %v7368_v60 }
 0x2d5   :  { %v1723_v33 = vmul.f32 1.442695, %v1704_v40  ;;  %v1750_v61 = vmul.f32 %v5935_v35, %v1670_v0  ;;  %1836 = vadd.xlane.f32.xlu2 %v1835_v49  ;;  %v1189_v21 = vmul.f32 0.5, %v5759_v41  ;;  %v1190_v35 = vmul.f32 0.5, %v5764_v24 }
 0x2d6   :  { %v1781_v31 = vmul.f32 %v1765_v14, %v1237_v8  ;;  %v1608_v15 = vmul.f32 %v1592_v51, %v1359_v47  ;;  %v1639_v58 = vmul.f32 %v1623_v13, %v6022_v42  ;;  %vm1223_vm8 = vcmp.ge.f32.partialorder %v5836_v50, 0.0 }
 0x2d7   :  { %v1766_v19 = vsub.f32 1.0, %v1750_v61  ;;  %3184 = vpow2.f32 %v1723_v33  ;;  %v1239_v52 = vsel %vm1223_vm8, 1.0, %v7368_v60  ;;  %vm1224_vm1 = vcmp.ge.f32.partialorder %v5839_v54, 0.0  ;;  %v1861_v33 = vld [vmem:[%s6857_s2] sm:$0xff]  ;;  %v1862_v61 = vld [vmem:[%s6857_s2 + $0x8] sm:$0xff] }
 0x2d8   :  { %v1797_v25 = vadd.f32 1.0, %v1781_v31  ;;  %v1624_v11 = vadd.f32 -0.28449672, %v1608_v15  ;;  %v1655_v9 = vadd.f32 0.2548296, %v1639_v58  ;;  %v1240_v36 = vsel %vm1224_vm1, 1.0, %v7368_v60 }
 0x2d9   :  { %v1782_v37 = vmul.f32 %v1766_v19, %v1238_v23  ;;  %v3183_v53 = vpop.eup %3182  ;;  %v1191_v38 = vmul.f32 0.5, %v5804_v17  ;;  %v1192_v30 = vmul.f32 0.5, %v5814_v39  ;;  %vm1863_vm7 = vcmask 523264  }
 0x2da   :  { %v1640_v56 = vmul.f32 %v1624_v11, %v1359_v47  ;;  %v1671_v34 = vmul.f32 %v1655_v9, %v6022_v42  ;;  %v6068_v2 = vmul.f32 %v1797_v25, %v1189_v21 }
 0x2db   :  { %v1798_v44 = vadd.f32 1.0, %v1782_v37 }
 0x2dc   :  { %v1656_v27 = vadd.f32 0.2548296, %v1640_v56  ;;  %v1751_v55 = vmul.f32 %v3183_v53, %v1671_v34 }
 0x2dd   :  { %v6071_v62 = vmul.f32 %v1798_v44, %v1190_v35  ;;  %v3185_v63 = vpop.eup %3184 }
 0x2de   :  { %v1672_v41 = vmul.f32 %v1656_v27, %v1359_v47  ;;  %v1767_v7 = vsub.f32 1.0, %v1751_v55 }
 0x2df   :  { %v1849_v12 = vpop.xlane.xlu2 %1848  ;;  %v1829_v42 = vadd.f32 %v6071_v62, %v6068_v2 }
 0x2e0   :  { %v1859_v16 = vmul.f32 0.00390625, %v1849_v12  ;;  %v1752_v24 = vmul.f32 %v3185_v63, %v1672_v41  ;;  %v1783_v26 = vmul.f32 %v1767_v7, %v1239_v52 }
 0x2e1   :  { %1830 = vadd.xlane.f32.xlu2 %v1829_v42 }
 0x2e2   :  { %1879 = vmatpush.msra.mxu3 %v1859_v16  ;;  %v1768_v50 = vsub.f32 1.0, %v1752_v24  ;;  %v1799_v20 = vadd.f32 1.0, %v1783_v26 }
 0x2e4   :  { %v1784_v47 = vmul.f32 %v1768_v50, %v1240_v36  ;;  %v6080_v40 = vmul.f32 %v1799_v20, %v1191_v38 }
 0x2e6   :  { %v1800_v10 = vadd.f32 1.0, %v1784_v47 }
 0x2e8   :  { %v6082_v6 = vmul.f32 %v1800_v10, %v1192_v30 }
 0x2e9   :  { %v1846_v29 = vpop.xlane.xlu0 %1845 }
 0x2ea   :  { %v1832_v54 = vadd.f32 %v6082_v6, %v6080_v40  ;;  %v1858_v18 = vmul.f32 0.00390625, %v1846_v29 }
 0x2ec   :  { %1833 = vadd.xlane.f32.xlu1 %v1832_v54  ;;  %1880 = vmatpush.msra.mxu3 %v1858_v18 }
 0x314   :  { %v1843_v32 = vpop.xlane.xlu2 %1842 }
 0x315   :  { %v1857_v1 = vmul.f32 0.00390625, %v1843_v32 }
 0x317   :  { %1881 = vmatpush.msra.mxu3 %v1857_v1 }
 0x33a   :  { %v1840_v0 = vpop.xlane.xlu1 %1839 }
 0x33b   :  { %v1856_v17 = vmul.f32 0.00390625, %v1840_v0 }
 0x33d   :  { %1882 = vmatpush.msra.mxu3 %v1856_v17 }
 0x348   :  { %v1837_v49 = vpop.xlane.xlu2 %1836 }
 0x349   :  { %v1855_v39 = vmul.f32 0.00390625, %v1837_v49 }
 0x34b   :  { %1883 = vmatpush.msra.mxu3 %v1855_v39 }
 0x354   :  { %v1831_v14 = vpop.xlane.xlu2 %1830 }
 0x355   :  { %v1853_v8 = vmul.f32 0.00390625, %v1831_v14 }
 0x35f   :  { %v1834_v51 = vpop.xlane.xlu1 %1833 }
 0x360   :  { %v1854_v13 = vmul.f32 0.00390625, %v1834_v51 }
 0x362   :  { %1884 = vmatpush.msra.mxu3 %v1854_v13 }
 0x364   :  { %1885 = vmatpush.msra.mxu3 %v1853_v8 }
 0x365   :  { %2845 = vmatmul.msk.f32.vlgmr.msra.gmra.mxu3 %vm1863_vm7, %v1861_v33 }
 0x36d   :  { %2846 = vmatmul.msk.f32.gmra.mxu3 %vm1863_vm7, %v1862_v61 }
 0x3e8   :  { %v6094_v31 = vpop.f32.mrf.mxu3 }
 0x3e9   :  { %v6097_v15 = vmul.f32 0.70710677, %v6094_v31 }
 0x3eb   :  { %v1901_v58 = vand.u32 2147483647, %v6097_v15  ;;  %vm1897_vm8 = vcmp.ge.f32.partialorder %v6097_v15, 0.0 }
 0x3ed   :  { %v1903_v19 = vmul.f32 0.3275911, %v1901_v58  ;;  %v1955_v24 = vsub.f32 0.0, %v1901_v58 }
 0x3ef   :  { %v1905_v23 = vadd.f32 1.0, %v1903_v19  ;;  %v1957_v30 = vmul.f32 %v1955_v24, %v1901_v58 }
 0x3f0   :  { %v6100_v25 = vpop.f32.mrf.mxu3 }
 0x3f1   :  { %3186 = vrcp.f32 %v1905_v23  ;;  %v6103_v11 = vmul.f32 0.70710677, %v6100_v25  ;;  %v1918_v35 = vand.u32 2147483648, %v1905_v23  ;;  %v1916_v27 = vand.u32 2147483647, %v1905_v23 }
 0x3f2   :  { %vm1912_vm15 = vweird.f32 %v1905_v23  ;;  %v1959_v17 = vmul.f32 1.442695, %v1957_v30 }
 0x3f3   :  { %v1902_v9 = vand.u32 2147483647, %v6103_v11  ;;  %v1919_v16 = vor.u32 1.1754944e-38, %v1918_v35  ;;  %vm1917_vm3 = vcmp.eq.f32.partialorder %v1916_v27, 8.507059e+37  ;;  %vm1898_vm1 = vcmp.ge.f32.partialorder %v6103_v11, 0.0  ;;  %v1973_v11 = vld [vmem:[%s6858_s3] sm:$0xff] }
 0x3f4   :  { %v1899_v27 = vsel %vm1897_vm8, 1.0, %v7368_v60 }
 0x3f5   :  { %v1904_v21 = vmul.f32 0.3275911, %v1902_v9  ;;  %v1956_v18 = vsub.f32 0.0, %v1902_v9 }
 0x3f7   :  { %v3187_v37 = vpop.eup %3186  ;;  %v1906_v56 = vadd.f32 1.0, %v1904_v21  ;;  %v1958_v14 = vmul.f32 %v1956_v18, %v1902_v9 }
 0x3f8   :  { %v1908_v34 = vmul.f32 %v3187_v37, %v1905_v23  ;;  %vm1913_vm11 = vweird.f32 %v3187_v37 }
 0x3f9   :  { %3188 = vrcp.f32 %v1906_v56  ;;  %vm1914_vm2 = vmor %vm1912_vm15, %vm1913_vm11  ;;  %v1933_v26 = vand.u32 2147483648, %v1906_v56  ;;  %v1931_v20 = vand.u32 2147483647, %v1906_v56  ;;  %vm1927_vm14 = vweird.f32 %v1906_v56 }
 0x3fa   :  { %v1909_v53 = vsub.f32 1.0, %v1908_v34  ;;  %3190 = vpow2.f32 %v1959_v17  ;;  %v1961_v61 = vmul.f32 1.442695, %v1958_v14  ;;  %vm1981_vm11 = vcmask 130048  }
 0x3fb   :  { %v1934_v10 = vor.u32 1.1754944e-38, %v1933_v26  ;;  %vm1932_vm0 = vcmp.eq.f32.partialorder %v1931_v20, 8.507059e+37  ;;  %v1975_v26 = vld [vmem:[%s6858_s3 + $0x10] sm:$0xff]  ;;  %v1976_v20 = vld [vmem:[%s6858_s3 + $0x18] sm:$0xff] }
 0x3fc   :  { %v1910_v44 = vmul.f32 %v3187_v37, %v1909_v53  ;;  %3192 = vpow2.f32 %v1961_v61 }
 0x3fe   :  { %v1911_v55 = vadd.f32 %v3187_v37, %v1910_v44 }
 0x3ff   :  { %v3189_v12 = vpop.eup %3188 }
 0x400   :  { %v1923_v41 = vmul.f32 %v3189_v12, %v1906_v56  ;;  %v1915_v7 = vsel %vm1914_vm2, %v3187_v37, %v1911_v55  ;;  %vm1928_vm6 = vweird.f32 %v3189_v12  ;;  %v3191_v21 = vpop.eup %3190 }
 0x401   :  { %v1920_v63 = vsel %vm1917_vm3, %v1919_v16, %v1915_v7  ;;  %vm1929_vm13 = vmor %vm1927_vm14, %vm1928_vm6  ;;  %v1900_v16 = vsel %vm1898_vm1, 1.0, %v7368_v60  ;;  %v1894_v7 = vmul.f32 0.5, %v6100_v25  ;;  %v1977_v60 = vld [vmem:[%s6858_s3 + $0x20] sm:$0xff]  ;;  %v1978_v25 = vld [vmem:[%s6858_s3 + $0x28] sm:$0xff] }
 0x402   :  { %v1924_v52 = vsub.f32 1.0, %v1923_v41  ;;  %v1937_v42 = vmul.f32 1.0614054, %v1920_v63  ;;  %v3193_v44 = vpop.eup %3192 }
 0x404   :  { %v1925_v50 = vmul.f32 %v3189_v12, %v1924_v52  ;;  %v1939_v36 = vadd.f32 -1.4531521, %v1937_v42  ;;  %v1893_v42 = vmul.f32 0.5, %v6094_v31  ;;  %v1974_v31 = vld [vmem:[%s6858_s3 + $0x8] sm:$0xff] }
 0x406   :  { %v1926_v38 = vadd.f32 %v3189_v12, %v1925_v50  ;;  %v1941_v47 = vmul.f32 %v1939_v36, %v1920_v63  ;;  %v1979_v50 = vld [vmem:[%s6858_s3 + $0x30] sm:$0xff]  ;;  %v1980_v36 = vld [vmem:[%s6858_s3 + $0x38] sm:$0xff] }
 0x408   :  { %v1930_v54 = vsel %vm1929_vm13, %v3189_v12, %v1926_v38  ;;  %v1943_v29 = vadd.f32 1.4214138, %v1941_v47 }
 0x409   :  { %v1935_v32 = vsel %vm1932_vm0, %v1934_v10, %v1930_v54 }
 0x40a   :  { %v1938_v1 = vmul.f32 1.0614054, %v1935_v32  ;;  %v1945_v0 = vmul.f32 %v1943_v29, %v1920_v63 }
 0x40c   :  { %v1940_v49 = vadd.f32 -1.4531521, %v1938_v1  ;;  %v1947_v39 = vadd.f32 -0.28449672, %v1945_v0 }
 0x40e   :  { %v1942_v51 = vmul.f32 %v1940_v49, %v1935_v32  ;;  %v1949_v13 = vmul.f32 %v1947_v39, %v1920_v63 }
 0x410   :  { %v1944_v8 = vadd.f32 1.4214138, %v1942_v51  ;;  %v1951_v33 = vadd.f32 0.2548296, %v1949_v13 }
 0x412   :  { %v1946_v58 = vmul.f32 %v1944_v8, %v1935_v32  ;;  %v1953_v19 = vmul.f32 %v1951_v33, %v1920_v63 }
 0x414   :  { %v1948_v23 = vadd.f32 -0.28449672, %v1946_v58  ;;  %v1963_v56 = vmul.f32 %v3191_v21, %v1953_v19 }
 0x416   :  { %v1950_v37 = vmul.f32 %v1948_v23, %v1935_v32  ;;  %v1965_v35 = vsub.f32 1.0, %v1963_v56 }
 0x418   :  { %v1952_v34 = vadd.f32 0.2548296, %v1950_v37  ;;  %v1967_v12 = vmul.f32 %v1965_v35, %v1899_v27 }
 0x41a   :  { %v1954_v53 = vmul.f32 %v1952_v34, %v1935_v32  ;;  %v1969_v52 = vadd.f32 1.0, %v1967_v12 }
 0x41c   :  { %v1964_v9 = vmul.f32 %v3193_v44, %v1954_v53  ;;  %v1971_v24 = vmul.f32 %v1969_v52, %v1893_v42 }
 0x41e   :  { %v1966_v55 = vsub.f32 1.0, %v1964_v9 }
 0x420   :  { %v1968_v41 = vmul.f32 %v1966_v55, %v1900_v16 }
 0x422   :  { %v1970_v63 = vadd.f32 1.0, %v1968_v41 }
 0x424   :  { %v1972_v15 = vmul.f32 %v1970_v63, %v1894_v7 }
 0x426   :  { %2020 = vmatpush.msra.mxu1 %v1972_v15  ;;  %2871 = vmatpush.msra.mxu2 %v1972_v15 }
 0x428   :  { %2021 = vmatpush.msra.mxu1 %v1971_v24  ;;  %2872 = vmatpush.msra.mxu2 %v1971_v24 }
 0x429   :  { %2847 = vmatmul.msk.f32.vlgmr.msra.gmra.mxu1 %vm1981_vm11, %v1973_v11  ;;  %2851 = vmatmul.msk.f32.vlgmr.msra.gmra.mxu2 %vm1981_vm11, %v1977_v60 }
 0x431   :  { %2848 = vmatmul.msk.f32.gmra.mxu1 %vm1981_vm11, %v1974_v31  ;;  %2852 = vmatmul.msk.f32.gmra.mxu2 %vm1981_vm11, %v1978_v25 }
 0x439   :  { %2849 = vmatmul.msk.f32.gmra.mxu1 %vm1981_vm11, %v1975_v26  ;;  %2853 = vmatmul.msk.f32.gmra.mxu2 %vm1981_vm11, %v1979_v50 }
 0x441   :  { %2850 = vmatmul.msk.f32.gmra.mxu1 %vm1981_vm11, %v1976_v20  ;;  %2854 = vmatmul.msk.f32.gmra.mxu2 %vm1981_vm11, %v1980_v36 }
 0x4a6   :  { %v2023_v38 = vpop.f32.mrf.mxu1 }
 0x4a7   :  { %v2047_v29 = vsub.f32 0.0, %v2023_v38 }
 0x4a9   :  { %v2055_v49 = vmul.f32 1.442695, %v2047_v29 }
 0x4ac   :  { %v2035_v47 = vpop.f32.mrf.mxu2 }
 0x4ad   :  { %v2051_v10 = vsub.f32 0.0, %v2035_v47 }
 0x4ae   :  { %v2026_v30 = vpop.f32.mrf.mxu1 }
 0x4af   :  { %v2048_v54 = vsub.f32 0.0, %v2026_v30  ;;  %v2063_v18 = vmul.f32 1.442695, %v2051_v10 }
 0x4b1   :  { %v2057_v32 = vmul.f32 1.442695, %v2048_v54  ;;  %3194 = vpow2.f32 %v2063_v18 }
 0x4b3   :  { %3196 = vpow2.f32 %v2057_v32 }
 0x4b4   :  { %v2038_v1 = vpop.f32.mrf.mxu2 }
 0x4b5   :  { %v2052_v0 = vsub.f32 0.0, %v2038_v1 }
 0x4b6   :  { %v2029_v17 = vpop.f32.mrf.mxu1 }
 0x4b7   :  { %v2065_v39 = vmul.f32 1.442695, %v2052_v0  ;;  %v2049_v14 = vsub.f32 0.0, %v2029_v17  ;;  %v3195_v8 = vpop.eup %3194 }
 0x4b8   :  { %v6144_v34 = vadd.f32 1.0, %v3195_v8 }
 0x4b9   :  { %3198 = vpow2.f32 %v2065_v39  ;;  %v2059_v51 = vmul.f32 1.442695, %v2049_v14  ;;  %v3197_v61 = vpop.eup %3196 }
 0x4ba   :  { %3200 = vpow2.f32 %v2055_v49  ;;  %v6146_v35 = vadd.f32 1.0, %v3197_v61  ;;  %vm2144_vm0 = vweird.f32 %v6144_v34 }
 0x4bb   :  { %3202 = vpow2.f32 %v2059_v51 }
 0x4bc   :  { %v2041_v13 = vpop.f32.mrf.mxu2 }
 0x4bd   :  { %v2053_v33 = vsub.f32 0.0, %v2041_v13 }
 0x4be   :  { %v2032_v58 = vpop.f32.mrf.mxu1 }
 0x4bf   :  { %v3199_v19 = vpop.eup %3198  ;;  %v2067_v23 = vmul.f32 1.442695, %v2053_v33  ;;  %v2050_v21 = vsub.f32 0.0, %v2032_v58 }
 0x4c0   :  { %v2076_v37 = vadd.f32 1.0, %v3199_v19  ;;  %v3201_v56 = vpop.eup %3200 }
 0x4c1   :  { %3204 = vpow2.f32 %v2067_v23  ;;  %v2061_v53 = vmul.f32 1.442695, %v2050_v21  ;;  %v6148_v44 = vadd.f32 1.0, %v3201_v56  ;;  %v3203_v55 = vpop.eup %3202  ;;  %v2148_v23 = vand.u32 2147483647, %v6144_v34 }
 0x4c2   :  { %3206 = vrcp.f32 %v2076_v37  ;;  %v6153_v42 = vadd.f32 1.0, %v3203_v55  ;;  %v2165_v31 = vand.u32 2147483648, %v2076_v37  ;;  %v2163_v26 = vand.u32 2147483647, %v2076_v37 }
 0x4c3   :  { %3208 = vpow2.f32 %v2061_v53  ;;  %vm2159_vm2 = vweird.f32 %v2076_v37  ;;  %v2150_v21 = vand.u32 2147483648, %v6144_v34 }
 0x4c4   :  { %v2044_v9 = vpop.f32.mrf.mxu2  ;;  %3210 = vrcp.f32 %v6144_v34  ;;  %v2166_v54 = vor.u32 1.1754944e-38, %v2165_v31  ;;  %vm2164_vm6 = vcmp.eq.f32.partialorder %v2163_v26, 8.507059e+37 }
 0x4c5   :  { %v2054_v27 = vsub.f32 0.0, %v2044_v9  ;;  %3212 = vrcp.f32 %v6146_v35 }
 0x4c6   :  { %3214 = vrcp.f32 %v6148_v44 }
 0x4c7   :  { %v3205_v12 = vpop.eup %3204  ;;  %v2069_v16 = vmul.f32 1.442695, %v2054_v27 }
 0x4c8   :  { %v3207_v41 = vpop.eup %3206  ;;  %v2077_v7 = vadd.f32 1.0, %v3205_v12 }
 0x4c9   :  { %v3209_v63 = vpop.eup %3208  ;;  %3216 = vpow2.f32 %v2069_v16  ;;  %v2155_v52 = vmul.f32 %v3207_v41, %v2076_v37  ;;  %vm2160_vm15 = vweird.f32 %v3207_v41 }
 0x4ca   :  { %3218 = vrcp.f32 %v2077_v7  ;;  %v2074_v15 = vadd.f32 1.0, %v3209_v63  ;;  %v6155_v24 = vpop.eup %3210  ;;  %vm2161_vm3 = vmor %vm2159_vm2, %vm2160_vm15  ;;  %v2178_v39 = vand.u32 2147483647, %v2077_v7  ;;  %v2180_v8 = vand.u32 2147483648, %v2077_v7 }
 0x4cb   :  { %v2156_v11 = vsub.f32 1.0, %v2155_v52  ;;  %v6157_v60 = vpop.eup %3212  ;;  %v2140_v20 = vmul.f32 %v6155_v24, %v6144_v34  ;;  %vm2174_vm1 = vweird.f32 %v2077_v7 }
 0x4cc   :  { %3220 = vrcp.f32 %v2074_v15  ;;  %v6159_v50 = vpop.eup %3214  ;;  %v2095_v47 = vmul.f32 %v6157_v60, %v6146_v35  ;;  %vm2129_vm13 = vweird.f32 %v2074_v15  ;;  %v2135_v33 = vand.u32 2147483648, %v2074_v15 }
 0x4cd   :  { %v2157_v25 = vmul.f32 %v3207_v41, %v2156_v11  ;;  %3222 = vrcp.f32 %v6153_v42  ;;  %v2141_v0 = vsub.f32 1.0, %v2140_v20  ;;  %v2080_v17 = vmul.f32 %v6159_v50, %v6148_v44 }
 0x4ce   :  { %v2096_v51 = vsub.f32 1.0, %v2095_v47  ;;  %v2133_v19 = vand.u32 2147483647, %v2074_v15  ;;  %vm2179_vm15 = vcmp.eq.f32.partialorder %v2178_v39, 8.507059e+37  ;;  %v2181_v16 = vor.u32 1.1754944e-38, %v2180_v8 }
 0x4cf   :  { %v3217_v36 = vpop.eup %3216  ;;  %v2158_v38 = vadd.f32 %v3207_v41, %v2157_v25  ;;  %v2081_v37 = vsub.f32 1.0, %v2080_v17  ;;  %v2142_v27 = vmul.f32 %v6155_v24, %v2141_v0  ;;  %v2151_v17 = vor.u32 1.1754944e-38, %v2150_v21  ;;  %v3240_v0 = vld [vmem:[%s6855_s0 + $0x8] sm:$0xff] }
 0x4d0   :  { %v3219_v30 = vpop.eup %3218  ;;  %v6166_v10 = vadd.f32 1.0, %v3217_v36  ;;  %v2097_v63 = vmul.f32 %v6157_v60, %v2096_v51 }
 0x4d1   :  { %v2162_v29 = vsel %vm2161_vm3, %v3207_v41, %v2158_v38  ;;  %v2170_v18 = vmul.f32 %v3219_v30, %v2077_v7  ;;  %vm2175_vm14 = vweird.f32 %v3219_v30  ;;  %v2136_v7 = vor.u32 1.1754944e-38, %v2135_v33 }
 0x4d2   :  { %v3221_v32 = vpop.eup %3220  ;;  %3224 = vrcp.f32 %v6166_v10  ;;  %v2167_v1 = vsel %vm2164_vm6, %v2166_v54, %v2162_v29  ;;  %vm6176_vm11 = vmor %vm2174_vm1, %vm2175_vm14  ;;  %vm2084_vm3 = vweird.f32 %v6148_v44  ;;  %vm2134_vm6 = vcmp.eq.f32.partialorder %v2133_v19, 8.507059e+37 }
 0x4d3   :  { %2234 = vperm.xlu2 %2961, %v2167_v1   ;;  %v2171_v49 = vsub.f32 1.0, %v2170_v18  ;;  %v2125_v14 = vmul.f32 %v3221_v32, %v2074_v15  ;;  %v6171_v13 = vpop.eup %3222  ;;  %vm2130_vm8 = vweird.f32 %v3221_v32  ;;  %vm2145_vm14 = vweird.f32 %v6155_v24 }
 0x4d4   :  { %v2110_v55 = vmul.f32 %v6171_v13, %v6153_v42  ;;  %vm6184_vm2 = vmor %vm2129_vm13, %vm2130_vm8  ;;  %vm2099_vm13 = vweird.f32 %v6146_v35  ;;  %vm2100_vm8 = vweird.f32 %v6157_v60  ;;  %v2143_v26 = vadd.f32 %v6155_v24, %v2142_v27 }
 0x4d5   :  { %v2172_v61 = vmul.f32 %v3219_v30, %v2171_v49  ;;  %v2126_v58 = vsub.f32 1.0, %v2125_v14  ;;  %v2195_v47 = vand.u32 2147483648, %v6166_v10  ;;  %v2105_v54 = vand.u32 2147483648, %v6146_v35  ;;  %vm6204_vm1 = vmor %vm2144_vm0, %vm2145_vm14 }
 0x4d6   :  { %v2111_v36 = vsub.f32 1.0, %v2110_v55  ;;  %v2098_v1 = vadd.f32 %v6157_v60, %v2097_v63  ;;  %v2082_v49 = vmul.f32 %v6159_v50, %v2081_v37  ;;  %vm2085_vm0 = vweird.f32 %v6159_v50 }
 0x4d7   :  { %v2173_v56 = vadd.f32 %v3219_v30, %v2172_v61  ;;  %v2127_v9 = vmul.f32 %v3221_v32, %v2126_v58  ;;  %v2147_v39 = vsel %vm6204_vm1, %v6155_v24, %v2143_v26  ;;  %v2196_v8 = vor.u32 1.1754944e-38, %v2195_v47 }
 0x4d8   :  { %v3225_v12 = vpop.eup %3224  ;;  %v2112_v51 = vmul.f32 %v6171_v13, %v2111_v36  ;;  %v2106_v33 = vor.u32 1.1754944e-38, %v2105_v54  ;;  %vm2115_vm1 = vweird.f32 %v6171_v13  ;;  %v2090_v19 = vand.u32 2147483648, %v6148_v44  ;;  %v2206_v54 = vld [vmem:[%s6859_s4 + $0x38] sm:$0xff] }
 0x4d9   :  { %v2177_v52 = vsel %vm6176_vm11, %v3219_v30, %v2173_v56  ;;  %v2128_v11 = vadd.f32 %v3221_v32, %v2127_v9  ;;  %v2185_v31 = vmul.f32 %v3225_v12, %v6166_v10  ;;  %v2103_v30 = vand.u32 2147483647, %v6146_v35 }
 0x4da   :  { %v2182_v25 = vsel %vm2179_vm15, %v2181_v16, %v2177_v52  ;;  %vm2190_vm11 = vweird.f32 %v3225_v12  ;;  %vm6210_vm15 = vcmp.eq.f32.partialorder %v2148_v23, 8.507059e+37  ;;  %v2120_v23 = vand.u32 2147483648, %v6153_v42 }
 0x4db   :  { %2239 = vperm.xlu1 %2960, %v2182_v25   ;;  %v2132_v15 = vsel %vm6184_vm2, %v3221_v32, %v2128_v11  ;;  %v2186_v20 = vsub.f32 1.0, %v2185_v31  ;;  %v2193_v32 = vand.u32 2147483647, %v6166_v10  ;;  %vm6218_vm2 = vmor %vm2099_vm13, %vm2100_vm8  ;;  %vm6229_vm12 = vcmp.eq.f32.partialorder %v2103_v30, 8.507059e+37  ;;  %v2199_v30 = vld [vmem:[%s6859_s4] sm:$0xff] }
 0x4dc   :  { %v2137_v38 = vsel %vm2134_vm6, %v2136_v7, %v2132_v15  ;;  %vm2189_vm6 = vweird.f32 %v6166_v10  ;;  %vm2114_vm13 = vweird.f32 %v6153_v42  ;;  %v2102_v24 = vsel %vm6218_vm2, %v6157_v60, %v2098_v1 }
 0x4dd   :  { %2224 = vperm.xlu2 %2961, %v2137_v38   ;;  %v2187_v18 = vmul.f32 %v3225_v12, %v2186_v20  ;;  %vm2191_vm14 = vmor %vm2189_vm6, %vm2190_vm11  ;;  %vm2194_vm8 = vcmp.eq.f32.partialorder %v2193_v32, 8.507059e+37  ;;  %v2152_v10 = vsel %vm6210_vm15, %v2151_v17, %v2147_v39  ;;  %v2083_v21 = vadd.f32 %v6159_v50, %v2082_v49  ;;  %v7381_v20 = vld [vmem:[#allocation90_spill] sm:$0xff]  ;;  %v3239_v32 = vld [vmem:[%s6855_s0] sm:$0xff] }
 0x4de   :  { %vm2086_vm11 = vmor %vm2084_vm3, %vm2085_vm0  ;;  %v2088_v60 = vand.u32 2147483647, %v6148_v44  ;;  %v2113_v37 = vadd.f32 %v6171_v13, %v2112_v51  ;;  %v2118_v56 = vand.u32 2147483647, %v6153_v42  ;;  %v2107_v53 = vsel %vm6229_vm12, %v2106_v33, %v2102_v24 }
 0x4df   :  { %v2188_v14 = vadd.f32 %v3225_v12, %v2187_v18  ;;  %vm2116_vm15 = vmor %vm2114_vm13, %vm2115_vm1  ;;  %v2091_v9 = vor.u32 1.1754944e-38, %v2090_v19  ;;  %v2121_v27 = vor.u32 1.1754944e-38, %v2120_v23  ;;  %v2087_v55 = vsel %vm2086_vm11, %v6159_v50, %v2083_v21  ;;  %v3244_v19 = vld [vmem:[%s6855_s0 + $0x28] sm:$0xff] }
 0x4e0   :  { %vm2089_vm2 = vcmp.eq.f32.partialorder %v2088_v60, 8.507059e+37  ;;  %vm2119_vm3 = vcmp.eq.f32.partialorder %v2118_v56, 8.507059e+37  ;;  %v3245_v56 = vld [vmem:[%s6855_s0 + $0x30] sm:$0xff] }
 0x4e1   :  { %v2192_v61 = vsel %vm2191_vm14, %v3225_v12, %v2188_v14  ;;  %v2117_v12 = vsel %vm2116_vm15, %v6171_v13, %v2113_v37  ;;  %v2092_v44 = vsel %vm2089_vm2, %v2091_v9, %v2087_v55  ;;  %v3241_v14 = vld [vmem:[%s6855_s0 + $0x10] sm:$0xff]  ;;  %v3246_v9 = vld [vmem:[%s6855_s0 + $0x38] sm:$0xff] }
 0x4e2   :  { %v2197_v58 = vsel %vm2194_vm8, %v2196_v8, %v2192_v61  ;;  %v2122_v16 = vsel %vm2119_vm3, %v2121_v27, %v2117_v12  ;;  %v3242_v8 = vld [vmem:[%s6855_s0 + $0x18] sm:$0xff] }
 0x4e3   :  { %2229 = vperm.xlu1 %2960, %v2152_v10   ;;  %2244 = vperm.xlu0 %2959, %v2197_v58   ;;  %v3243_v10 = vld [vmem:[%s6855_s0 + $0x20] sm:$0xff] }
 0x4e5   :  { %2214 = vperm.xlu2 %2961, %v2107_v53  }
 0x4eb   :  { %2209 = vperm.xlu0 %2959, %v2092_v44   ;;  %2219 = vperm.xlu1 %2960, %v2122_v16   ;;  %v3247_v16 = vld [vmem:[%s6855_s0 + $0x40] sm:$0xff] }
 0x52d   :  { %v2235_v41 = vpop.permute.xlu2 %2234 }
 0x52e   :  { %v2257_v25 = vmul.f32 %v2235_v41, %v5543_v22  ;;  %v2258_v15 = vmul.f32 %v2235_v41, %v5551_v5 }
 0x537   :  { %v2225_v63 = vpop.permute.xlu2 %2224 }
 0x54d   :  { %v2240_v7 = vpop.permute.xlu1 %2239 }
 0x54e   :  { %v2259_v50 = vmul.f32 %v2240_v7, %v5496_v28  ;;  %v2260_v13 = vmul.f32 %v2240_v7, %v5498_v46  ;;  %v2254_v28 = vmul.f32 %v2225_v63, %v5997_v59  ;;  %v2215_v46 = vpop.permute.xlu2 %2214  ;;  %v3248_v7 = vld [vmem:[%s6855_s0 + $0x48] sm:$0xff] }
 0x54f   :  { %v2250_v47 = vmul.f32 %v2215_v46, %v6082_v6  ;;  %v2205_v6 = vld [vmem:[%s6859_s4 + $0x30] sm:$0xff] }
 0x555   :  { %v2230_v52 = vpop.permute.xlu1 %2229  ;;  %v2245_v11 = vpop.permute.xlu0 %2244 }
 0x556   :  { %v2261_v42 = vmul.f32 %v2245_v11, %v5373_v4  ;;  %v2262_v31 = vmul.f32 %v2245_v11, %v5375_v57  ;;  %v2255_v26 = vmul.f32 %v2230_v52, %v5772_v48  ;;  %v2256_v4 = vmul.f32 %v2230_v52, %v7381_v20 }
 0x557   :  { %v2253_v57 = vmul.f32 %v2225_v63, %v5992_v45  ;;  %v2249_v48 = vmul.f32 %v2215_v46, %v6080_v40  ;;  %v2204_v40 = vld [vmem:[%s6859_s4 + $0x28] sm:$0xff] }
 0x558   :  { %2295 = vmatpush.msrb.mxu2 %v2261_v42  ;;  %2336 = vmatpush.msrb.mxu3 %v2262_v31  ;;  %v3249_v31 = vld [vmem:[%s6855_s0 + $0x50] sm:$0xff] }
 0x55a   :  { %2296 = vmatpush.msrb.mxu2 %v2259_v50  ;;  %2337 = vmatpush.msrb.mxu3 %v2260_v13  ;;  %v3250_v13 = vld [vmem:[%s6855_s0 + $0x58] sm:$0xff] }
 0x55c   :  { %2297 = vmatpush.msrb.mxu2 %v2257_v25  ;;  %2338 = vmatpush.msrb.mxu3 %v2258_v15 }
 0x55d   :  { %v2220_v36 = vpop.permute.xlu1 %2219  ;;  %v2210_v38 = vpop.permute.xlu0 %2209 }
 0x55e   :  { %2298 = vmatpush.msrb.mxu2 %v2255_v26  ;;  %2339 = vmatpush.msrb.mxu3 %v2256_v4  ;;  %v2251_v22 = vmul.f32 %v2220_v36, %v6047_v3  ;;  %v2252_v5 = vmul.f32 %v2220_v36, %v6053_v43  ;;  %v2247_v45 = vmul.f32 %v2210_v38, %v6068_v2  ;;  %v2200_v3 = vld [vmem:[%s6859_s4 + $0x8] sm:$0xff]  ;;  %v2201_v43 = vld [vmem:[%s6859_s4 + $0x10] sm:$0xff]  ;;  %v2202_v2 = vld [vmem:[%s6859_s4 + $0x18] sm:$0xff] }
 0x55f   :  { %v2248_v59 = vmul.f32 %v2210_v38, %v6071_v62  ;;  %v2203_v62 = vld [vmem:[%s6859_s4 + $0x20] sm:$0xff] }
 0x560   :  { %2299 = vmatpush.msrb.mxu2 %v2253_v57  ;;  %2340 = vmatpush.msrb.mxu3 %v2254_v28  ;;  %v3251_v4 = vld [vmem:[%s6855_s0 + $0x60] sm:$0xff]  ;;  %v3252_v57 = vld [vmem:[%s6855_s0 + $0x68] sm:$0xff] }
 0x562   :  { %2300 = vmatpush.msrb.mxu2 %v2251_v22  ;;  %2341 = vmatpush.msrb.mxu3 %v2252_v5 }
 0x564   :  { %2301 = vmatpush.msrb.mxu2 %v2249_v48  ;;  %2342 = vmatpush.msrb.mxu3 %v2250_v47 }
 0x566   :  { %2302 = vmatpush.msrb.mxu2 %v2247_v45  ;;  %2343 = vmatpush.msrb.mxu3 %v2248_v59  ;;  %v7382_v59 = vld [vmem:[#allocation84_spill] sm:$0xff] }
 0x567   :  { %2855 = vmatmul.msk.f32.vlgmr.msrb.gmra.mxu2 %vm1863_vm7, %v2199_v30  ;;  %2863 = vmatmul.msk.f32.vlgmr.msrb.gmra.mxu3 %vm1863_vm7, %v2199_v30  ;;  %vm7383_vm12 = vcmp.lt.s32.totalorder %v7382_v59, 127  ;;  %vm7385_vm6 = vcmp.lt.s32.totalorder %v7382_v59, 1 }
 0x568   :  { %vm7384_vm0 = vmmov %vm7383_vm12 }
 0x569   :  { %vm7386_vm14 = vmmov %vm7385_vm6 }
 0x56a   :  { %vm7391_vm13 = vmmov %vm7385_vm6 }
 0x56b   :  { %vm7392_vm8 = vmmov %vm7385_vm6 }
 0x56c   :  { %vm7393_vm1 = vmmov %vm7384_vm0 }
 0x56d   :  { %vm7394_vm11 = vmmov %vm7384_vm0 }
 0x56e   :  { %vm7395_vm15 = vmmov %vm7385_vm6 }
 0x56f   :  { %2856 = vmatmul.msk.f32.gmra.mxu2 %vm1863_vm7, %v2200_v3  ;;  %2864 = vmatmul.msk.f32.gmra.mxu3 %vm1863_vm7, %v2200_v3  ;;  %vm7396_vm2 = vmmov %vm7385_vm6 }
 0x570   :  { %vm7397_vm3 = vmmov %vm7384_vm0 }
 0x577   :  { %2857 = vmatmul.msk.f32.gmra.mxu2 %vm1863_vm7, %v2201_v43  ;;  %2865 = vmatmul.msk.f32.gmra.mxu3 %vm1863_vm7, %v2201_v43 }
 0x57f   :  { %2858 = vmatmul.msk.f32.gmra.mxu2 %vm1863_vm7, %v2202_v2  ;;  %2866 = vmatmul.msk.f32.gmra.mxu3 %vm1863_vm7, %v2202_v2 }
 0x587   :  { %2859 = vmatmul.msk.f32.gmra.mxu2 %vm1863_vm7, %v2203_v62  ;;  %2867 = vmatmul.msk.f32.gmra.mxu3 %vm1863_vm7, %v2203_v62 }
 0x58f   :  { %2860 = vmatmul.msk.f32.gmra.mxu2 %vm1863_vm7, %v2204_v40  ;;  %2868 = vmatmul.msk.f32.gmra.mxu3 %vm1863_vm7, %v2204_v40 }
 0x597   :  { %2861 = vmatmul.msk.f32.gmra.mxu2 %vm1863_vm7, %v2205_v6  ;;  %2869 = vmatmul.msk.f32.gmra.mxu3 %vm1863_vm7, %v2205_v6 }
 0x59f   :  { %2862 = vmatmul.msk.f32.gmra.mxu2 %vm1863_vm7, %v2206_v54  ;;  %2870 = vmatmul.msk.f32.gmra.mxu3 %vm1863_vm7, %v2206_v54 }
 0x5ea   :  { %v2304_v29 = vpop.f32.mrf.mxu2  ;;  %v2345_v18 = vpop.f32.mrf.mxu3 }
 0x5eb   :  { %v6315_v1 = vadd.f32 %v3239_v32, %v2304_v29  ;;  %v6320_v17 = vadd.f32 %v3240_v0, %v2345_v18 }
 0x5ed   :  { %v2967_v34 = vpack.i.bf16 %v6320_v17, %v6315_v1 }
 0x5ef   :  { %2963 = vrot.lane.b32.xlu1 %v2967_v34, %s3288_s23  ;;  %2968 = vrot.lane.b32.xlu2 %v2967_v34, %s3290_s15 }
 0x5f2   :  { %v2307_v49 = vpop.f32.mrf.mxu2  ;;  %v2348_v39 = vpop.f32.mrf.mxu3 }
 0x5f3   :  { %v6329_v51 = vadd.f32 %v3241_v14, %v2307_v49  ;;  %v6334_v35 = vadd.f32 %v3242_v8, %v2348_v39 }
 0x5f5   :  { %v2977_v33 = vpack.i.bf16 %v6334_v35, %v6329_v51 }
 0x5f7   :  { %2973 = vrot.lane.b32.xlu0 %v2977_v33, %s3288_s23  ;;  %2978 = vrot.lane.b32.xlu1 %v2977_v33, %s3290_s15 }
 0x5fa   :  { %v2310_v61 = vpop.f32.mrf.mxu2  ;;  %v2351_v24 = vpop.f32.mrf.mxu3 }
 0x5fb   :  { %v6343_v58 = vadd.f32 %v3243_v10, %v2310_v61  ;;  %v6348_v23 = vadd.f32 %v3244_v19, %v2351_v24 }
 0x5fd   :  { %v2987_v21 = vpack.i.bf16 %v6348_v23, %v6343_v58 }
 0x5ff   :  { %2988 = vrot.lane.b32.xlu0 %v2987_v21, %s3290_s15  ;;  %2983 = vrot.lane.b32.xlu2 %v2987_v21, %s3288_s23 }
 0x602   :  { %v2313_v60 = vpop.f32.mrf.mxu2  ;;  %v2354_v37 = vpop.f32.mrf.mxu3 }
 0x603   :  { %v6357_v53 = vadd.f32 %v3245_v56, %v2313_v60  ;;  %v6362_v27 = vadd.f32 %v3246_v9, %v2354_v37 }
 0x605   :  { %v2997_v55 = vpack.i.bf16 %v6362_v27, %v6357_v53 }
 0x607   :  { %2993 = vrot.lane.b32.xlu1 %v2997_v55, %s3288_s23  ;;  %2998 = vrot.lane.b32.xlu2 %v2997_v55, %s3290_s15 }
 0x60a   :  { %v2316_v12 = vpop.f32.mrf.mxu2  ;;  %v2357_v44 = vpop.f32.mrf.mxu3 }
 0x60b   :  { %v6371_v41 = vadd.f32 %v3247_v16, %v2316_v12  ;;  %v6376_v63 = vadd.f32 %v3248_v7, %v2357_v44 }
 0x60d   :  { %v3007_v52 = vpack.i.bf16 %v6376_v63, %v6371_v41 }
 0x60f   :  { %3003 = vrot.lane.b32.xlu0 %v3007_v52, %s3288_s23  ;;  %3008 = vrot.lane.b32.xlu1 %v3007_v52, %s3290_s15 }
 0x612   :  { %v2319_v11 = vpop.f32.mrf.mxu2  ;;  %v2360_v42 = vpop.f32.mrf.mxu3 }
 0x613   :  { %v6385_v50 = vadd.f32 %v3249_v31, %v2319_v11  ;;  %v6390_v25 = vadd.f32 %v3250_v13, %v2360_v42 }
 0x615   :  { %v3017_v15 = vpack.i.bf16 %v6390_v25, %v6385_v50 }
 0x617   :  { %3018 = vrot.lane.b32.xlu0 %v3017_v15, %s3290_s15  ;;  %3013 = vrot.lane.b32.xlu2 %v3017_v15, %s3288_s23 }
 0x61a   :  { %v2322_v26 = vpop.f32.mrf.mxu2  ;;  %v2363_v20 = vpop.f32.mrf.mxu3 }
 0x61b   :  { %v6399_v36 = vadd.f32 %v3251_v4, %v2322_v26  ;;  %v6404_v28 = vadd.f32 %v3252_v57, %v2363_v20 }
 0x61d   :  { %v6408_v46 = vpack.i.bf16 %v6404_v28, %v6399_v36 }
 0x61f   :  { %3023 = vrot.lane.b32.xlu0 %v6408_v46, %s3288_s23 }
 0x622   :  { %v2325_v26 = vpop.f32.mrf.mxu2  ;;  %v2366_v20 = vpop.f32.mrf.mxu3 }
 0x649   :  { %v2969_v22 = vpop.permute.xlu2 %2968 }
 0x64a   :  { %v2971_v5 = vunpack.i.h.bf16 %v2969_v22  ;;  %v2970_v38 = vunpack.i.l.bf16 %v2969_v22 }
 0x64c   :  { %v2497_v30 = vsel %vm7383_vm12, %v2970_v38, %v2971_v5  ;;  %v2505_v3 = vsel %vm7384_vm0, %v2971_v5, %v2970_v38  ;;  %v3253_v38 = vld [vmem:[%s6855_s0 + $0x70] sm:$0xff]  ;;  %vm7398_vm12 = vmmov %vm7384_vm0 }
 0x64d   :  { %v2513_v34 = vsel %vm4006_vm4, %v2497_v30, -3.4028235e+38  ;;  %v2514_v39 = vsel %vm4019_vm5, %v2505_v3, -3.4028235e+38 }
 0x659   :  { %v2984_v29 = vpop.permute.xlu2 %2983 }
 0x65a   :  { %v2986_v33 = vunpack.i.h.bf16 %v2984_v29  ;;  %v2985_v61 = vunpack.i.l.bf16 %v2984_v29 }
 0x65c   :  { %v2419_v12 = vsel %vm7395_vm15, %v2985_v61, %v2986_v33  ;;  %v2427_v52 = vsel %vm7396_vm2, %v2986_v33, %v2985_v61  ;;  %vm7405_vm15 = vmmov %vm7384_vm0 }
 0x65d   :  { %v2437_v4 = vsel %vm4072_vm9, %v2427_v52, -3.4028235e+38  ;;  %v2438_v57 = vsel %vm4076_vm10, %v2419_v12, -3.4028235e+38 }
 0x65e   :  { %v2453_v30 = vmax.f32 %v6343_v58, %v2437_v4  ;;  %v2454_v3 = vmax.f32 %v6348_v23, %v2438_v57 }
 0x661   :  { %v2964_v48 = vpop.permute.xlu1 %2963 }
 0x662   :  { %v2966_v47 = vunpack.i.h.bf16 %v2964_v48  ;;  %v2965_v45 = vunpack.i.l.bf16 %v2964_v48  ;;  %v6473_v48 = vadd.f32 %v3253_v38, %v2325_v26 }
 0x664   :  { %v2417_v43 = vsel %vm7385_vm6, %v2965_v45, %v2966_v47  ;;  %v2425_v2 = vsel %vm7386_vm14, %v2966_v47, %v2965_v45  ;;  %v3254_v47 = vld [vmem:[%s6855_s0 + $0x78] sm:$0xff]  ;;  %vm7399_vm6 = vmmov %vm7384_vm0 }
 0x665   :  { %v2433_v40 = vsel %vm4072_vm9, %v2425_v2, -3.4028235e+38  ;;  %v2434_v54 = vsel %vm4076_vm10, %v2417_v43, -3.4028235e+38  ;;  %v6478_v45 = vadd.f32 %v3254_v47, %v2366_v20  ;;  %v2999_v43 = vpop.permute.xlu2 %2998  ;;  %vm7400_vm14 = vmmov %vm7396_vm2 }
 0x666   :  { %v2449_v18 = vmax.f32 %v6315_v1, %v2433_v40  ;;  %v2450_v32 = vmax.f32 %v6320_v17, %v2434_v54  ;;  %v3001_v54 = vunpack.i.h.bf16 %v2999_v43  ;;  %v3000_v29 = vunpack.i.l.bf16 %v2999_v43 }
 0x668   :  { %v6430_v14 = vmax.f32 %v2449_v18, %v2513_v34  ;;  %v6432_v8 = vmax.f32 %v2450_v32, %v2514_v39  ;;  %v2500_v34 = vsel %vm7384_vm0, %v3000_v29, %v3001_v54  ;;  %v3052_v39 = vpack.i.bf16 %v6478_v45, %v6473_v48 }
 0x669   :  { %v2974_v24 = vpop.permute.xlu0 %2973  ;;  %v2979_v10 = vpop.permute.xlu1 %2978  ;;  %v2508_v61 = vsel %vm7399_vm6, %v3001_v54, %v3000_v29  ;;  %vm7409_vm6 = vcmp.lt.s32.totalorder %v7382_v59, 112 }
 0x66a   :  { %v2976_v19 = vunpack.i.h.bf16 %v2974_v24  ;;  %v2975_v21 = vunpack.i.l.bf16 %v2974_v24  ;;  %v2981_v60 = vunpack.i.h.bf16 %v2979_v10  ;;  %v2980_v1 = vunpack.i.l.bf16 %v2979_v10 }
 0x66b   :  { %v3027_v17 = vpack.i.bf16 %v6432_v8, %v6430_v14 }
 0x66c   :  { %v2418_v37 = vsel %vm7391_vm13, %v2975_v21, %v2976_v19  ;;  %v2426_v56 = vsel %vm7392_vm8, %v2976_v19, %v2975_v21  ;;  %v2498_v9 = vsel %vm7393_vm1, %v2980_v1, %v2981_v60  ;;  %v2506_v55 = vsel %vm7394_vm11, %v2981_v60, %v2980_v1  ;;  %vm7401_vm13 = vmmov %vm7396_vm2 }
 0x66d   :  { %v2435_v44 = vsel %vm4072_vm9, %v2426_v56, -3.4028235e+38  ;;  %v2436_v16 = vsel %vm4076_vm10, %v2418_v37, -3.4028235e+38  ;;  %v2515_v7 = vsel %vm4006_vm4, %v2498_v9, -3.4028235e+38  ;;  %3028 = vrot.lane.b32.xlu1 %v3027_v17, %s3284_s17  ;;  %3043 = vrot.lane.b32.xlu2 %v3027_v17, %s3293_s27  ;;  %vm7402_vm8 = vmmov %vm7396_vm2 }
 0x66e   :  { %v2451_v11 = vmax.f32 %v6329_v51, %v2435_v44  ;;  %v2452_v42 = vmax.f32 %v6334_v35, %v2436_v16  ;;  %v2516_v31 = vsel %vm4019_vm5, %v2506_v55, -3.4028235e+38  ;;  %v2520_v1 = vsel %vm4019_vm5, %v2508_v61, -3.4028235e+38  ;;  %vm7403_vm1 = vmmov %vm7396_vm2 }
 0x66f   :  { %vm7404_vm11 = vmmov %vm7384_vm0 }
 0x670   :  { %v6460_v13 = vmax.f32 %v2451_v11, %v2515_v7  ;;  %v6462_v15 = vmax.f32 %v2452_v42, %v2516_v31  ;;  %vm7406_vm2 = vmmov %vm7403_vm1 }
 0x671   :  { %v2989_v22 = vpop.permute.xlu0 %2988  ;;  %v3014_v56 = vpop.permute.xlu2 %3013 }
 0x672   :  { %v2991_v5 = vunpack.i.h.bf16 %v2989_v22  ;;  %v2990_v51 = vunpack.i.l.bf16 %v2989_v22  ;;  %v3047_v35 = vpack.i.bf16 %v6462_v15, %v6460_v13  ;;  %v3016_v16 = vunpack.i.h.bf16 %v3014_v56 }
 0x673   :  { %v3015_v7 = vunpack.i.l.bf16 %v3014_v56  ;;  %v2733_v56 = vld [vmem:[%s6860_s5 + $0xe0] sm:$0xff] }
 0x674   :  { %v2499_v2 = vsel %vm7397_vm3, %v2990_v51, %v2991_v5  ;;  %v2507_v40 = vsel %vm7398_vm12, %v2991_v5, %v2990_v51  ;;  %3058 = vrot.lane.b32.xlu0 %v3047_v35, %s3293_s27  ;;  %vm7407_vm3 = vmmov %vm7403_vm1 }
 0x675   :  { %v2517_v18 = vsel %vm4006_vm4, %v2499_v2, -3.4028235e+38  ;;  %v2518_v32 = vsel %vm4019_vm5, %v2507_v40, -3.4028235e+38  ;;  %3048 = vrot.lane.b32.xlu2 %v3047_v35, %s3284_s17  ;;  %3033 = vrot.lane.b32.xlu1 %v6408_v46, %s3290_s15  ;;  %v2519_v46 = vsel %vm4006_vm4, %v2500_v34, -3.4028235e+38  ;;  %v2422_v5 = vsel %vm7406_vm2, %v3015_v7, %v3016_v16  ;;  %vm7408_vm12 = vmmov %vm7384_vm0 }
 0x676   :  { %v6494_v58 = vmax.f32 %v2453_v30, %v2517_v18  ;;  %v6496_v23 = vmax.f32 %v2454_v3, %v2518_v32  ;;  %v2430_v47 = vsel %vm7407_vm3, %v3016_v16, %v3015_v7  ;;  %v2444_v29 = vsel %vm4076_vm10, %v2422_v5, -3.4028235e+38  ;;  %v2716_v16 = vld [vmem:[%s6860_s5 + $0x58] sm:$0xff]  ;;  %v2731_v7 = vld [vmem:[%s6860_s5 + $0xd0] sm:$0xff]  ;;  %v2725_v5 = vld [vmem:[%s6860_s5 + $0xa0] sm:$0xff] }
 0x677   :  { %v2443_v54 = vsel %vm4072_vm9, %v2430_v47, -3.4028235e+38  ;;  %v2723_v47 = vld [vmem:[%s6860_s5 + $0x90] sm:$0xff] }
 0x678   :  { %v3062_v19 = vpack.i.bf16 %v6496_v23, %v6494_v58  ;;  %v2459_v34 = vmax.f32 %v6385_v50, %v2443_v54  ;;  %v2721_v54 = vld [vmem:[%s6860_s5 + $0x80] sm:$0xff] }
 0x679   :  { %v2994_v33 = vpop.permute.xlu1 %2993 }
 0x67a   :  { %v2996_v24 = vunpack.i.h.bf16 %v2994_v33  ;;  %v2995_v10 = vunpack.i.l.bf16 %v2994_v33 }
 0x67c   :  { %v2420_v21 = vsel %vm7400_vm14, %v2995_v10, %v2996_v24  ;;  %v2428_v60 = vsel %vm7401_vm13, %v2996_v24, %v2995_v10  ;;  %3063 = vrot.lane.b32.xlu0 %v3062_v19, %s3284_s17  ;;  %vm7410_vm14 = vcmp.lt.s32.totalorder %v7382_v59, 16 }
 0x67d   :  { %v2439_v17 = vsel %vm4072_vm9, %v2428_v60, -3.4028235e+38  ;;  %v2440_v37 = vsel %vm4076_vm10, %v2420_v21, -3.4028235e+38  ;;  %3053 = vrot.lane.b32.xlu2 %v3052_v39, %s3290_s15  ;;  %3038 = vrot.lane.b32.xlu1 %v3052_v39, %s3288_s23  ;;  %v2460_v39 = vmax.f32 %v6390_v25, %v2444_v29  ;;  %v2736_v25 = vld [vmem:[%s6860_s5 + $0xf8] sm:$0xff]  ;;  %v2735_v60 = vld [vmem:[%s6860_s5 + $0xf0] sm:$0xff]  ;;  %vm7411_vm13 = vmmov %vm7410_vm14 }
 0x67e   :  { %v2455_v9 = vmax.f32 %v6357_v53, %v2439_v17  ;;  %v2456_v55 = vmax.f32 %v6362_v27, %v2440_v37  ;;  %v2720_v21 = vld [vmem:[%s6860_s5 + $0x78] sm:$0xff]  ;;  %2778 = vmatpush.msrb.mxu1 %v2736_v25  ;;  %v2734_v17 = vld [vmem:[%s6860_s5 + $0xe8] sm:$0xff]  ;;  %v2705_v29 = vld [vmem:[%s6860_s5] sm:$0xff] }
 0x67f   :  { %2737 = vmatpush.msra.mxu0 %v2720_v21  ;;  %v2718_v37 = vld [vmem:[%s6860_s5 + $0x68] sm:$0xff]  ;;  %vm7418_vm3 = vmmov %vm7411_vm13 }
 0x680   :  { %v6523_v12 = vmax.f32 %v2455_v9, %v2519_v46  ;;  %v6525_v44 = vmax.f32 %v2456_v55, %v2520_v1  ;;  %v2719_v1 = vld [vmem:[%s6860_s5 + $0x70] sm:$0xff]  ;;  %2779 = vmatpush.msrb.mxu1 %v2735_v60  ;;  %v2717_v9 = vld [vmem:[%s6860_s5 + $0x60] sm:$0xff]  ;;  %v2732_v55 = vld [vmem:[%s6860_s5 + $0xd8] sm:$0xff] }
 0x681   :  { %v3004_v52 = vpop.permute.xlu0 %3003  ;;  %v3009_v11 = vpop.permute.xlu1 %3008  ;;  %2738 = vmatpush.msra.mxu0 %v2719_v1 }
 0x682   :  { %v3006_v42 = vunpack.i.h.bf16 %v3004_v52  ;;  %v3005_v31 = vunpack.i.l.bf16 %v3004_v52  ;;  %v3011_v26 = vunpack.i.h.bf16 %v3009_v11  ;;  %v3010_v20 = vunpack.i.l.bf16 %v3009_v11  ;;  %2780 = vmatpush.msrb.mxu1 %v2734_v17  ;;  %v2715_v52 = vld [vmem:[%s6860_s5 + $0x50] sm:$0xff]  ;;  %v2730_v11 = vld [vmem:[%s6860_s5 + $0xc8] sm:$0xff] }
 0x683   :  { %v3077_v4 = vpack.i.bf16 %v6525_v44, %v6523_v12  ;;  %2739 = vmatpush.msra.mxu0 %v2718_v37 }
 0x684   :  { %v2421_v53 = vsel %vm7402_vm8, %v3005_v31, %v3006_v42  ;;  %v2429_v27 = vsel %vm7403_vm1, %v3006_v42, %v3005_v31  ;;  %v2501_v57 = vsel %vm7404_vm11, %v3010_v20, %v3011_v26  ;;  %v2509_v22 = vsel %vm7405_vm15, %v3011_v26, %v3010_v20  ;;  %2781 = vmatpush.msrb.mxu1 %v2733_v56  ;;  %v2714_v42 = vld [vmem:[%s6860_s5 + $0x48] sm:$0xff]  ;;  %v2729_v31 = vld [vmem:[%s6860_s5 + $0xc0] sm:$0xff]  ;;  %v2728_v20 = vld [vmem:[%s6860_s5 + $0xb8] sm:$0xff] }
 0x685   :  { %v2441_v51 = vsel %vm4072_vm9, %v2429_v27, -3.4028235e+38  ;;  %v2442_v35 = vsel %vm4076_vm10, %v2421_v53, -3.4028235e+38  ;;  %v2521_v38 = vsel %vm4006_vm4, %v2501_v57, -3.4028235e+38  ;;  %3078 = vrot.lane.b32.xlu0 %v3077_v4, %s3293_s27  ;;  %3073 = vrot.lane.b32.xlu2 %v3077_v4, %s3284_s17  ;;  %vm7412_vm8 = vmmov %vm7403_vm1 }
 0x686   :  { %v2457_v30 = vmax.f32 %v6371_v41, %v2441_v51  ;;  %v2458_v3 = vmax.f32 %v6376_v63, %v2442_v35  ;;  %v2522_v43 = vsel %vm4019_vm5, %v2509_v22, -3.4028235e+38  ;;  %3068 = vrot.lane.b32.xlu1 %v3062_v19, %s3293_s27  ;;  %2740 = vmatpush.msra.mxu0 %v2717_v9  ;;  %v2713_v26 = vld [vmem:[%s6860_s5 + $0x40] sm:$0xff]  ;;  %v2712_v4 = vld [vmem:[%s6860_s5 + $0x38] sm:$0xff]  ;;  %v2727_v53 = vld [vmem:[%s6860_s5 + $0xb0] sm:$0xff]  ;;  %vm7413_vm1 = vcmp.ge.s32.totalorder %v7382_v59, 16 }
 0x687   :  { %2782 = vmatpush.msrb.mxu1 %v2732_v55  ;;  %v2711_v27 = vld [vmem:[%s6860_s5 + $0x30] sm:$0xff]  ;;  %v2726_v57 = vld [vmem:[%s6860_s5 + $0xa8] sm:$0xff]  ;;  %v2709_v51 = vld [vmem:[%s6860_s5 + $0x20] sm:$0xff] }
 0x688   :  { %v6554_v2 = vmax.f32 %v2457_v30, %v2521_v38  ;;  %v6556_v40 = vmax.f32 %v2458_v3, %v2522_v43  ;;  %2741 = vmatpush.msra.mxu0 %v2716_v16  ;;  %v2710_v22 = vld [vmem:[%s6860_s5 + $0x28] sm:$0xff]  ;;  %v2724_v35 = vld [vmem:[%s6860_s5 + $0x98] sm:$0xff]  ;;  %v2707_v30 = vld [vmem:[%s6860_s5 + $0x10] sm:$0xff] }
 0x689   :  { %v3019_v18 = vpop.permute.xlu0 %3018  ;;  %2783 = vmatpush.msrb.mxu1 %v2731_v7  ;;  %v2708_v38 = vld [vmem:[%s6860_s5 + $0x18] sm:$0xff]  ;;  %v2722_v3 = vld [vmem:[%s6860_s5 + $0x88] sm:$0xff]  ;;  %vm7414_vm11 = vmmov %vm7406_vm2 }
 0x68a   :  { %v3021_v32 = vunpack.i.h.bf16 %v3019_v18  ;;  %v3020_v41 = vunpack.i.l.bf16 %v3019_v18  ;;  %v3087_v63 = vpack.i.bf16 %v6556_v40, %v6554_v2  ;;  %2742 = vmatpush.msra.mxu0 %v2715_v52  ;;  %v2706_v43 = vld [vmem:[%s6860_s5 + $0x8] sm:$0xff]  ;;  %v7415_v55 = vld [vmem:[#allocation92_spill] sm:$0xff]  ;;  %vm7417_vm2 = vmmov %vm7409_vm6  ;;  %s3299_s5 = smov [#allocation2]  }
 0x68b   :  { %2784 = vmatpush.msrb.mxu1 %v2730_v11  ;;  %vm7416_vm15 = vcmp.lt.s32.totalorder %v7415_v55, 240 }
 0x68c   :  { %v2502_v33 = vsel %vm7408_vm12, %v3020_v41, %v3021_v32  ;;  %v2510_v61 = vsel %vm7384_vm0, %v3021_v32, %v3020_v41  ;;  %2743 = vmatpush.msra.mxu0 %v2714_v42  ;;  %vm7419_vm12 = vmmov %vm7418_vm3 }
 0x68d   :  { %v2523_v24 = vsel %vm4006_vm4, %v2502_v33, -3.4028235e+38  ;;  %v2524_v10 = vsel %vm4019_vm5, %v2510_v61, -3.4028235e+38  ;;  %3088 = vrot.lane.b32.xlu2 %v3087_v63, %s3293_s27  ;;  %2785 = vmatpush.msrb.mxu1 %v2729_v31  ;;  %vm7420_vm0 = vmmov %vm7417_vm2 }
 0x68e   :  { %v6575_v19 = vmax.f32 %v2459_v34, %v2523_v24  ;;  %v6577_v46 = vmax.f32 %v2460_v39, %v2524_v10  ;;  %3083 = vrot.lane.b32.xlu1 %v3087_v63, %s3284_s17  ;;  %2744 = vmatpush.msra.mxu0 %v2713_v26 }
 0x68f   :  { %2786 = vmatpush.msrb.mxu1 %v2728_v20 }
 0x690   :  { %v3092_v50 = vpack.i.bf16 %v6577_v46, %v6575_v19  ;;  %2745 = vmatpush.msra.mxu0 %v2712_v4 }
 0x691   :  { %2787 = vmatpush.msrb.mxu1 %v2727_v53  ;;  %v3024_v32 = vpop.permute.xlu0 %3023 }
 0x692   :  { %3093 = vrot.lane.b32.xlu0 %v3092_v50, %s3284_s17  ;;  %2746 = vmatpush.msra.mxu0 %v2711_v27  ;;  %v3026_v34 = vunpack.i.h.bf16 %v3024_v32  ;;  %v3025_v39 = vunpack.i.l.bf16 %v3024_v32 }
 0x693   :  { %2788 = vmatpush.msrb.mxu1 %v2726_v57 }
 0x694   :  { %2747 = vmatpush.msra.mxu0 %v2710_v22  ;;  %v2431_v17 = vsel %vm7412_vm8, %v3026_v34, %v3025_v39  ;;  %v2423_v9 = vsel %vm7414_vm11, %v3025_v39, %v3026_v34  ;;  %vm7424_vm8 = vmmov %vm7416_vm15 }
 0x695   :  { %2789 = vmatpush.msrb.mxu1 %v2725_v5  ;;  %v2445_v42 = vsel %vm4072_vm9, %v2431_v17, -3.4028235e+38  ;;  %v2446_v4 = vsel %vm4076_vm10, %v2423_v9, -3.4028235e+38 }
 0x696   :  { %3098 = vrot.lane.b32.xlu1 %v3092_v50, %s3293_s27  ;;  %2748 = vmatpush.msra.mxu0 %v2709_v51  ;;  %v2461_v5 = vmax.f32 %v6399_v36, %v2445_v42 }
 0x697   :  { %2790 = vmatpush.msrb.mxu1 %v2724_v35 }
 0x698   :  { %2749 = vmatpush.msra.mxu0 %v2708_v38 }
 0x699   :  { %2791 = vmatpush.msrb.mxu1 %v2723_v47  ;;  %v2462_v47 = vmax.f32 %v6404_v28, %v2446_v4 }
 0x69a   :  { %2750 = vmatpush.msra.mxu0 %v2707_v30 }
 0x69b   :  { %2792 = vmatpush.msrb.mxu1 %v2722_v3 }
 0x69c   :  { %2751 = vmatpush.msra.mxu0 %v2706_v43 }
 0x69d   :  { %2793 = vmatpush.msrb.mxu1 %v2721_v54 }
 0x69e   :  { %2752 = vmatpush.msra.mxu0 %v2705_v29 }
 0x6c7   :  { %v3044_v18 = vpop.permute.xlu2 %3043 }
 0x6c8   :  { %v3046_v41 = vunpack.i.h.bf16 %v3044_v18  ;;  %v3045_v63 = vunpack.i.l.bf16 %v3044_v18 }
 0x6ca   :  { %v2665_v50 = vsel %vm7409_vm6, %v3046_v41, %v3045_v63  ;;  %v2657_v11 = vsel %vm7417_vm2, %v3045_v63, %v3046_v41  ;;  %vm7421_vm6 = vmmov %vm7413_vm1  ;;  %vm7428_vm2 = vcmp.lt.s32.totalorder %v7382_v59, 1 }
 0x6cb   :  { %v2674_v16 = vsel %vm7416_vm15, %v2665_v50, -3.4028235e+38 }
 0x6cf   :  { %v3049_v33 = vpop.permute.xlu2 %3048 }
 0x6d0   :  { %v3051_v25 = vunpack.i.h.bf16 %v3049_v33  ;;  %v3050_v21 = vunpack.i.l.bf16 %v3049_v33 }
 0x6d2   :  { %v2578_v26 = vsel %vm7418_vm3, %v3050_v21, %v3051_v25  ;;  %v2586_v20 = vsel %vm7419_vm12, %v3051_v25, %v3050_v21  ;;  %vm7429_vm3 = vmmov %vm7428_vm2 }
 0x6d3   :  { %v2612_v51 = vmax.f32 %v6462_v15, %v2578_v26  ;;  %v2595_v38 = vsel %vm7421_vm6, %v2586_v20, -3.4028235e+38 }
 0x6d4   :  { %v2611_v41 = vmax.f32 %v6460_v13, %v2595_v38 }
 0x6d7   :  { %v3054_v30 = vpop.permute.xlu2 %3053 }
 0x6d8   :  { %v3056_v63 = vunpack.i.h.bf16 %v3054_v30  ;;  %v3055_v34 = vunpack.i.l.bf16 %v3054_v30 }
 0x6df   :  { %v3029_v61 = vpop.permute.xlu1 %3028  ;;  %v3074_v42 = vpop.permute.xlu2 %3073 }
 0x6e0   :  { %v3031_v24 = vunpack.i.h.bf16 %v3029_v61  ;;  %v3030_v10 = vunpack.i.l.bf16 %v3029_v61 }
 0x6e2   :  { %v2577_v60 = vsel %vm7410_vm14, %v3030_v10, %v3031_v24  ;;  %v2585_v1 = vsel %vm7411_vm13, %v3031_v24, %v3030_v10  ;;  %vm7422_vm14 = vcmp.lt.s32.totalorder %v7382_v59, 127 }
 0x6e3   :  { %v2610_v37 = vmax.f32 %v6432_v8, %v2577_v60  ;;  %v2593_v56 = vsel %vm7413_vm1, %v2585_v1, -3.4028235e+38  ;;  %vm7423_vm13 = vmmov %vm7422_vm14 }
 0x6e4   :  { %v2609_v7 = vmax.f32 %v6430_v14, %v2593_v56  ;;  %vm7425_vm1 = vmmov %vm7420_vm0 }
 0x6e5   :  { %v2690_v52 = vmax.f32 %v2610_v37, %v2674_v16  ;;  %vm7426_vm11 = vmmov %vm7423_vm13 }
 0x6e6   :  { %v3059_v31 = vpop.permute.xlu0 %3058  ;;  %v2689_v8 = vmax.f32 %v2609_v7, %v2657_v11  ;;  %v2504_v13 = vsel %vm7426_vm11, %v3055_v34, %v3056_v63  ;;  %vm7427_vm15 = vmmov %vm7426_vm11 }
 0x6e7   :  { %2794 = vmatmul.f32.vlgmr.msrb.gmra.mxu1 %v2690_v52  ;;  %v3034_v14 = vpop.permute.xlu1 %3033  ;;  %v3061_v53 = vunpack.i.h.bf16 %v3059_v31  ;;  %v3060_v27 = vunpack.i.l.bf16 %v3059_v31  ;;  %v2512_v60 = vsel %vm7427_vm15, %v3056_v63, %v3055_v34  ;;  %v2527_v52 = vsel %vm4006_vm4, %v2504_v13, -3.4028235e+38 }
 0x6e8   :  { %v3036_v57 = vunpack.i.h.bf16 %v3034_v14  ;;  %v3035_v22 = vunpack.i.l.bf16 %v3034_v14  ;;  %2753 = vmatmul.f32.vlgmr.msra.gmra.mxu0 %v2689_v8  ;;  %v2528_v11 = vsel %vm4019_vm5, %v2512_v60, -3.4028235e+38  ;;  %v3075_v8 = vunpack.i.l.bf16 %v3074_v42 }
 0x6e9   :  { %v2666_v35 = vsel %vm7420_vm0, %v3061_v53, %v3060_v27  ;;  %v2658_v28 = vsel %vm7425_vm1, %v3060_v27, %v3061_v53 }
 0x6ea   :  { %v2503_v3 = vsel %vm7422_vm14, %v3035_v22, %v3036_v57  ;;  %v2511_v43 = vsel %vm7423_vm13, %v3036_v57, %v3035_v22  ;;  %v2676_v36 = vsel %vm7424_vm8, %v2666_v35, -3.4028235e+38  ;;  %v2691_v33 = vmax.f32 %v2611_v41, %v2658_v28  ;;  %vm7437_vm13 = vmmov %vm7425_vm1 }
 0x6eb   :  { %v2525_v15 = vsel %vm4006_vm4, %v2503_v3, -3.4028235e+38  ;;  %v2526_v54 = vsel %vm4019_vm5, %v2511_v43, -3.4028235e+38  ;;  %v2692_v29 = vmax.f32 %v2612_v51, %v2676_v36  ;;  %vm7432_vm4 = vmmov %vm7420_vm0 }
 0x6ec   :  { %v6725_v18 = vmax.f32 %v2461_v5, %v2525_v15  ;;  %v6727_v32 = vmax.f32 %v2462_v47, %v2526_v54  ;;  %vm7433_vm5 = vmmov %vm7420_vm0  ;;  %v3089_v54 = vpop.permute.xlu2 %3088 }
 0x6ed   :  { %vm7434_vm0 = vmmov %vm7424_vm8 }
 0x6ee   :  { %v3064_v39 = vpop.permute.xlu0 %3063  ;;  %v3107_v61 = vpack.i.bf16 %v6727_v32, %v6725_v18  ;;  %vm7439_vm11 = vmmov %vm7434_vm0 }
 0x6ef   :  { %2797 = vmatmul.f32.gmra.mxu1 %v2692_v29  ;;  %v3039_v24 = vpop.permute.xlu1 %3038  ;;  %v3066_v10 = vunpack.i.h.bf16 %v3064_v39  ;;  %v3065_v50 = vunpack.i.l.bf16 %v3064_v39 }
 0x6f0   :  { %v3041_v25 = vunpack.i.h.bf16 %v3039_v24  ;;  %v3040_v21 = vunpack.i.l.bf16 %v3039_v24  ;;  %2756 = vmatmul.f32.gmra.mxu0 %v2691_v33  ;;  %3108 = vrot.lane.b32.xlu0 %v3107_v61, %s3293_s27  ;;  %v3091_v33 = vunpack.i.h.bf16 %v3089_v54 }
 0x6f1   :  { %3103 = vrot.lane.b32.xlu2 %v3107_v61, %s3284_s17  ;;  %v2587_v7 = vsel %vm7419_vm12, %v3066_v10, %v3065_v50  ;;  %v3090_v61 = vunpack.i.l.bf16 %v3089_v54 }
 0x6f2   :  { %v2424_v1 = vsel %vm7428_vm2, %v3040_v21, %v3041_v25  ;;  %v2432_v17 = vsel %vm7429_vm3, %v3041_v25, %v3040_v21 }
 0x6f3   :  { %v2447_v37 = vsel %vm4072_vm9, %v2432_v17, -3.4028235e+38  ;;  %v2448_v56 = vsel %vm4076_vm10, %v2424_v1, -3.4028235e+38  ;;  %vm7430_vm9 = vmmov %vm7421_vm6 }
 0x6f4   :  { %v2463_v9 = vmax.f32 %v6473_v48, %v2447_v37  ;;  %v2464_v16 = vmax.f32 %v6478_v45, %v2448_v56  ;;  %v2597_v6 = vsel %vm7430_vm9, %v2587_v7, -3.4028235e+38  ;;  %vm7431_vm10 = vmmov %vm7419_vm12  ;;  %v3076_v45 = vunpack.i.h.bf16 %v3074_v42 }
 0x6f5   :  { %v2579_v48 = vsel %vm7431_vm10, %v3065_v50, %v3066_v10  ;;  %v2613_v14 = vmax.f32 %v6494_v58, %v2597_v6  ;;  %vm7435_vm6 = vmmov %vm7431_vm10 }
 0x6f6   :  { %v6754_v31 = vmax.f32 %v2463_v9, %v2527_v52  ;;  %v6756_v62 = vmax.f32 %v2464_v16, %v2528_v11  ;;  %v2614_v53 = vmax.f32 %v6496_v23, %v2579_v48  ;;  %v2588_v38 = vsel %vm7435_vm6, %v3076_v45, %v3075_v8  ;;  %vm7436_vm14 = vmmov %vm7430_vm9 }
 0x6f7   :  { %v3079_v26 = vpop.permute.xlu0 %3078  ;;  %v2599_v58 = vsel %vm7436_vm14, %v2588_v38, -3.4028235e+38  ;;  %vm7438_vm8 = vmmov %vm7435_vm6 }
 0x6f8   :  { %v3069_v20 = vpop.permute.xlu1 %3068  ;;  %v3117_v0 = vpack.i.bf16 %v6756_v62, %v6754_v31  ;;  %v3081_v27 = vunpack.i.h.bf16 %v3079_v26  ;;  %v3080_v57 = vunpack.i.l.bf16 %v3079_v26  ;;  %v2580_v3 = vsel %vm7438_vm8, %v3075_v8, %v3076_v45  ;;  %vm7440_vm15 = vmmov %vm7435_vm6 }
 0x6f9   :  { %v3071_v49 = vunpack.i.h.bf16 %v3069_v20  ;;  %v3070_v4 = vunpack.i.l.bf16 %v3069_v20  ;;  %v2615_v29 = vmax.f32 %v6523_v12, %v2599_v58  ;;  %v2616_v41 = vmax.f32 %v6525_v44, %v2580_v3  ;;  %vm7441_vm2 = vmmov %vm7430_vm9 }
 0x6fa   :  { %3118 = vrot.lane.b32.xlu2 %v3117_v0, %s3293_s27  ;;  %3113 = vrot.lane.b32.xlu1 %v3117_v0, %s3284_s17  ;;  %v2668_v23 = vsel %vm7437_vm13, %v3081_v27, %v3080_v57  ;;  %v2660_v15 = vsel %vm7425_vm1, %v3080_v57, %v3081_v27  ;;  %vm7442_vm3 = vmmov %vm7435_vm6  ;;  %s2831_s17 = sshll.u32 %s3299_s5, 4  ;;  %s2832_s17 = int_to_ptr.vmem [resolvable:$true] %s2831_s17 }
 0x6fb   :  { %v2659_v22 = vsel %vm7432_vm4, %v3070_v4, %v3071_v49  ;;  %v2667_v5 = vsel %vm7433_vm5, %v3071_v49, %v3070_v4  ;;  %v2680_v28 = vsel %vm7439_vm11, %v2668_v23, -3.4028235e+38  ;;  %v2695_v39 = vmax.f32 %v2615_v29, %v2660_v15  ;;  %vm7443_vm12 = vmmov %vm7425_vm1 }
 0x6fc   :  { %v2693_v51 = vmax.f32 %v2613_v14, %v2659_v22  ;;  %v2678_v35 = vsel %vm7434_vm0, %v2667_v5, -3.4028235e+38  ;;  %v2696_v24 = vmax.f32 %v2616_v41, %v2680_v28  ;;  %v2669_v60 = vsel %vm7443_vm12, %v3091_v33, %v3090_v61  ;;  %vm7444_vm9 = vmmov %vm7442_vm3 }
 0x6fd   :  { %v2694_v47 = vmax.f32 %v2614_v53, %v2678_v35  ;;  %vm7445_vm10 = vmmov %vm7425_vm1 }
 0x6fe   :  { %2759 = vmatmul.f32.gmra.mxu0 %v2693_v51  ;;  %v2661_v56 = vsel %vm7445_vm10, %v3090_v61, %v3091_v33  ;;  %vm7446_vm4 = vmmov %vm7434_vm0 }
 0x6ff   :  { %2800 = vmatmul.f32.gmra.mxu1 %v2694_v47  ;;  %v2682_v16 = vsel %vm7446_vm4, %v2669_v60, -3.4028235e+38  ;;  %vm7447_vm5 = vmmov %vm7441_vm2 }
 0x700   :  { %v3084_v30 = vpop.permute.xlu1 %3083  ;;  %vm7448_vm0 = vmmov %vm7442_vm3 }
 0x701   :  { %v3086_v43 = vunpack.i.h.bf16 %v3084_v30  ;;  %v3085_v36 = vunpack.i.l.bf16 %v3084_v30  ;;  %vm7449_vm6 = vmmov %vm7425_vm1 }
 0x702   :  { %vm7450_vm14 = vmmov %vm7425_vm1 }
 0x703   :  { %v2589_v63 = vsel %vm7440_vm15, %v3086_v43, %v3085_v36  ;;  %v2581_v12 = vsel %vm7442_vm3, %v3085_v36, %v3086_v43  ;;  %vm7451_vm13 = vmmov %vm7446_vm4 }
 0x704   :  { %v3094_v34 = vpop.permute.xlu0 %3093  ;;  %v2601_v10 = vsel %vm7441_vm2, %v2589_v63, -3.4028235e+38  ;;  %v2618_v13 = vmax.f32 %v6556_v40, %v2581_v12  ;;  %vm7452_vm8 = vmmov %vm7448_vm0 }
 0x705   :  { %v3096_v50 = vunpack.i.h.bf16 %v3094_v34  ;;  %v3095_v25 = vunpack.i.l.bf16 %v3094_v34  ;;  %v2617_v44 = vmax.f32 %v6554_v2, %v2601_v10  ;;  %vm7453_vm1 = vmmov %vm7441_vm2 }
 0x706   :  { %2762 = vmatmul.f32.gmra.mxu0 %v2695_v39  ;;  %v2698_v7 = vmax.f32 %v2618_v13, %v2682_v16  ;;  %vm7454_vm11 = vmmov %vm7448_vm0 }
 0x707   :  { %2803 = vmatmul.f32.gmra.mxu1 %v2696_v24  ;;  %v2590_v1 = vsel %vm7444_vm9, %v3096_v50, %v3095_v25  ;;  %v2697_v9 = vmax.f32 %v2617_v44, %v2661_v56  ;;  %v2582_v40 = vsel %vm7448_vm0, %v3095_v25, %v3096_v50  ;;  %vm7455_vm15 = vmmov %vm7449_vm6 }
 0x708   :  { %v3099_v21 = vpop.permute.xlu1 %3098  ;;  %v2603_v2 = vsel %vm7447_vm5, %v2590_v1, -3.4028235e+38  ;;  %v2620_v6 = vmax.f32 %v6577_v46, %v2582_v40  ;;  %vm7456_vm2 = vmmov %vm7449_vm6 }
 0x709   :  { %v3101_v17 = vunpack.i.h.bf16 %v3099_v21  ;;  %v3100_v37 = vunpack.i.l.bf16 %v3099_v21  ;;  %v2619_v11 = vmax.f32 %v6575_v19, %v2603_v2  ;;  %vm7457_vm3 = vmmov %vm7446_vm4 }
 0x70a   :  { %vm7458_vm12 = vmmov %vm7456_vm2 }
 0x70b   :  { %v2670_v52 = vsel %vm7449_vm6, %v3101_v17, %v3100_v37  ;;  %v2662_v42 = vsel %vm7450_vm14, %v3100_v37, %v3101_v17  ;;  %vm7459_vm9 = vmmov %vm7448_vm0 }
 0x70c   :  { %v2684_v48 = vsel %vm7451_vm13, %v2670_v52, -3.4028235e+38  ;;  %v2699_v45 = vmax.f32 %v2619_v11, %v2662_v42  ;;  %vm7460_vm10 = vmmov %vm7448_vm0 }
 0x70d   :  { %v2700_v8 = vmax.f32 %v2620_v6, %v2684_v48  ;;  %vm7461_vm4 = vmmov %vm7453_vm1 }
 0x70e   :  { %2765 = vmatmul.f32.gmra.mxu0 %v2697_v9  ;;  %vm7462_vm5 = vmmov %vm7457_vm3 }
 0x70f   :  { %2806 = vmatmul.f32.gmra.mxu1 %v2698_v7  ;;  %vm7463_vm0 = vmmov %vm7456_vm2 }
 0x716   :  { %2768 = vmatmul.f32.gmra.mxu0 %v2699_v45 }
 0x717   :  { %2809 = vmatmul.f32.gmra.mxu1 %v2700_v8 }
 0x74b   :  { %v3104_v26 = vpop.permute.xlu2 %3103 }
 0x74c   :  { %v3106_v20 = vunpack.i.h.bf16 %v3104_v26  ;;  %v3105_v0 = vunpack.i.l.bf16 %v3104_v26 }
 0x74e   :  { %v2591_v49 = vsel %vm7452_vm8, %v3106_v20, %v3105_v0  ;;  %v2583_v46 = vsel %vm7454_vm11, %v3105_v0, %v3106_v20 }
 0x74f   :  { %v2605_v19 = vsel %vm7453_vm1, %v2591_v49, -3.4028235e+38  ;;  %v2622_v51 = vmax.f32 %v6727_v32, %v2583_v46 }
 0x750   :  { %v2621_v57 = vmax.f32 %v6725_v18, %v2605_v19 }
 0x754   :  { %v3119_v23 = vpop.permute.xlu2 %3118 }
 0x755   :  { %v3121_v18 = vunpack.i.h.bf16 %v3119_v23  ;;  %v3120_v3 = vunpack.i.l.bf16 %v3119_v23 }
 0x757   :  { %v2672_v28 = vsel %vm7458_vm12, %v3121_v18, %v3120_v3  ;;  %v2664_v10 = vsel %vm7463_vm0, %v3120_v3, %v3121_v18 }
 0x758   :  { %v2688_v33 = vsel %vm7462_vm5, %v2672_v28, -3.4028235e+38 }
 0x762   :  { %v3109_v4 = vpop.permute.xlu0 %3108 }
 0x763   :  { %v3111_v14 = vunpack.i.h.bf16 %v3109_v4  ;;  %v3110_v53 = vunpack.i.l.bf16 %v3109_v4 }
 0x764   :  { %v2795_v27 = vpop.f32.mrf.mxu1 }
 0x765   :  { %v2754_v22 = vpop.f32.mrf.mxu0  ;;  %v2663_v5 = vsel %vm7455_vm15, %v3110_v53, %v3111_v14  ;;  %v2671_v35 = vsel %vm7456_vm2, %v3111_v14, %v3110_v53 }
 0x766   :  { %v2796_v38 = vadd.f32 %v2795_v27, %v2754_v22  ;;  %v2701_v47 = vmax.f32 %v2621_v57, %v2663_v5  ;;  %v2686_v58 = vsel %vm7457_vm3, %v2671_v35, -3.4028235e+38 }
 0x767   :  { %v2702_v30 = vmax.f32 %v2622_v51, %v2686_v58 }
 0x768   :  { %2819 = vst.msk [vmem:[#allocation2] sm:$0xff] %vm1863_vm7, %v2796_v38  ;;  %2771 = vmatmul.f32.gmra.mxu0 %v2701_v47 }
 0x769   :  { %2812 = vmatmul.f32.gmra.mxu1 %v2702_v30 }
 0x76c   :  { %v2798_v43 = vpop.f32.mrf.mxu1  ;;  %v3114_v36 = vpop.permute.xlu1 %3113 }
 0x76d   :  { %v3116_v15 = vunpack.i.h.bf16 %v3114_v36  ;;  %v3115_v32 = vunpack.i.l.bf16 %v3114_v36  ;;  %v2757_v54 = vpop.f32.mrf.mxu0 }
 0x76e   :  { %v2799_v29 = vadd.f32 %v2798_v43, %v2757_v54 }
 0x76f   :  { %v2592_v41 = vsel %vm7459_vm9, %v3116_v15, %v3115_v32  ;;  %v2584_v63 = vsel %vm7460_vm10, %v3115_v32, %v3116_v15 }
 0x770   :  { %2820 = vst.msk [vmem:[#allocation2 + $0x8] sm:$0xff] %vm1863_vm7, %v2799_v29  ;;  %v2624_v34 = vmax.f32 %v6756_v62, %v2584_v63  ;;  %v2607_v39 = vsel %vm7461_vm4, %v2592_v41, -3.4028235e+38 }
 0x771   :  { %v2623_v61 = vmax.f32 %v6754_v31, %v2607_v39 }
 0x772   :  { %v2704_v24 = vmax.f32 %v2624_v34, %v2688_v33 }
 0x773   :  { %v2703_v50 = vmax.f32 %v2623_v61, %v2664_v10 }
 0x774   :  { %2815 = vmatmul.f32.gmra.mxu1 %v2704_v24 }
 0x775   :  { %2774 = vmatmul.f32.gmra.mxu0 %v2703_v50 }
 0x77b   :  { %v2760_v25 = vpop.f32.mrf.mxu0 }
 0x77c   :  { %v2801_v12 = vpop.f32.mrf.mxu1 }
 0x77d   :  { %v2802_v21 = vadd.f32 %v2801_v12, %v2760_v25 }
 0x77f   :  { %2821 = vst.msk [vmem:[#allocation2 + $0x10] sm:$0xff] %vm1863_vm7, %v2802_v21 }
 0x783   :  { %v2763_v62 = vpop.f32.mrf.mxu0 }
 0x784   :  { %v2804_v44 = vpop.f32.mrf.mxu1 }
 0x785   :  { %v2805_v13 = vadd.f32 %v2804_v44, %v2763_v62 }
 0x787   :  { %2822 = vst.msk [vmem:[#allocation2 + $0x18] sm:$0xff] %vm1863_vm7, %v2805_v13 }
 0x78b   :  { %v2766_v55 = vpop.f32.mrf.mxu0 }
 0x78c   :  { %v2807_v60 = vpop.f32.mrf.mxu1 }
 0x78d   :  { %v2808_v31 = vadd.f32 %v2807_v60, %v2766_v55 }
 0x78f   :  { %2823 = vst.msk [vmem:[#allocation2 + $0x20] sm:$0xff] %vm1863_vm7, %v2808_v31 }
 0x793   :  { %v2769_v59 = vpop.f32.mrf.mxu0 }
 0x794   :  { %v2810_v1 = vpop.f32.mrf.mxu1 }
 0x795   :  { %v2811_v17 = vadd.f32 %v2810_v1, %v2769_v59 }
 0x797   :  { %2824 = vst.msk [vmem:[#allocation2 + $0x28] sm:$0xff] %vm1863_vm7, %v2811_v17 }
 0x7e5   :  { %v2772_v37 = vpop.f32.mrf.mxu0 }
 0x7e6   :  { %v2813_v56 = vpop.f32.mrf.mxu1 }
 0x7e7   :  { %v2814_v9 = vadd.f32 %v2813_v56, %v2772_v37 }
 0x7e9   :  { %2825 = vst.msk [vmem:[#allocation2 + $0x30] sm:$0xff] %vm1863_vm7, %v2814_v9 }
 0x7f1   :  { %v2816_v16 = vpop.f32.mrf.mxu1 }
 0x7f2   :  { %v2775_v7 = vpop.f32.mrf.mxu0 }
 0x7f3   :  { %v2817_v2 = vadd.f32 %v2816_v16, %v2775_v7 }
 0x7f5   :  { %2826 = vst.msk [vmem:[#allocation2 + $0x38] sm:$0xff] %vm1863_vm7, %v2817_v2 }
 0x7f6   :  { %2839 = dma.vmem_to_hbm [thread:$0]  %s2832_s17, 1024, %s2834_s14, [#allocation3], %s3300_s16, %s3300_s16, %s3301_s18  }
 0x7f7   :  { %3279 = dma.done.wait [#allocation3], 1024  }
 0x7f8   :  { %3280 = vsyncadd [#allocation3], 4294966272 }
 0x7f9   :  { %2844 = vsyncpa [#allocation3], 1 }

</bundles_post_ra>
